<compile_context>
chip_gen: v5e
topology: v5e:2x2
jax: 0.10.0
libtpu: 0.0.40
codegen_flags: <defaults>
</compile_context>

<pallas_src>
import functools

import jax
import jax.numpy as jnp
from jax.experimental import pallas as pl
from jax.experimental.pallas import tpu as pltpu


# ------------------------------------------------------------------ per-generation tuning
def _tpu_generation():
    try:
        kind = jax.devices()[0].device_kind.lower()
    except Exception:
        return 0
    for g in (7, 6, 5):
        if "v%d" % g in kind:
            return g
    return 0


_GEN = _tpu_generation()
_TWO_TC = (_GEN == 7)                                   # v7x: 2 TensorCores per chip
_VMEM_LIMIT = (96 if _GEN in (5, 6) else 32) * 1024 * 1024   # 128 MiB parts get 96 MiB
_TM_DEFAULT = 512 if _GEN in (5, 6) else 256                 # bigger row tiles on v5e/v6e


def _compiler_params():
    return pltpu.CompilerParams(dimension_semantics=("parallel",),
                                vmem_limit_bytes=_VMEM_LIMIT)


def _round_up(x, m):
    return ((x + m - 1) // m) * m


def _row_tile(M):
    if M > _TM_DEFAULT:
        return _TM_DEFAULT
    # On v7x guarantee >= 2 grid steps so both TensorCores are used.
    if _TWO_TC and M > 8:
        return _round_up(pl.cdiv(M, 2), 8)
    return M


def _attn_batch_tile(B, S, threeD, itemsize):
    per_batch = max(S * threeD * itemsize, 1)
    bt = max(1, min(B, (512 * 1024) // per_batch))      # aim for ~0.5 MiB input blocks
    if _TWO_TC and B >= 2:
        bt = min(bt, pl.cdiv(B, 2))                     # keep >= 2 grid steps on v7x
    return bt


def _resident(shape):
    # Weight / bias / LN-param blocks: same block for every row-tile grid step (VMEM resident).
    return pl.BlockSpec(shape, lambda i: (0,) * len(shape))


# ------------------------------------------------------------------ in-kernel helpers (f32)
def _erf(x):
    # Abramowitz & Stegun 7.1.26 polynomial, |err| <= 1.5e-7.
    p = 0.3275911
    a1, a2, a3, a4, a5 = (0.254829592, -0.284496736, 1.421413741,
                          -1.453152027, 1.061405429)
    ax = jnp.abs(x)
    t = 1.0 / (1.0 + p * ax)
    poly = ((((a5 * t + a4) * t + a3) * t + a2) * t + a1) * t
    y = 1.0 - poly * jnp.exp(-ax * ax)
    return jnp.where(x >= 0.0, y, -y)


def _gelu_exact(x):
    return 0.5 * x * (1.0 + _erf(x * 0.7071067811865476))


def _layernorm(x, gamma, beta, eps):
    mean = jnp.mean(x, axis=-1, keepdims=True)
    var = jnp.mean((x - mean) ** 2, axis=-1, keepdims=True)
    return (x - mean) * jax.lax.rsqrt(var + eps) * gamma + beta


# ----------------------------------------------------------------------------- kernels
def _linear_kernel(x_ref, w_ref, b_ref, o_ref):
    # out = x @ W + b   (bf16 MXU operands, f32 accumulation)
    x = x_ref[...].astype(jnp.bfloat16)
    acc = jnp.dot(x, w_ref[...], preferred_element_type=jnp.float32)
    o_ref[...] = (acc + b_ref[...]).astype(o_ref.dtype)


def _ln_linear_kernel(x_ref, g_ref, beta_ref, w_ref, b_ref, o_ref, *, eps):
    # out = LayerNorm(x) @ W + b
    x = x_ref[...].astype(jnp.float32)
    h = _layernorm(x, g_ref[...], beta_ref[...], eps).astype(jnp.bfloat16)
    acc = jnp.dot(h, w_ref[...], preferred_element_type=jnp.float32) + b_ref[...]
    o_ref[...] = acc.astype(o_ref.dtype)


def _attention_kernel(qkv_ref, o_ref, *, num_heads, head_dim):
    # qkv block: (Bt, S, 3*D), head-major layout [(q_h|k_h|v_h) per head];
    # softmax scale is already folded into the q projection weights.
    for h in range(num_heads):                          # static unroll over heads
        lo = 3 * head_dim * h
        q = qkv_ref[:, :, lo:lo + head_dim].astype(jnp.bfloat16)
        k = qkv_ref[:, :, lo + head_dim:lo + 2 * head_dim].astype(jnp.bfloat16)
        v = qkv_ref[:, :, lo + 2 * head_dim:lo + 3 * head_dim].astype(jnp.bfloat16)
        s = jnp.einsum('bqd,bkd->bqk', q, k,
                       preferred_element_type=jnp.float32)          # (Bt,S,S) f32
        s = s - jnp.max(s, axis=-1, keepdims=True)
        p = jnp.exp(s)
        p = p * pl.reciprocal(jnp.sum(p, axis=-1, keepdims=True), approx=True)
        out = jnp.einsum('bqk,bkd->bqd', p.astype(jnp.bfloat16), v,
                         preferred_element_type=jnp.float32)
        # Per-head store straight into the lane-dense (Bt, S, D) output block:
        # bounds live ranges, no final lane-concatenate relayout.
        o_ref[:, :, h * head_dim:(h + 1) * head_dim] = out.astype(o_ref.dtype)


def _proj_res_ln_fc1_kernel(attn_ref, pw_ref, pb_ref, res_ref,
                            g_ref, beta_ref, w1_ref, b1_ref,
                            xo_ref, h_ref, *, eps):
    # x_new = attn @ Wproj + bproj + residual ; h = GELU(LN2(x_new) @ Wfc1 + bfc1)
    attn = attn_ref[...].astype(jnp.bfloat16)
    x = jnp.dot(attn, pw_ref[...], preferred_element_type=jnp.float32) + pb_ref[...]
    x = x + res_ref[...].astype(jnp.float32)
    xo_ref[...] = x.astype(xo_ref.dtype)
    hn = _layernorm(x, g_ref[...], beta_ref[...], eps).astype(jnp.bfloat16)
    acc = jnp.dot(hn, w1_ref[...], preferred_element_type=jnp.float32) + b1_ref[...]
    h_ref[...] = _gelu_exact(acc).astype(h_ref.dtype)


def _fc2_res_ln_linear_kernel(h_ref, w2_ref, b2_ref, res_ref,
                              g_ref, beta_ref, w_ref, bias_ref,
                              xo_ref, o_ref, *, eps):
    # x_new = h @ Wfc2 + bfc2 + residual ; out = LN(x_new) @ W + b
    # (W is either the next block's QKV projection or the final prediction head.)
    h = h_ref[...].astype(jnp.bfloat16)
    x = jnp.dot(h, w2_ref[...], preferred_element_type=jnp.float32) + b2_ref[...]
    x = x + res_ref[...].astype(jnp.float32)
    xo_ref[...] = x.astype(xo_ref.dtype)
    y = _layernorm(x, g_ref[...], beta_ref[...], eps).astype(jnp.bfloat16)
    acc = jnp.dot(y, w_ref[...], preferred_element_type=jnp.float32) + bias_ref[...]
    o_ref[...] = acc.astype(o_ref.dtype)


# --------------------------------------------------------------------------- wrappers
def pallas_linear(x2d, w, b):
    M, K = x2d.shape
    N = w.shape[1]
    tm = _row_tile(M)
    return pl.pallas_call(
        _linear_kernel,
        out_shape=jax.ShapeDtypeStruct((M, N), x2d.dtype),
        grid=(pl.cdiv(M, tm),),
        in_specs=[pl.BlockSpec((tm, K), lambda i: (i, 0)),
                  _resident((K, N)), _resident((1, N))],
        out_specs=pl.BlockSpec((tm, N), lambda i: (i, 0)),
        compiler_params=_compiler_params(),
    )(x2d, w, b.reshape(1, N))


def pallas_ln_linear(x2d, gamma, beta, w, b, *, eps=1e-5):
    M, K = x2d.shape
    N = w.shape[1]
    tm = _row_tile(M)
    return pl.pallas_call(
        functools.partial(_ln_linear_kernel, eps=eps),
        out_shape=jax.ShapeDtypeStruct((M, N), x2d.dtype),
        grid=(pl.cdiv(M, tm),),
        in_specs=[pl.BlockSpec((tm, K), lambda i: (i, 0)),
                  _resident((1, K)), _resident((1, K)),
                  _resident((K, N)), _resident((1, N))],
        out_specs=pl.BlockSpec((tm, N), lambda i: (i, 0)),
        compiler_params=_compiler_params(),
    )(x2d, gamma.reshape(1, K), beta.reshape(1, K), w, b.reshape(1, N))


def pallas_attention(qkv, *, num_heads, head_dim):
    B, S, threeD = qkv.shape
    D = num_heads * head_dim
    bt = _attn_batch_tile(B, S, threeD, qkv.dtype.itemsize)
    return pl.pallas_call(
        functools.partial(_attention_kernel, num_heads=num_heads, head_dim=head_dim),
        out_shape=jax.ShapeDtypeStruct((B, S, D), qkv.dtype),
        grid=(pl.cdiv(B, bt),),
        in_specs=[pl.BlockSpec((bt, S, threeD), lambda i: (i, 0, 0))],
        out_specs=pl.BlockSpec((bt, S, D), lambda i: (i, 0, 0)),
        compiler_params=_compiler_params(),
    )(qkv)


def pallas_proj_res_ln_fc1(attn2d, pw, pb, res2d, gamma, beta, w1, b1, *, eps=1e-5):
    M, D = attn2d.shape
    Hd = w1.shape[1]
    tm = _row_tile(M)
    return pl.pallas_call(
        functools.partial(_proj_res_ln_fc1_kernel, eps=eps),
        out_shape=(jax.ShapeDtypeStruct((M, D), res2d.dtype),
                   jax.ShapeDtypeStruct((M, Hd), res2d.dtype)),
        grid=(pl.cdiv(M, tm),),
        in_specs=[pl.BlockSpec((tm, D), lambda i: (i, 0)),
                  _resident((D, D)), _resident((1, D)),
                  pl.BlockSpec((tm, D), lambda i: (i, 0)),
                  _resident((1, D)), _resident((1, D)),
                  _resident((D, Hd)), _resident((1, Hd))],
        out_specs=(pl.BlockSpec((tm, D), lambda i: (i, 0)),
                   pl.BlockSpec((tm, Hd), lambda i: (i, 0))),
        compiler_params=_compiler_params(),
    )(attn2d, pw, pb.reshape(1, D), res2d,
      gamma.reshape(1, D), beta.reshape(1, D), w1, b1.reshape(1, Hd))


def pallas_fc2_res_ln_linear(hh, w2, b2, res2d, gamma, beta, w, b, *, eps=1e-5):
    M, Hd = hh.shape
    D = w2.shape[1]
    N = w.shape[1]
    tm = _row_tile(M)
    return pl.pallas_call(
        functools.partial(_fc2_res_ln_linear_kernel, eps=eps),
        out_shape=(jax.ShapeDtypeStruct((M, D), res2d.dtype),
                   jax.ShapeDtypeStruct((M, N), res2d.dtype)),
        grid=(pl.cdiv(M, tm),),
        in_specs=[pl.BlockSpec((tm, Hd), lambda i: (i, 0)),
                  _resident((Hd, D)), _resident((1, D)),
                  pl.BlockSpec((tm, D), lambda i: (i, 0)),
                  _resident((1, D)), _resident((1, D)),
                  _resident((D, N)), _resident((1, N))],
        out_specs=(pl.BlockSpec((tm, D), lambda i: (i, 0)),
                   pl.BlockSpec((tm, N), lambda i: (i, 0))),
        compiler_params=_compiler_params(),
    )(hh, w2, b2.reshape(1, D), res2d,
      gamma.reshape(1, D), beta.reshape(1, D), w, b.reshape(1, N))


# ---------------------------------------------------------------------- model forward
def masked_decoder_forward(params, x, ids_restore, *, num_heads):
    """Mirrors MaskedDecoder.forward. x: (B, len_keep+1, in_chans), ids_restore: (B, L)."""
    B, Lk, Cin = x.shape
    D = params["embed_w"].shape[1]
    L = ids_restore.shape[1]
    Dh = D // num_heads

    # decoder_embed
    x = pallas_linear(x.reshape(B * Lk, Cin), params["embed_w"], params["embed_b"])
    x = x.reshape(B, Lk, D)

    # append mask tokens and un-shuffle with ids_restore
    # TODO(synk): data-dependent token un-shuffle (gather) stays in plain JAX glue.
    n_mask = L + 1 - Lk
    mask_tokens = jnp.broadcast_to(params["mask_token"], (B, n_mask, D))
    x_ = jnp.concatenate([x[:, 1:, :], mask_tokens], axis=1)          # (B, L, D)
    x_ = jnp.take_along_axis(x_, ids_restore[:, :, None], axis=1)     # gather along seq
    x = jnp.concatenate([x[:, :1, :], x_], axis=1)                    # (B, L+1, D)
    x = x + params["pos_embed"]

    S = L + 1
    M = B * S
    x2d = x.reshape(M, D)
    blocks = params["blocks"]
    depth = len(blocks)

    # first block's LN1 + QKV projection
    qkv = pallas_ln_linear(x2d, blocks[0]["ln1_g"], blocks[0]["ln1_b"],
                           blocks[0]["qkv_w"], blocks[0]["qkv_b"])

    out2d = None
    for i, blk in enumerate(blocks):
        attn = pallas_attention(qkv.reshape(B, S, 3 * D),
                                num_heads=num_heads, head_dim=Dh)     # (B, S, D)
        # proj + residual fused with LN2 + FC1 + exact GELU
        x2d, hh = pallas_proj_res_ln_fc1(
            attn.reshape(M, D), blk["proj_w"], blk["proj_b"], x2d,
            blk["ln2_g"], blk["ln2_b"], blk["fc1_w"], blk["fc1_b"])
        if i + 1 < depth:
            # FC2 + residual fused with the next block's LN1 + QKV
            nxt = blocks[i + 1]
            x2d, qkv = pallas_fc2_res_ln_linear(
                hh, blk["fc2_w"], blk["fc2_b"], x2d,
                nxt["ln1_g"], nxt["ln1_b"], nxt["qkv_w"], nxt["qkv_b"])
        else:
            # last block: FC2 + residual fused with the final LayerNorm + prediction head
            _, out2d = pallas_fc2_res_ln_linear(
                hh, blk["fc2_w"], blk["fc2_b"], x2d,
                params["norm_g"], params["norm_b"],
                params["pred_w"], params["pred_b"])

    out = out2d.reshape(B, S, -1)
    return out[:, 1:, :]                                              # drop cls token


# ----------------------------------------------------------------------- param init/prep
def init_params(key, encoder_in_chans, in_chans, out_chans, patch_size,
                num_patches, depth, mlp_ratio):
    D = out_chans
    pred_out = patch_size ** 2 * encoder_in_chans

    def nrm(k, shape, std=0.02):
        return std * jax.random.normal(k, shape, jnp.float32)

    keys = jax.random.split(key, 4 + depth)
    params = {
        "embed_w": nrm(jax.random.fold_in(keys[0], 0), (in_chans, D)),
        "embed_b": jnp.zeros((D,), jnp.float32),
        "mask_token": nrm(keys[1], (1, 1, D)),
        "pos_embed": nrm(keys[2], (1, num_patches + 1, D)),
        "norm_g": jnp.ones((D,), jnp.float32),
        "norm_b": jnp.zeros((D,), jnp.float32),
        "pred_w": nrm(jax.random.fold_in(keys[3], 0), (D, pred_out)),
        "pred_b": jnp.zeros((pred_out,), jnp.float32),
        "blocks": [],
    }
    hidden = mlp_ratio * D
    for d in range(depth):
        bk = jax.random.split(keys[4 + d], 4)
        params["blocks"].append({
            "ln1_g": jnp.ones((D,), jnp.float32),
            "ln1_b": jnp.zeros((D,), jnp.float32),
            "qkv_w": nrm(bk[0], (D, 3 * D)),
            "qkv_b": jnp.zeros((3 * D,), jnp.float32),
            "proj_w": nrm(bk[1], (D, D)),
            "proj_b": jnp.zeros((D,), jnp.float32),
            "ln2_g": jnp.ones((D,), jnp.float32),
            "ln2_b": jnp.zeros((D,), jnp.float32),
            "fc1_w": nrm(bk[2], (D, hidden)),
            "fc1_b": jnp.zeros((hidden,), jnp.float32),
            "fc2_w": nrm(bk[3], (hidden, D)),
            "fc2_b": jnp.zeros((D,), jnp.float32),
        })
    return params


def prepare_params(params, num_heads):
    """One-time parameter prep: fold the softmax scale into the q projection, permute QKV
    columns to head-major [(q_h|k_h|v_h) per head] layout, and cast matmul weights to bf16
    (biases / LN params / embeddings stay f32)."""
    D = params["embed_w"].shape[1]
    Dh = D // num_heads
    scale = Dh ** -0.5
    perm = jnp.asarray([part * D + h * Dh + j
                        for h in range(num_heads)
                        for part in range(3)
                        for j in range(Dh)], jnp.int32)
    bf16 = lambda w: w.astype(jnp.bfloat16)

    out = dict(params)
    out["embed_w"] = bf16(params["embed_w"])
    out["pred_w"] = bf16(params["pred_w"])
    new_blocks = []
    for blk in params["blocks"]:
        qw = blk["qkv_w"].at[:, :D].multiply(scale)      # fold softmax scale into q cols
        qb = blk["qkv_b"].at[:D].multiply(scale)
        nb = dict(blk)
        nb["qkv_w"] = bf16(qw[:, perm])
        nb["qkv_b"] = qb[perm]
        nb["proj_w"] = bf16(blk["proj_w"])
        nb["fc1_w"] = bf16(blk["fc1_w"])
        nb["fc2_w"] = bf16(blk["fc2_w"])
        new_blocks.append(nb)
    out["blocks"] = new_blocks
    return out


# --------------------------------------------------------------------------------- main
if __name__ == "__main__":
    # small config consistent with the module's __init__
    encoder_in_chans = 3
    in_chans = 32          # encoder embed dim feeding the decoder
    out_chans = 32         # decoder embed dim
    patch_size = 4
    num_patches = 16
    num_heads = 4
    depth = 2
    mlp_ratio = 4
    B = 2
    len_keep = 8           # visible (kept) patches from the encoder

    root = jax.random.PRNGKey(0)
    k_params, k_x, k_ids = jax.random.split(root, 3)

    params = init_params(k_params, encoder_in_chans, in_chans, out_chans,
                         patch_size, num_patches, depth, mlp_ratio)
    params = prepare_params(params, num_heads)

    # encoder output: cls token + visible patches
    x = jax.random.normal(k_x, (B, len_keep + 1, in_chans), jnp.float32)
    # ids_restore: per-batch permutation of patch indices
    ids_restore = jnp.stack(
        [jax.random.permutation(jax.random.fold_in(k_ids, i), num_patches)
         for i in range(B)]
    ).astype(jnp.int32)

    fwd = jax.jit(functools.partial(masked_decoder_forward, num_heads=num_heads))
    out = fwd(params, x, ids_restore)
    out = jax.block_until_ready(out)

    expected = (B, num_patches, patch_size ** 2 * encoder_in_chans)
    assert out.shape == expected, (out.shape, expected)
    assert bool(jnp.all(jnp.isfinite(out)))
    print("KERNEL_OK")
</pallas_src>

<mosaic_0001>
module attributes {stable_mosaic.version = 11 : i64} {
  func.func @_linear_kernel(%arg0: i32, %arg1: memref<18x32xf32, #tpu.memory_space<vmem>>, %arg2: memref<32x32xbf16, #tpu.memory_space<vmem>>, %arg3: memref<1x32xf32, #tpu.memory_space<vmem>>, %arg4: memref<18x32xf32, #tpu.memory_space<vmem>>) attributes {dimension_semantics = [#tpu.dimension_semantics<parallel>], iteration_bounds = array<i64: 1>, scalar_prefetch = 0 : i64, scratch_operands = 0 : i64, tpu.core_type = #tpu.core_type<tc>, window_params = [{transform_indices = @transform_0, window_bounds = array<i64: 18, 32>}, {pipeline_mode = #tpu.pipeline_mode<synchronous>, transform_indices = @transform_1, window_bounds = array<i64: 32, 32>}, {pipeline_mode = #tpu.pipeline_mode<synchronous>, transform_indices = @transform_2, window_bounds = array<i64: 1, 32>}, {transform_indices = @transform_3, window_bounds = array<i64: 18, 32>}]} {
    %c0 = arith.constant 0 : index
    %c0_0 = arith.constant 0 : index
    %0 = vector.load %arg1[%c0, %c0_0] : memref<18x32xf32, #tpu.memory_space<vmem>>, vector<18x32xf32>
    %1 = arith.truncf %0 : vector<18x32xf32> to vector<18x32xbf16>
    %c0_1 = arith.constant 0 : index
    %c0_2 = arith.constant 0 : index
    %2 = vector.load %arg2[%c0_1, %c0_2] : memref<32x32xbf16, #tpu.memory_space<vmem>>, vector<32x32xbf16>
    %cst = arith.constant dense<0.000000e+00> : vector<18x32xf32>
    %3 = tpu.matmul %1, %2, %cst {dimension_numbers = #tpu.dot_dimension_numbers<[1], [0], [0], [1], [0, 0, 1, 1], [], []>} : vector<18x32xbf16>, vector<32x32xbf16>, vector<18x32xf32> -> vector<18x32xf32>
    %c0_3 = arith.constant 0 : index
    %c0_4 = arith.constant 0 : index
    %4 = vector.load %arg3[%c0_3, %c0_4] : memref<1x32xf32, #tpu.memory_space<vmem>>, vector<1x32xf32>
    %5 = vector.broadcast %4 : vector<1x32xf32> to vector<18x32xf32>
    %6 = arith.addf %3, %5 : vector<18x32xf32>
    %c0_5 = arith.constant 0 : index
    %c0_6 = arith.constant 0 : index
    %7 = vector.load %arg4[%c0_5, %c0_6] : memref<18x32xf32, #tpu.memory_space<vmem>>, vector<18x32xf32>
    tpu.vector_store %arg4[%c0_5, %c0_6], %6 {strides = array<i32>} : memref<18x32xf32, #tpu.memory_space<vmem>>, vector<18x32xf32>,
    return
  }
  func.func @transform_0(%arg0: i32) -> (i32, i32) {
    %c0_i32 = arith.constant 0 : i32
    %c0_i32_0 = arith.constant 0 : i32
    return %arg0, %c0_i32 : i32, i32
  }
  func.func @transform_1(%arg0: i32) -> (i32, i32) {
    %c0_i32 = arith.constant 0 : i32
    %c0_i32_0 = arith.constant 0 : i32
    %c0_i32_1 = arith.constant 0 : i32
    return %c0_i32, %c0_i32_0 : i32, i32
  }
  func.func @transform_2(%arg0: i32) -> (i32, i32) {
    %c0_i32 = arith.constant 0 : i32
    %c0_i32_0 = arith.constant 0 : i32
    %c0_i32_1 = arith.constant 0 : i32
    return %c0_i32, %c0_i32_0 : i32, i32
  }
  func.func @transform_3(%arg0: i32) -> (i32, i32) {
    %c0_i32 = arith.constant 0 : i32
    %c0_i32_0 = arith.constant 0 : i32
    return %arg0, %c0_i32 : i32, i32
  }
}

module attributes {stable_mosaic.version = 11 : i64} {
  func.func @_ln_linear_kernel(%arg0: i32, %arg1: memref<34x32xf32, #tpu.memory_space<vmem>>, %arg2: memref<1x32xf32, #tpu.memory_space<vmem>>, %arg3: memref<1x32xf32, #tpu.memory_space<vmem>>, %arg4: memref<32x96xbf16, #tpu.memory_space<vmem>>, %arg5: memref<1x96xf32, #tpu.memory_space<vmem>>, %arg6: memref<34x96xf32, #tpu.memory_space<vmem>>) attributes {dimension_semantics = [#tpu.dimension_semantics<parallel>], iteration_bounds = array<i64: 1>, scalar_prefetch = 0 : i64, scratch_operands = 0 : i64, tpu.core_type = #tpu.core_type<tc>, window_params = [{transform_indices = @transform_0, window_bounds = array<i64: 34, 32>}, {pipeline_mode = #tpu.pipeline_mode<synchronous>, transform_indices = @transform_1, window_bounds = array<i64: 1, 32>}, {pipeline_mode = #tpu.pipeline_mode<synchronous>, transform_indices = @transform_2, window_bounds = array<i64: 1, 32>}, {pipeline_mode = #tpu.pipeline_mode<synchronous>, transform_indices = @transform_3, window_bounds = array<i64: 32, 96>}, {pipeline_mode = #tpu.pipeline_mode<synchronous>, transform_indices = @transform_4, window_bounds = array<i64: 1, 96>}, {transform_indices = @transform_5, window_bounds = array<i64: 34, 96>}]} {
    %c0 = arith.constant 0 : index
    %c0_0 = arith.constant 0 : index
    %0 = vector.load %arg1[%c0, %c0_0] : memref<34x32xf32, #tpu.memory_space<vmem>>, vector<34x32xf32>
    %c0_1 = arith.constant 0 : index
    %c0_2 = arith.constant 0 : index
    %1 = vector.load %arg2[%c0_1, %c0_2] : memref<1x32xf32, #tpu.memory_space<vmem>>, vector<1x32xf32>
    %c0_3 = arith.constant 0 : index
    %c0_4 = arith.constant 0 : index
    %2 = vector.load %arg3[%c0_3, %c0_4] : memref<1x32xf32, #tpu.memory_space<vmem>>, vector<1x32xf32>
    %cst = arith.constant dense<0.000000e+00> : vector<34xf32>
    %3 = vector.multi_reduction <add>, %0, %cst [1] : vector<34x32xf32> to vector<34xf32>
    %4 = vector.shape_cast %3 : vector<34xf32> to vector<34x1xf32>
    %cst_5 = arith.constant 3.200000e+01 : f32
    %5 = vector.broadcast %cst_5 : f32 to vector<34x1xf32>
    %6 = arith.divf %4, %5 : vector<34x1xf32>
    %7 = vector.broadcast %6 : vector<34x1xf32> to vector<34x32xf32>
    %8 = arith.subf %0, %7 : vector<34x32xf32>
    %9 = arith.mulf %8, %8 : vector<34x32xf32>
    %cst_6 = arith.constant dense<0.000000e+00> : vector<34xf32>
    %10 = vector.multi_reduction <add>, %9, %cst_6 [1] : vector<34x32xf32> to vector<34xf32>
    %11 = vector.shape_cast %10 : vector<34xf32> to vector<34x1xf32>
    %cst_7 = arith.constant 3.200000e+01 : f32
    %12 = vector.broadcast %cst_7 : f32 to vector<34x1xf32>
    %13 = arith.divf %11, %12 : vector<34x1xf32>
    %14 = vector.broadcast %6 : vector<34x1xf32> to vector<34x32xf32>
    %15 = arith.subf %0, %14 : vector<34x32xf32>
    %cst_8 = arith.constant 9.99999974E-6 : f32
    %16 = vector.broadcast %cst_8 : f32 to vector<34x1xf32>
    %17 = arith.addf %13, %16 : vector<34x1xf32>
    %18 = math.rsqrt %17 : vector<34x1xf32>
    %19 = vector.broadcast %18 : vector<34x1xf32> to vector<34x32xf32>
    %20 = arith.mulf %15, %19 : vector<34x32xf32>
    %21 = vector.broadcast %1 : vector<1x32xf32> to vector<34x32xf32>
    %22 = arith.mulf %20, %21 : vector<34x32xf32>
    %23 = vector.broadcast %2 : vector<1x32xf32> to vector<34x32xf32>
    %24 = arith.addf %22, %23 : vector<34x32xf32>
    %25 = arith.truncf %24 : vector<34x32xf32> to vector<34x32xbf16>
    %c0_9 = arith.constant 0 : index
    %c0_10 = arith.constant 0 : index
    %26 = vector.load %arg4[%c0_9, %c0_10] : memref<32x96xbf16, #tpu.memory_space<vmem>>, vector<32x96xbf16>
    %cst_11 = arith.constant dense<0.000000e+00> : vector<34x96xf32>
    %27 = tpu.matmul %25, %26, %cst_11 {dimension_numbers = #tpu.dot_dimension_numbers<[1], [0], [0], [1], [0, 0, 1, 1], [], []>} : vector<34x32xbf16>, vector<32x96xbf16>, vector<34x96xf32> -> vector<34x96xf32>
    %c0_12 = arith.constant 0 : index
    %c0_13 = arith.constant 0 : index
    %28 = vector.load %arg5[%c0_12, %c0_13] : memref<1x96xf32, #tpu.memory_space<vmem>>, vector<1x96xf32>
    %29 = vector.broadcast %28 : vector<1x96xf32> to vector<34x96xf32>
    %30 = arith.addf %27, %29 : vector<34x96xf32>
    %c0_14 = arith.constant 0 : index
    %c0_15 = arith.constant 0 : index
    %31 = vector.load %arg6[%c0_14, %c0_15] : memref<34x96xf32, #tpu.memory_space<vmem>>, vector<34x96xf32>
    tpu.vector_store %arg6[%c0_14, %c0_15], %30 {strides = array<i32>} : memref<34x96xf32, #tpu.memory_space<vmem>>, vector<34x96xf32>,
    return
  }
  func.func @transform_0(%arg0: i32) -> (i32, i32) {
    %c0_i32 = arith.constant 0 : i32
    %c0_i32_0 = arith.constant 0 : i32
    return %arg0, %c0_i32 : i32, i32
  }
  func.func @transform_1(%arg0: i32) -> (i32, i32) {
    %c0_i32 = arith.constant 0 : i32
    %c0_i32_0 = arith.constant 0 : i32
    %c0_i32_1 = arith.constant 0 : i32
    return %c0_i32, %c0_i32_0 : i32, i32
  }
  func.func @transform_2(%arg0: i32) -> (i32, i32) {
    %c0_i32 = arith.constant 0 : i32
    %c0_i32_0 = arith.constant 0 : i32
    %c0_i32_1 = arith.constant 0 : i32
    return %c0_i32, %c0_i32_0 : i32, i32
  }
  func.func @transform_3(%arg0: i32) -> (i32, i32) {
    %c0_i32 = arith.constant 0 : i32
    %c0_i32_0 = arith.constant 0 : i32
    %c0_i32_1 = arith.constant 0 : i32
    return %c0_i32, %c0_i32_0 : i32, i32
  }
  func.func @transform_4(%arg0: i32) -> (i32, i32) {
    %c0_i32 = arith.constant 0 : i32
    %c0_i32_0 = arith.constant 0 : i32
    %c0_i32_1 = arith.constant 0 : i32
    return %c0_i32, %c0_i32_0 : i32, i32
  }
  func.func @transform_5(%arg0: i32) -> (i32, i32) {
    %c0_i32 = arith.constant 0 : i32
    %c0_i32_0 = arith.constant 0 : i32
    return %arg0, %c0_i32 : i32, i32
  }
}

module attributes {stable_mosaic.version = 11 : i64} {
  func.func @_attention_kernel(%arg0: i32, %arg1: memref<2x17x96xf32, #tpu.memory_space<vmem>>, %arg2: memref<2x17x32xf32, #tpu.memory_space<vmem>>) attributes {dimension_semantics = [#tpu.dimension_semantics<parallel>], iteration_bounds = array<i64: 1>, scalar_prefetch = 0 : i64, scratch_operands = 0 : i64, tpu.core_type = #tpu.core_type<tc>, window_params = [{transform_indices = @transform_0, window_bounds = array<i64: 2, 17, 96>}, {transform_indices = @transform_1, window_bounds = array<i64: 2, 17, 32>}]} {
    %c0 = arith.constant 0 : index
    %c0_0 = arith.constant 0 : index
    %c0_1 = arith.constant 0 : index
    %0 = vector.load %arg1[%c0, %c0_0, %c0_1] : memref<2x17x96xf32, #tpu.memory_space<vmem>>, vector<2x17x8xf32>
    %1 = arith.truncf %0 : vector<2x17x8xf32> to vector<2x17x8xbf16>
    %c0_2 = arith.constant 0 : index
    %c0_3 = arith.constant 0 : index
    %c8 = arith.constant 8 : index
    %2 = vector.load %arg1[%c0_2, %c0_3, %c8] : memref<2x17x96xf32, #tpu.memory_space<vmem>>, vector<2x17x8xf32>
    %3 = arith.truncf %2 : vector<2x17x8xf32> to vector<2x17x8xbf16>
    %c0_4 = arith.constant 0 : index
    %c0_5 = arith.constant 0 : index
    %c16 = arith.constant 16 : index
    %4 = vector.load %arg1[%c0_4, %c0_5, %c16] : memref<2x17x96xf32, #tpu.memory_space<vmem>>, vector<2x17x8xf32>
    %5 = arith.truncf %4 : vector<2x17x8xf32> to vector<2x17x8xbf16>
    "tpu.trace_start"() <{level = 10 : i32, message = "bqd,bkd->bqk"}> : () -> ()
    %cst = arith.constant dense<0.000000e+00> : vector<2x17x17xf32>
    %6 = tpu.matmul %1, %3, %cst {dimension_numbers = #tpu.dot_dimension_numbers<[2], [2], [1], [1], [0, 0, 0, 1, 1, 1], [0], [0]>} : vector<2x17x8xbf16>, vector<2x17x8xbf16>, vector<2x17x17xf32> -> vector<2x17x17xf32>
    "tpu.trace_stop"() : () -> ()
    %cst_6 = arith.constant dense<0xFF800000> : vector<2x17xf32>
    %7 = vector.multi_reduction <maximumf>, %6, %cst_6 [2] : vector<2x17x17xf32> to vector<2x17xf32>
    %8 = vector.shape_cast %7 : vector<2x17xf32> to vector<2x17x1xf32>
    %9 = vector.broadcast %8 : vector<2x17x1xf32> to vector<2x17x17xf32>
    %10 = arith.subf %6, %9 : vector<2x17x17xf32>
    %11 = math.exp %10 : vector<2x17x17xf32>
    %cst_7 = arith.constant dense<0.000000e+00> : vector<2x17xf32>
    %12 = vector.multi_reduction <add>, %11, %cst_7 [2] : vector<2x17x17xf32> to vector<2x17xf32>
    %13 = vector.shape_cast %12 : vector<2x17xf32> to vector<2x17x1xf32>
    %14 = tpu.reciprocal %13 {approx = true} : vector<2x17x1xf32> -> vector<2x17x1xf32>
    %15 = vector.broadcast %14 : vector<2x17x1xf32> to vector<2x17x17xf32>
    %16 = arith.mulf %11, %15 : vector<2x17x17xf32>
    %17 = arith.truncf %16 : vector<2x17x17xf32> to vector<2x17x17xbf16>
    "tpu.trace_start"() <{level = 10 : i32, message = "bqk,bkd->bqd"}> : () -> ()
    %cst_8 = arith.constant dense<0.000000e+00> : vector<2x17x8xf32>
    %18 = tpu.matmul %17, %5, %cst_8 {dimension_numbers = #tpu.dot_dimension_numbers<[2], [1], [1], [2], [0, 0, 0, 1, 1, 2], [0], [0]>} : vector<2x17x17xbf16>, vector<2x17x8xbf16>, vector<2x17x8xf32> -> vector<2x17x8xf32>
    "tpu.trace_stop"() : () -> ()
    %c0_9 = arith.constant 0 : index
    %c0_10 = arith.constant 0 : index
    %c0_11 = arith.constant 0 : index
    %19 = vector.load %arg2[%c0_9, %c0_10, %c0_11] : memref<2x17x32xf32, #tpu.memory_space<vmem>>, vector<2x17x8xf32>
    tpu.vector_store %arg2[%c0_9, %c0_10, %c0_11], %18 {strides = array<i32>} : memref<2x17x32xf32, #tpu.memory_space<vmem>>, vector<2x17x8xf32>,
    %c0_12 = arith.constant 0 : index
    %c0_13 = arith.constant 0 : index
    %c24 = arith.constant 24 : index
    %20 = vector.load %arg1[%c0_12, %c0_13, %c24] : memref<2x17x96xf32, #tpu.memory_space<vmem>>, vector<2x17x8xf32>
    %21 = arith.truncf %20 : vector<2x17x8xf32> to vector<2x17x8xbf16>
    %c0_14 = arith.constant 0 : index
    %c0_15 = arith.constant 0 : index
    %c32 = arith.constant 32 : index
    %22 = vector.load %arg1[%c0_14, %c0_15, %c32] : memref<2x17x96xf32, #tpu.memory_space<vmem>>, vector<2x17x8xf32>
    %23 = arith.truncf %22 : vector<2x17x8xf32> to vector<2x17x8xbf16>
    %c0_16 = arith.constant 0 : index
    %c0_17 = arith.constant 0 : index
    %c40 = arith.constant 40 : index
    %24 = vector.load %arg1[%c0_16, %c0_17, %c40] : memref<2x17x96xf32, #tpu.memory_space<vmem>>, vector<2x17x8xf32>
    %25 = arith.truncf %24 : vector<2x17x8xf32> to vector<2x17x8xbf16>
    "tpu.trace_start"() <{level = 10 : i32, message = "bqd,bkd->bqk"}> : () -> ()
    %cst_18 = arith.constant dense<0.000000e+00> : vector<2x17x17xf32>
    %26 = tpu.matmul %21, %23, %cst_18 {dimension_numbers = #tpu.dot_dimension_numbers<[2], [2], [1], [1], [0, 0, 0, 1, 1, 1], [0], [0]>} : vector<2x17x8xbf16>, vector<2x17x8xbf16>, vector<2x17x17xf32> -> vector<2x17x17xf32>
    "tpu.trace_stop"() : () -> ()
    %cst_19 = arith.constant dense<0xFF800000> : vector<2x17xf32>
    %27 = vector.multi_reduction <maximumf>, %26, %cst_19 [2] : vector<2x17x17xf32> to vector<2x17xf32>
    %28 = vector.shape_cast %27 : vector<2x17xf32> to vector<2x17x1xf32>
    %29 = vector.broadcast %28 : vector<2x17x1xf32> to vector<2x17x17xf32>
    %30 = arith.subf %26, %29 : vector<2x17x17xf32>
    %31 = math.exp %30 : vector<2x17x17xf32>
    %cst_20 = arith.constant dense<0.000000e+00> : vector<2x17xf32>
    %32 = vector.multi_reduction <add>, %31, %cst_20 [2] : vector<2x17x17xf32> to vector<2x17xf32>
    %33 = vector.shape_cast %32 : vector<2x17xf32> to vector<2x17x1xf32>
    %34 = tpu.reciprocal %33 {approx = true} : vector<2x17x1xf32> -> vector<2x17x1xf32>
    %35 = vector.broadcast %34 : vector<2x17x1xf32> to vector<2x17x17xf32>
    %36 = arith.mulf %31, %35 : vector<2x17x17xf32>
    %37 = arith.truncf %36 : vector<2x17x17xf32> to vector<2x17x17xbf16>
    "tpu.trace_start"() <{level = 10 : i32, message = "bqk,bkd->bqd"}> : () -> ()
    %cst_21 = arith.constant dense<0.000000e+00> : vector<2x17x8xf32>
    %38 = tpu.matmul %37, %25, %cst_21 {dimension_numbers = #tpu.dot_dimension_numbers<[2], [1], [1], [2], [0, 0, 0, 1, 1, 2], [0], [0]>} : vector<2x17x17xbf16>, vector<2x17x8xbf16>, vector<2x17x8xf32> -> vector<2x17x8xf32>
    "tpu.trace_stop"() : () -> ()
    %c0_22 = arith.constant 0 : index
    %c0_23 = arith.constant 0 : index
    %c8_24 = arith.constant 8 : index
    %39 = vector.load %arg2[%c0_22, %c0_23, %c8_24] : memref<2x17x32xf32, #tpu.memory_space<vmem>>, vector<2x17x8xf32>
    tpu.vector_store %arg2[%c0_22, %c0_23, %c8_24], %38 {strides = array<i32>} : memref<2x17x32xf32, #tpu.memory_space<vmem>>, vector<2x17x8xf32>,
    %c0_25 = arith.constant 0 : index
    %c0_26 = arith.constant 0 : index
    %c48 = arith.constant 48 : index
    %40 = vector.load %arg1[%c0_25, %c0_26, %c48] : memref<2x17x96xf32, #tpu.memory_space<vmem>>, vector<2x17x8xf32>
    %41 = arith.truncf %40 : vector<2x17x8xf32> to vector<2x17x8xbf16>
    %c0_27 = arith.constant 0 : index
    %c0_28 = arith.constant 0 : index
    %c56 = arith.constant 56 : index
    %42 = vector.load %arg1[%c0_27, %c0_28, %c56] : memref<2x17x96xf32, #tpu.memory_space<vmem>>, vector<2x17x8xf32>
    %43 = arith.truncf %42 : vector<2x17x8xf32> to vector<2x17x8xbf16>
    %c0_29 = arith.constant 0 : index
    %c0_30 = arith.constant 0 : index
    %c64 = arith.constant 64 : index
    %44 = vector.load %arg1[%c0_29, %c0_30, %c64] : memref<2x17x96xf32, #tpu.memory_space<vmem>>, vector<2x17x8xf32>
    %45 = arith.truncf %44 : vector<2x17x8xf32> to vector<2x17x8xbf16>
    "tpu.trace_start"() <{level = 10 : i32, message = "bqd,bkd->bqk"}> : () -> ()
    %cst_31 = arith.constant dense<0.000000e+00> : vector<2x17x17xf32>
    %46 = tpu.matmul %41, %43, %cst_31 {dimension_numbers = #tpu.dot_dimension_numbers<[2], [2], [1], [1], [0, 0, 0, 1, 1, 1], [0], [0]>} : vector<2x17x8xbf16>, vector<2x17x8xbf16>, vector<2x17x17xf32> -> vector<2x17x17xf32>
    "tpu.trace_stop"() : () -> ()
    %cst_32 = arith.constant dense<0xFF800000> : vector<2x17xf32>
    %47 = vector.multi_reduction <maximumf>, %46, %cst_32 [2] : vector<2x17x17xf32> to vector<2x17xf32>
    %48 = vector.shape_cast %47 : vector<2x17xf32> to vector<2x17x1xf32>
    %49 = vector.broadcast %48 : vector<2x17x1xf32> to vector<2x17x17xf32>
    %50 = arith.subf %46, %49 : vector<2x17x17xf32>
    %51 = math.exp %50 : vector<2x17x17xf32>
    %cst_33 = arith.constant dense<0.000000e+00> : vector<2x17xf32>
    %52 = vector.multi_reduction <add>, %51, %cst_33 [2] : vector<2x17x17xf32> to vector<2x17xf32>
    %53 = vector.shape_cast %52 : vector<2x17xf32> to vector<2x17x1xf32>
    %54 = tpu.reciprocal %53 {approx = true} : vector<2x17x1xf32> -> vector<2x17x1xf32>
    %55 = vector.broadcast %54 : vector<2x17x1xf32> to vector<2x17x17xf32>
    %56 = arith.mulf %51, %55 : vector<2x17x17xf32>
    %57 = arith.truncf %56 : vector<2x17x17xf32> to vector<2x17x17xbf16>
    "tpu.trace_start"() <{level = 10 : i32, message = "bqk,bkd->bqd"}> : () -> ()
    %cst_34 = arith.constant dense<0.000000e+00> : vector<2x17x8xf32>
    %58 = tpu.matmul %57, %45, %cst_34 {dimension_numbers = #tpu.dot_dimension_numbers<[2], [1], [1], [2], [0, 0, 0, 1, 1, 2], [0], [0]>} : vector<2x17x17xbf16>, vector<2x17x8xbf16>, vector<2x17x8xf32> -> vector<2x17x8xf32>
    "tpu.trace_stop"() : () -> ()
    %c0_35 = arith.constant 0 : index
    %c0_36 = arith.constant 0 : index
    %c16_37 = arith.constant 16 : index
    %59 = vector.load %arg2[%c0_35, %c0_36, %c16_37] : memref<2x17x32xf32, #tpu.memory_space<vmem>>, vector<2x17x8xf32>
    tpu.vector_store %arg2[%c0_35, %c0_36, %c16_37], %58 {strides = array<i32>} : memref<2x17x32xf32, #tpu.memory_space<vmem>>, vector<2x17x8xf32>,
    %c0_38 = arith.constant 0 : index
    %c0_39 = arith.constant 0 : index
    %c72 = arith.constant 72 : index
    %60 = vector.load %arg1[%c0_38, %c0_39, %c72] : memref<2x17x96xf32, #tpu.memory_space<vmem>>, vector<2x17x8xf32>
    %61 = arith.truncf %60 : vector<2x17x8xf32> to vector<2x17x8xbf16>
    %c0_40 = arith.constant 0 : index
    %c0_41 = arith.constant 0 : index
    %c80 = arith.constant 80 : index
    %62 = vector.load %arg1[%c0_40, %c0_41, %c80] : memref<2x17x96xf32, #tpu.memory_space<vmem>>, vector<2x17x8xf32>
    %63 = arith.truncf %62 : vector<2x17x8xf32> to vector<2x17x8xbf16>
    %c0_42 = arith.constant 0 : index
    %c0_43 = arith.constant 0 : index
    %c88 = arith.constant 88 : index
    %64 = vector.load %arg1[%c0_42, %c0_43, %c88] : memref<2x17x96xf32, #tpu.memory_space<vmem>>, vector<2x17x8xf32>
    %65 = arith.truncf %64 : vector<2x17x8xf32> to vector<2x17x8xbf16>
    "tpu.trace_start"() <{level = 10 : i32, message = "bqd,bkd->bqk"}> : () -> ()
    %cst_44 = arith.constant dense<0.000000e+00> : vector<2x17x17xf32>
    %66 = tpu.matmul %61, %63, %cst_44 {dimension_numbers = #tpu.dot_dimension_numbers<[2], [2], [1], [1], [0, 0, 0, 1, 1, 1], [0], [0]>} : vector<2x17x8xbf16>, vector<2x17x8xbf16>, vector<2x17x17xf32> -> vector<2x17x17xf32>
    "tpu.trace_stop"() : () -> ()
    %cst_45 = arith.constant dense<0xFF800000> : vector<2x17xf32>
    %67 = vector.multi_reduction <maximumf>, %66, %cst_45 [2] : vector<2x17x17xf32> to vector<2x17xf32>
    %68 = vector.shape_cast %67 : vector<2x17xf32> to vector<2x17x1xf32>
    %69 = vector.broadcast %68 : vector<2x17x1xf32> to vector<2x17x17xf32>
    %70 = arith.subf %66, %69 : vector<2x17x17xf32>
    %71 = math.exp %70 : vector<2x17x17xf32>
    %cst_46 = arith.constant dense<0.000000e+00> : vector<2x17xf32>
    %72 = vector.multi_reduction <add>, %71, %cst_46 [2] : vector<2x17x17xf32> to vector<2x17xf32>
    %73 = vector.shape_cast %72 : vector<2x17xf32> to vector<2x17x1xf32>
    %74 = tpu.reciprocal %73 {approx = true} : vector<2x17x1xf32> -> vector<2x17x1xf32>
    %75 = vector.broadcast %74 : vector<2x17x1xf32> to vector<2x17x17xf32>
    %76 = arith.mulf %71, %75 : vector<2x17x17xf32>
    %77 = arith.truncf %76 : vector<2x17x17xf32> to vector<2x17x17xbf16>
    "tpu.trace_start"() <{level = 10 : i32, message = "bqk,bkd->bqd"}> : () -> ()
    %cst_47 = arith.constant dense<0.000000e+00> : vector<2x17x8xf32>
    %78 = tpu.matmul %77, %65, %cst_47 {dimension_numbers = #tpu.dot_dimension_numbers<[2], [1], [1], [2], [0, 0, 0, 1, 1, 2], [0], [0]>} : vector<2x17x17xbf16>, vector<2x17x8xbf16>, vector<2x17x8xf32> -> vector<2x17x8xf32>
    "tpu.trace_stop"() : () -> ()
    %c0_48 = arith.constant 0 : index
    %c0_49 = arith.constant 0 : index
    %c24_50 = arith.constant 24 : index
    %79 = vector.load %arg2[%c0_48, %c0_49, %c24_50] : memref<2x17x32xf32, #tpu.memory_space<vmem>>, vector<2x17x8xf32>
    tpu.vector_store %arg2[%c0_48, %c0_49, %c24_50], %78 {strides = array<i32>} : memref<2x17x32xf32, #tpu.memory_space<vmem>>, vector<2x17x8xf32>,
    return
  }
  func.func @transform_0(%arg0: i32) -> (i32, i32, i32) {
    %c0_i32 = arith.constant 0 : i32
    %c0_i32_0 = arith.constant 0 : i32
    %c0_i32_1 = arith.constant 0 : i32
    return %arg0, %c0_i32, %c0_i32_0 : i32, i32, i32
  }
  func.func @transform_1(%arg0: i32) -> (i32, i32, i32) {
    %c0_i32 = arith.constant 0 : i32
    %c0_i32_0 = arith.constant 0 : i32
    %c0_i32_1 = arith.constant 0 : i32
    return %arg0, %c0_i32, %c0_i32_0 : i32, i32, i32
  }
}

module attributes {stable_mosaic.version = 11 : i64} {
  func.func @_proj_res_ln_fc1_kernel(%arg0: i32, %arg1: memref<34x32xf32, #tpu.memory_space<vmem>>, %arg2: memref<32x32xbf16, #tpu.memory_space<vmem>>, %arg3: memref<1x32xf32, #tpu.memory_space<vmem>>, %arg4: memref<34x32xf32, #tpu.memory_space<vmem>>, %arg5: memref<1x32xf32, #tpu.memory_space<vmem>>, %arg6: memref<1x32xf32, #tpu.memory_space<vmem>>, %arg7: memref<32x128xbf16, #tpu.memory_space<vmem>>, %arg8: memref<1x128xf32, #tpu.memory_space<vmem>>, %arg9: memref<34x32xf32, #tpu.memory_space<vmem>>, %arg10: memref<34x128xf32, #tpu.memory_space<vmem>>) attributes {dimension_semantics = [#tpu.dimension_semantics<parallel>], iteration_bounds = array<i64: 1>, scalar_prefetch = 0 : i64, scratch_operands = 0 : i64, tpu.core_type = #tpu.core_type<tc>, window_params = [{transform_indices = @transform_0, window_bounds = array<i64: 34, 32>}, {pipeline_mode = #tpu.pipeline_mode<synchronous>, transform_indices = @transform_1, window_bounds = array<i64: 32, 32>}, {pipeline_mode = #tpu.pipeline_mode<synchronous>, transform_indices = @transform_2, window_bounds = array<i64: 1, 32>}, {transform_indices = @transform_3, window_bounds = array<i64: 34, 32>}, {pipeline_mode = #tpu.pipeline_mode<synchronous>, transform_indices = @transform_4, window_bounds = array<i64: 1, 32>}, {pipeline_mode = #tpu.pipeline_mode<synchronous>, transform_indices = @transform_5, window_bounds = array<i64: 1, 32>}, {pipeline_mode = #tpu.pipeline_mode<synchronous>, transform_indices = @transform_6, window_bounds = array<i64: 32, 128>}, {pipeline_mode = #tpu.pipeline_mode<synchronous>, transform_indices = @transform_7, window_bounds = array<i64: 1, 128>}, {transform_indices = @transform_8, window_bounds = array<i64: 34, 32>}, {transform_indices = @transform_9, window_bounds = array<i64: 34, 128>}]} {
    %c0 = arith.constant 0 : index
    %c0_0 = arith.constant 0 : index
    %0 = vector.load %arg1[%c0, %c0_0] : memref<34x32xf32, #tpu.memory_space<vmem>>, vector<34x32xf32>
    %1 = arith.truncf %0 : vector<34x32xf32> to vector<34x32xbf16>
    %c0_1 = arith.constant 0 : index
    %c0_2 = arith.constant 0 : index
    %2 = vector.load %arg2[%c0_1, %c0_2] : memref<32x32xbf16, #tpu.memory_space<vmem>>, vector<32x32xbf16>
    %cst = arith.constant dense<0.000000e+00> : vector<34x32xf32>
    %3 = tpu.matmul %1, %2, %cst {dimension_numbers = #tpu.dot_dimension_numbers<[1], [0], [0], [1], [0, 0, 1, 1], [], []>} : vector<34x32xbf16>, vector<32x32xbf16>, vector<34x32xf32> -> vector<34x32xf32>
    %c0_3 = arith.constant 0 : index
    %c0_4 = arith.constant 0 : index
    %4 = vector.load %arg3[%c0_3, %c0_4] : memref<1x32xf32, #tpu.memory_space<vmem>>, vector<1x32xf32>
    %5 = vector.broadcast %4 : vector<1x32xf32> to vector<34x32xf32>
    %6 = arith.addf %3, %5 : vector<34x32xf32>
    %c0_5 = arith.constant 0 : index
    %c0_6 = arith.constant 0 : index
    %7 = vector.load %arg4[%c0_5, %c0_6] : memref<34x32xf32, #tpu.memory_space<vmem>>, vector<34x32xf32>
    %8 = arith.addf %6, %7 : vector<34x32xf32>
    %c0_7 = arith.constant 0 : index
    %c0_8 = arith.constant 0 : index
    %9 = vector.load %arg9[%c0_7, %c0_8] : memref<34x32xf32, #tpu.memory_space<vmem>>, vector<34x32xf32>
    tpu.vector_store %arg9[%c0_7, %c0_8], %8 {strides = array<i32>} : memref<34x32xf32, #tpu.memory_space<vmem>>, vector<34x32xf32>,
    %c0_9 = arith.constant 0 : index
    %c0_10 = arith.constant 0 : index
    %10 = vector.load %arg5[%c0_9, %c0_10] : memref<1x32xf32, #tpu.memory_space<vmem>>, vector<1x32xf32>
    %c0_11 = arith.constant 0 : index
    %c0_12 = arith.constant 0 : index
    %11 = vector.load %arg6[%c0_11, %c0_12] : memref<1x32xf32, #tpu.memory_space<vmem>>, vector<1x32xf32>
    %cst_13 = arith.constant dense<0.000000e+00> : vector<34xf32>
    %12 = vector.multi_reduction <add>, %8, %cst_13 [1] : vector<34x32xf32> to vector<34xf32>
    %13 = vector.shape_cast %12 : vector<34xf32> to vector<34x1xf32>
    %cst_14 = arith.constant 3.200000e+01 : f32
    %14 = vector.broadcast %cst_14 : f32 to vector<34x1xf32>
    %15 = arith.divf %13, %14 : vector<34x1xf32>
    %16 = vector.broadcast %15 : vector<34x1xf32> to vector<34x32xf32>
    %17 = arith.subf %8, %16 : vector<34x32xf32>
    %18 = arith.mulf %17, %17 : vector<34x32xf32>
    %cst_15 = arith.constant dense<0.000000e+00> : vector<34xf32>
    %19 = vector.multi_reduction <add>, %18, %cst_15 [1] : vector<34x32xf32> to vector<34xf32>
    %20 = vector.shape_cast %19 : vector<34xf32> to vector<34x1xf32>
    %cst_16 = arith.constant 3.200000e+01 : f32
    %21 = vector.broadcast %cst_16 : f32 to vector<34x1xf32>
    %22 = arith.divf %20, %21 : vector<34x1xf32>
    %23 = vector.broadcast %15 : vector<34x1xf32> to vector<34x32xf32>
    %24 = arith.subf %8, %23 : vector<34x32xf32>
    %cst_17 = arith.constant 9.99999974E-6 : f32
    %25 = vector.broadcast %cst_17 : f32 to vector<34x1xf32>
    %26 = arith.addf %22, %25 : vector<34x1xf32>
    %27 = math.rsqrt %26 : vector<34x1xf32>
    %28 = vector.broadcast %27 : vector<34x1xf32> to vector<34x32xf32>
    %29 = arith.mulf %24, %28 : vector<34x32xf32>
    %30 = vector.broadcast %10 : vector<1x32xf32> to vector<34x32xf32>
    %31 = arith.mulf %29, %30 : vector<34x32xf32>
    %32 = vector.broadcast %11 : vector<1x32xf32> to vector<34x32xf32>
    %33 = arith.addf %31, %32 : vector<34x32xf32>
    %34 = arith.truncf %33 : vector<34x32xf32> to vector<34x32xbf16>
    %c0_18 = arith.constant 0 : index
    %c0_19 = arith.constant 0 : index
    %35 = vector.load %arg7[%c0_18, %c0_19] : memref<32x128xbf16, #tpu.memory_space<vmem>>, vector<32x128xbf16>
    %cst_20 = arith.constant dense<0.000000e+00> : vector<34x128xf32>
    %36 = tpu.matmul %34, %35, %cst_20 {dimension_numbers = #tpu.dot_dimension_numbers<[1], [0], [0], [1], [0, 0, 1, 1], [], []>} : vector<34x32xbf16>, vector<32x128xbf16>, vector<34x128xf32> -> vector<34x128xf32>
    %c0_21 = arith.constant 0 : index
    %c0_22 = arith.constant 0 : index
    %37 = vector.load %arg8[%c0_21, %c0_22] : memref<1x128xf32, #tpu.memory_space<vmem>>, vector<1x128xf32>
    %38 = vector.broadcast %37 : vector<1x128xf32> to vector<34x128xf32>
    %39 = arith.addf %36, %38 : vector<34x128xf32>
    %cst_23 = arith.constant 5.000000e-01 : f32
    %40 = vector.broadcast %cst_23 : f32 to vector<34x128xf32>
    %41 = arith.mulf %40, %39 : vector<34x128xf32>
    %cst_24 = arith.constant 0.707106769 : f32
    %42 = vector.broadcast %cst_24 : f32 to vector<34x128xf32>
    %43 = arith.mulf %39, %42 : vector<34x128xf32>
    %44 = math.absf %43 : vector<34x128xf32>
    %cst_25 = arith.constant 0.327591091 : f32
    %45 = vector.broadcast %cst_25 : f32 to vector<34x128xf32>
    %46 = arith.mulf %45, %44 : vector<34x128xf32>
    %cst_26 = arith.constant 1.000000e+00 : f32
    %47 = vector.broadcast %cst_26 : f32 to vector<34x128xf32>
    %48 = arith.addf %47, %46 : vector<34x128xf32>
    %cst_27 = arith.constant 1.000000e+00 : f32
    %49 = vector.broadcast %cst_27 : f32 to vector<34x128xf32>
    %50 = arith.divf %49, %48 : vector<34x128xf32>
    %cst_28 = arith.constant 1.06140542 : f32
    %51 = vector.broadcast %cst_28 : f32 to vector<34x128xf32>
    %52 = arith.mulf %51, %50 : vector<34x128xf32>
    %cst_29 = arith.constant -1.45315206 : f32
    %53 = vector.broadcast %cst_29 : f32 to vector<34x128xf32>
    %54 = arith.addf %52, %53 : vector<34x128xf32>
    %55 = arith.mulf %54, %50 : vector<34x128xf32>
    %cst_30 = arith.constant 1.42141378 : f32
    %56 = vector.broadcast %cst_30 : f32 to vector<34x128xf32>
    %57 = arith.addf %55, %56 : vector<34x128xf32>
    %58 = arith.mulf %57, %50 : vector<34x128xf32>
    %cst_31 = arith.constant -0.284496725 : f32
    %59 = vector.broadcast %cst_31 : f32 to vector<34x128xf32>
    %60 = arith.addf %58, %59 : vector<34x128xf32>
    %61 = arith.mulf %60, %50 : vector<34x128xf32>
    %cst_32 = arith.constant 0.254829586 : f32
    %62 = vector.broadcast %cst_32 : f32 to vector<34x128xf32>
    %63 = arith.addf %61, %62 : vector<34x128xf32>
    %64 = arith.mulf %63, %50 : vector<34x128xf32>
    %cst_33 = arith.constant 0.000000e+00 : f32
    %65 = vector.broadcast %cst_33 : f32 to vector<34x128xf32>
    %66 = arith.subf %65, %44 : vector<34x128xf32>
    %67 = arith.mulf %66, %44 : vector<34x128xf32>
    %68 = math.exp %67 : vector<34x128xf32>
    %69 = arith.mulf %64, %68 : vector<34x128xf32>
    %cst_34 = arith.constant 1.000000e+00 : f32
    %70 = vector.broadcast %cst_34 : f32 to vector<34x128xf32>
    %71 = arith.subf %70, %69 : vector<34x128xf32>
    %cst_35 = arith.constant 0.000000e+00 : f32
    %72 = vector.broadcast %cst_35 : f32 to vector<34x128xf32>
    %73 = arith.cmpf oge, %43, %72 : vector<34x128xf32>
    %cst_36 = arith.constant 0.000000e+00 : f32
    %74 = vector.broadcast %cst_36 : f32 to vector<34x128xf32>
    %75 = arith.subf %74, %71 : vector<34x128xf32>
    %76 = arith.select %73, %71, %75 : vector<34x128xi1>, vector<34x128xf32>
    %cst_37 = arith.constant 1.000000e+00 : f32
    %77 = vector.broadcast %cst_37 : f32 to vector<34x128xf32>
    %78 = arith.addf %77, %76 : vector<34x128xf32>
    %79 = arith.mulf %41, %78 : vector<34x128xf32>
    %c0_38 = arith.constant 0 : index
    %c0_39 = arith.constant 0 : index
    %80 = vector.load %arg10[%c0_38, %c0_39] : memref<34x128xf32, #tpu.memory_space<vmem>>, vector<34x128xf32>
    tpu.vector_store %arg10[%c0_38, %c0_39], %79 {strides = array<i32>} : memref<34x128xf32, #tpu.memory_space<vmem>>, vector<34x128xf32>,
    return
  }
  func.func @transform_0(%arg0: i32) -> (i32, i32) {
    %c0_i32 = arith.constant 0 : i32
    %c0_i32_0 = arith.constant 0 : i32
    return %arg0, %c0_i32 : i32, i32
  }
  func.func @transform_1(%arg0: i32) -> (i32, i32) {
    %c0_i32 = arith.constant 0 : i32
    %c0_i32_0 = arith.constant 0 : i32
    %c0_i32_1 = arith.constant 0 : i32
    return %c0_i32, %c0_i32_0 : i32, i32
  }
  func.func @transform_2(%arg0: i32) -> (i32, i32) {
    %c0_i32 = arith.constant 0 : i32
    %c0_i32_0 = arith.constant 0 : i32
    %c0_i32_1 = arith.constant 0 : i32
    return %c0_i32, %c0_i32_0 : i32, i32
  }
  func.func @transform_3(%arg0: i32) -> (i32, i32) {
    %c0_i32 = arith.constant 0 : i32
    %c0_i32_0 = arith.constant 0 : i32
    return %arg0, %c0_i32 : i32, i32
  }
  func.func @transform_4(%arg0: i32) -> (i32, i32) {
    %c0_i32 = arith.constant 0 : i32
    %c0_i32_0 = arith.constant 0 : i32
    %c0_i32_1 = arith.constant 0 : i32
    return %c0_i32, %c0_i32_0 : i32, i32
  }
  func.func @transform_5(%arg0: i32) -> (i32, i32) {
    %c0_i32 = arith.constant 0 : i32
    %c0_i32_0 = arith.constant 0 : i32
    %c0_i32_1 = arith.constant 0 : i32
    return %c0_i32, %c0_i32_0 : i32, i32
  }
  func.func @transform_6(%arg0: i32) -> (i32, i32) {
    %c0_i32 = arith.constant 0 : i32
    %c0_i32_0 = arith.constant 0 : i32
    %c0_i32_1 = arith.constant 0 : i32
    return %c0_i32, %c0_i32_0 : i32, i32
  }
  func.func @transform_7(%arg0: i32) -> (i32, i32) {
    %c0_i32 = arith.constant 0 : i32
    %c0_i32_0 = arith.constant 0 : i32
    %c0_i32_1 = arith.constant 0 : i32
    return %c0_i32, %c0_i32_0 : i32, i32
  }
  func.func @transform_8(%arg0: i32) -> (i32, i32) {
    %c0_i32 = arith.constant 0 : i32
    %c0_i32_0 = arith.constant 0 : i32
    return %arg0, %c0_i32 : i32, i32
  }
  func.func @transform_9(%arg0: i32) -> (i32, i32) {
    %c0_i32 = arith.constant 0 : i32
    %c0_i32_0 = arith.constant 0 : i32
    return %arg0, %c0_i32 : i32, i32
  }
}

module attributes {stable_mosaic.version = 11 : i64} {
  func.func @_fc2_res_ln_linear_kernel(%arg0: i32, %arg1: memref<34x128xf32, #tpu.memory_space<vmem>>, %arg2: memref<128x32xbf16, #tpu.memory_space<vmem>>, %arg3: memref<1x32xf32, #tpu.memory_space<vmem>>, %arg4: memref<34x32xf32, #tpu.memory_space<vmem>>, %arg5: memref<1x32xf32, #tpu.memory_space<vmem>>, %arg6: memref<1x32xf32, #tpu.memory_space<vmem>>, %arg7: memref<32x48xbf16, #tpu.memory_space<vmem>>, %arg8: memref<1x48xf32, #tpu.memory_space<vmem>>, %arg9: memref<34x32xf32, #tpu.memory_space<vmem>>, %arg10: memref<34x48xf32, #tpu.memory_space<vmem>>) attributes {dimension_semantics = [#tpu.dimension_semantics<parallel>], iteration_bounds = array<i64: 1>, scalar_prefetch = 0 : i64, scratch_operands = 0 : i64, tpu.core_type = #tpu.core_type<tc>, window_params = [{transform_indices = @transform_0, window_bounds = array<i64: 34, 128>}, {pipeline_mode = #tpu.pipeline_mode<synchronous>, transform_indices = @transform_1, window_bounds = array<i64: 128, 32>}, {pipeline_mode = #tpu.pipeline_mode<synchronous>, transform_indices = @transform_2, window_bounds = array<i64: 1, 32>}, {transform_indices = @transform_3, window_bounds = array<i64: 34, 32>}, {pipeline_mode = #tpu.pipeline_mode<synchronous>, transform_indices = @transform_4, window_bounds = array<i64: 1, 32>}, {pipeline_mode = #tpu.pipeline_mode<synchronous>, transform_indices = @transform_5, window_bounds = array<i64: 1, 32>}, {pipeline_mode = #tpu.pipeline_mode<synchronous>, transform_indices = @transform_6, window_bounds = array<i64: 32, 48>}, {pipeline_mode = #tpu.pipeline_mode<synchronous>, transform_indices = @transform_7, window_bounds = array<i64: 1, 48>}, {transform_indices = @transform_8, window_bounds = array<i64: 34, 32>}, {transform_indices = @transform_9, window_bounds = array<i64: 34, 48>}]} {
    %c0 = arith.constant 0 : index
    %c0_0 = arith.constant 0 : index
    %0 = vector.load %arg1[%c0, %c0_0] : memref<34x128xf32, #tpu.memory_space<vmem>>, vector<34x128xf32>
    %1 = arith.truncf %0 : vector<34x128xf32> to vector<34x128xbf16>
    %c0_1 = arith.constant 0 : index
    %c0_2 = arith.constant 0 : index
    %2 = vector.load %arg2[%c0_1, %c0_2] : memref<128x32xbf16, #tpu.memory_space<vmem>>, vector<128x32xbf16>
    %cst = arith.constant dense<0.000000e+00> : vector<34x32xf32>
    %3 = tpu.matmul %1, %2, %cst {dimension_numbers = #tpu.dot_dimension_numbers<[1], [0], [0], [1], [0, 0, 1, 1], [], []>} : vector<34x128xbf16>, vector<128x32xbf16>, vector<34x32xf32> -> vector<34x32xf32>
    %c0_3 = arith.constant 0 : index
    %c0_4 = arith.constant 0 : index
    %4 = vector.load %arg3[%c0_3, %c0_4] : memref<1x32xf32, #tpu.memory_space<vmem>>, vector<1x32xf32>
    %5 = vector.broadcast %4 : vector<1x32xf32> to vector<34x32xf32>
    %6 = arith.addf %3, %5 : vector<34x32xf32>
    %c0_5 = arith.constant 0 : index
    %c0_6 = arith.constant 0 : index
    %7 = vector.load %arg4[%c0_5, %c0_6] : memref<34x32xf32, #tpu.memory_space<vmem>>, vector<34x32xf32>
    %8 = arith.addf %6, %7 : vector<34x32xf32>
    %c0_7 = arith.constant 0 : index
    %c0_8 = arith.constant 0 : index
    %9 = vector.load %arg9[%c0_7, %c0_8] : memref<34x32xf32, #tpu.memory_space<vmem>>, vector<34x32xf32>
    tpu.vector_store %arg9[%c0_7, %c0_8], %8 {strides = array<i32>} : memref<34x32xf32, #tpu.memory_space<vmem>>, vector<34x32xf32>,
    %c0_9 = arith.constant 0 : index
    %c0_10 = arith.constant 0 : index
    %10 = vector.load %arg5[%c0_9, %c0_10] : memref<1x32xf32, #tpu.memory_space<vmem>>, vector<1x32xf32>
    %c0_11 = arith.constant 0 : index
    %c0_12 = arith.constant 0 : index
    %11 = vector.load %arg6[%c0_11, %c0_12] : memref<1x32xf32, #tpu.memory_space<vmem>>, vector<1x32xf32>
    %cst_13 = arith.constant dense<0.000000e+00> : vector<34xf32>
    %12 = vector.multi_reduction <add>, %8, %cst_13 [1] : vector<34x32xf32> to vector<34xf32>
    %13 = vector.shape_cast %12 : vector<34xf32> to vector<34x1xf32>
    %cst_14 = arith.constant 3.200000e+01 : f32
    %14 = vector.broadcast %cst_14 : f32 to vector<34x1xf32>
    %15 = arith.divf %13, %14 : vector<34x1xf32>
    %16 = vector.broadcast %15 : vector<34x1xf32> to vector<34x32xf32>
    %17 = arith.subf %8, %16 : vector<34x32xf32>
    %18 = arith.mulf %17, %17 : vector<34x32xf32>
    %cst_15 = arith.constant dense<0.000000e+00> : vector<34xf32>
    %19 = vector.multi_reduction <add>, %18, %cst_15 [1] : vector<34x32xf32> to vector<34xf32>
    %20 = vector.shape_cast %19 : vector<34xf32> to vector<34x1xf32>
    %cst_16 = arith.constant 3.200000e+01 : f32
    %21 = vector.broadcast %cst_16 : f32 to vector<34x1xf32>
    %22 = arith.divf %20, %21 : vector<34x1xf32>
    %23 = vector.broadcast %15 : vector<34x1xf32> to vector<34x32xf32>
    %24 = arith.subf %8, %23 : vector<34x32xf32>
    %cst_17 = arith.constant 9.99999974E-6 : f32
    %25 = vector.broadcast %cst_17 : f32 to vector<34x1xf32>
    %26 = arith.addf %22, %25 : vector<34x1xf32>
    %27 = math.rsqrt %26 : vector<34x1xf32>
    %28 = vector.broadcast %27 : vector<34x1xf32> to vector<34x32xf32>
    %29 = arith.mulf %24, %28 : vector<34x32xf32>
    %30 = vector.broadcast %10 : vector<1x32xf32> to vector<34x32xf32>
    %31 = arith.mulf %29, %30 : vector<34x32xf32>
    %32 = vector.broadcast %11 : vector<1x32xf32> to vector<34x32xf32>
    %33 = arith.addf %31, %32 : vector<34x32xf32>
    %34 = arith.truncf %33 : vector<34x32xf32> to vector<34x32xbf16>
    %c0_18 = arith.constant 0 : index
    %c0_19 = arith.constant 0 : index
    %35 = vector.load %arg7[%c0_18, %c0_19] : memref<32x48xbf16, #tpu.memory_space<vmem>>, vector<32x48xbf16>
    %cst_20 = arith.constant dense<0.000000e+00> : vector<34x48xf32>
    %36 = tpu.matmul %34, %35, %cst_20 {dimension_numbers = #tpu.dot_dimension_numbers<[1], [0], [0], [1], [0, 0, 1, 1], [], []>} : vector<34x32xbf16>, vector<32x48xbf16>, vector<34x48xf32> -> vector<34x48xf32>
    %c0_21 = arith.constant 0 : index
    %c0_22 = arith.constant 0 : index
    %37 = vector.load %arg8[%c0_21, %c0_22] : memref<1x48xf32, #tpu.memory_space<vmem>>, vector<1x48xf32>
    %38 = vector.broadcast %37 : vector<1x48xf32> to vector<34x48xf32>
    %39 = arith.addf %36, %38 : vector<34x48xf32>
    %c0_23 = arith.constant 0 : index
    %c0_24 = arith.constant 0 : index
    %40 = vector.load %arg10[%c0_23, %c0_24] : memref<34x48xf32, #tpu.memory_space<vmem>>, vector<34x48xf32>
    tpu.vector_store %arg10[%c0_23, %c0_24], %39 {strides = array<i32>} : memref<34x48xf32, #tpu.memory_space<vmem>>, vector<34x48xf32>,
    return
  }
  func.func @transform_0(%arg0: i32) -> (i32, i32) {
    %c0_i32 = arith.constant 0 : i32
    %c0_i32_0 = arith.constant 0 : i32
    return %arg0, %c0_i32 : i32, i32
  }
  func.func @transform_1(%arg0: i32) -> (i32, i32) {
    %c0_i32 = arith.constant 0 : i32
    %c0_i32_0 = arith.constant 0 : i32
    %c0_i32_1 = arith.constant 0 : i32
    return %c0_i32, %c0_i32_0 : i32, i32
  }
  func.func @transform_2(%arg0: i32) -> (i32, i32) {
    %c0_i32 = arith.constant 0 : i32
    %c0_i32_0 = arith.constant 0 : i32
    %c0_i32_1 = arith.constant 0 : i32
    return %c0_i32, %c0_i32_0 : i32, i32
  }
  func.func @transform_3(%arg0: i32) -> (i32, i32) {
    %c0_i32 = arith.constant 0 : i32
    %c0_i32_0 = arith.constant 0 : i32
    return %arg0, %c0_i32 : i32, i32
  }
  func.func @transform_4(%arg0: i32) -> (i32, i32) {
    %c0_i32 = arith.constant 0 : i32
    %c0_i32_0 = arith.constant 0 : i32
    %c0_i32_1 = arith.constant 0 : i32
    return %c0_i32, %c0_i32_0 : i32, i32
  }
  func.func @transform_5(%arg0: i32) -> (i32, i32) {
    %c0_i32 = arith.constant 0 : i32
    %c0_i32_0 = arith.constant 0 : i32
    %c0_i32_1 = arith.constant 0 : i32
    return %c0_i32, %c0_i32_0 : i32, i32
  }
  func.func @transform_6(%arg0: i32) -> (i32, i32) {
    %c0_i32 = arith.constant 0 : i32
    %c0_i32_0 = arith.constant 0 : i32
    %c0_i32_1 = arith.constant 0 : i32
    return %c0_i32, %c0_i32_0 : i32, i32
  }
  func.func @transform_7(%arg0: i32) -> (i32, i32) {
    %c0_i32 = arith.constant 0 : i32
    %c0_i32_0 = arith.constant 0 : i32
    %c0_i32_1 = arith.constant 0 : i32
    return %c0_i32, %c0_i32_0 : i32, i32
  }
  func.func @transform_8(%arg0: i32) -> (i32, i32) {
    %c0_i32 = arith.constant 0 : i32
    %c0_i32_0 = arith.constant 0 : i32
    return %arg0, %c0_i32 : i32, i32
  }
  func.func @transform_9(%arg0: i32) -> (i32, i32) {
    %c0_i32 = arith.constant 0 : i32
    %c0_i32_0 = arith.constant 0 : i32
    return %arg0, %c0_i32 : i32, i32
  }
}

module attributes {stable_mosaic.version = 11 : i64} {
  func.func @_fc2_res_ln_linear_kernel(%arg0: i32, %arg1: memref<34x128xf32, #tpu.memory_space<vmem>>, %arg2: memref<128x32xbf16, #tpu.memory_space<vmem>>, %arg3: memref<1x32xf32, #tpu.memory_space<vmem>>, %arg4: memref<34x32xf32, #tpu.memory_space<vmem>>, %arg5: memref<1x32xf32, #tpu.memory_space<vmem>>, %arg6: memref<1x32xf32, #tpu.memory_space<vmem>>, %arg7: memref<32x96xbf16, #tpu.memory_space<vmem>>, %arg8: memref<1x96xf32, #tpu.memory_space<vmem>>, %arg9: memref<34x32xf32, #tpu.memory_space<vmem>>, %arg10: memref<34x96xf32, #tpu.memory_space<vmem>>) attributes {dimension_semantics = [#tpu.dimension_semantics<parallel>], iteration_bounds = array<i64: 1>, scalar_prefetch = 0 : i64, scratch_operands = 0 : i64, tpu.core_type = #tpu.core_type<tc>, window_params = [{transform_indices = @transform_0, window_bounds = array<i64: 34, 128>}, {pipeline_mode = #tpu.pipeline_mode<synchronous>, transform_indices = @transform_1, window_bounds = array<i64: 128, 32>}, {pipeline_mode = #tpu.pipeline_mode<synchronous>, transform_indices = @transform_2, window_bounds = array<i64: 1, 32>}, {transform_indices = @transform_3, window_bounds = array<i64: 34, 32>}, {pipeline_mode = #tpu.pipeline_mode<synchronous>, transform_indices = @transform_4, window_bounds = array<i64: 1, 32>}, {pipeline_mode = #tpu.pipeline_mode<synchronous>, transform_indices = @transform_5, window_bounds = array<i64: 1, 32>}, {pipeline_mode = #tpu.pipeline_mode<synchronous>, transform_indices = @transform_6, window_bounds = array<i64: 32, 96>}, {pipeline_mode = #tpu.pipeline_mode<synchronous>, transform_indices = @transform_7, window_bounds = array<i64: 1, 96>}, {transform_indices = @transform_8, window_bounds = array<i64: 34, 32>}, {transform_indices = @transform_9, window_bounds = array<i64: 34, 96>}]} {
    %c0 = arith.constant 0 : index
    %c0_0 = arith.constant 0 : index
    %0 = vector.load %arg1[%c0, %c0_0] : memref<34x128xf32, #tpu.memory_space<vmem>>, vector<34x128xf32>
    %1 = arith.truncf %0 : vector<34x128xf32> to vector<34x128xbf16>
    %c0_1 = arith.constant 0 : index
    %c0_2 = arith.constant 0 : index
    %2 = vector.load %arg2[%c0_1, %c0_2] : memref<128x32xbf16, #tpu.memory_space<vmem>>, vector<128x32xbf16>
    %cst = arith.constant dense<0.000000e+00> : vector<34x32xf32>
    %3 = tpu.matmul %1, %2, %cst {dimension_numbers = #tpu.dot_dimension_numbers<[1], [0], [0], [1], [0, 0, 1, 1], [], []>} : vector<34x128xbf16>, vector<128x32xbf16>, vector<34x32xf32> -> vector<34x32xf32>
    %c0_3 = arith.constant 0 : index
    %c0_4 = arith.constant 0 : index
    %4 = vector.load %arg3[%c0_3, %c0_4] : memref<1x32xf32, #tpu.memory_space<vmem>>, vector<1x32xf32>
    %5 = vector.broadcast %4 : vector<1x32xf32> to vector<34x32xf32>
    %6 = arith.addf %3, %5 : vector<34x32xf32>
    %c0_5 = arith.constant 0 : index
    %c0_6 = arith.constant 0 : index
    %7 = vector.load %arg4[%c0_5, %c0_6] : memref<34x32xf32, #tpu.memory_space<vmem>>, vector<34x32xf32>
    %8 = arith.addf %6, %7 : vector<34x32xf32>
    %c0_7 = arith.constant 0 : index
    %c0_8 = arith.constant 0 : index
    %9 = vector.load %arg9[%c0_7, %c0_8] : memref<34x32xf32, #tpu.memory_space<vmem>>, vector<34x32xf32>
    tpu.vector_store %arg9[%c0_7, %c0_8], %8 {strides = array<i32>} : memref<34x32xf32, #tpu.memory_space<vmem>>, vector<34x32xf32>,
    %c0_9 = arith.constant 0 : index
    %c0_10 = arith.constant 0 : index
    %10 = vector.load %arg5[%c0_9, %c0_10] : memref<1x32xf32, #tpu.memory_space<vmem>>, vector<1x32xf32>
    %c0_11 = arith.constant 0 : index
    %c0_12 = arith.constant 0 : index
    %11 = vector.load %arg6[%c0_11, %c0_12] : memref<1x32xf32, #tpu.memory_space<vmem>>, vector<1x32xf32>
    %cst_13 = arith.constant dense<0.000000e+00> : vector<34xf32>
    %12 = vector.multi_reduction <add>, %8, %cst_13 [1] : vector<34x32xf32> to vector<34xf32>
    %13 = vector.shape_cast %12 : vector<34xf32> to vector<34x1xf32>
    %cst_14 = arith.constant 3.200000e+01 : f32
    %14 = vector.broadcast %cst_14 : f32 to vector<34x1xf32>
    %15 = arith.divf %13, %14 : vector<34x1xf32>
    %16 = vector.broadcast %15 : vector<34x1xf32> to vector<34x32xf32>
    %17 = arith.subf %8, %16 : vector<34x32xf32>
    %18 = arith.mulf %17, %17 : vector<34x32xf32>
    %cst_15 = arith.constant dense<0.000000e+00> : vector<34xf32>
    %19 = vector.multi_reduction <add>, %18, %cst_15 [1] : vector<34x32xf32> to vector<34xf32>
    %20 = vector.shape_cast %19 : vector<34xf32> to vector<34x1xf32>
    %cst_16 = arith.constant 3.200000e+01 : f32
    %21 = vector.broadcast %cst_16 : f32 to vector<34x1xf32>
    %22 = arith.divf %20, %21 : vector<34x1xf32>
    %23 = vector.broadcast %15 : vector<34x1xf32> to vector<34x32xf32>
    %24 = arith.subf %8, %23 : vector<34x32xf32>
    %cst_17 = arith.constant 9.99999974E-6 : f32
    %25 = vector.broadcast %cst_17 : f32 to vector<34x1xf32>
    %26 = arith.addf %22, %25 : vector<34x1xf32>
    %27 = math.rsqrt %26 : vector<34x1xf32>
    %28 = vector.broadcast %27 : vector<34x1xf32> to vector<34x32xf32>
    %29 = arith.mulf %24, %28 : vector<34x32xf32>
    %30 = vector.broadcast %10 : vector<1x32xf32> to vector<34x32xf32>
    %31 = arith.mulf %29, %30 : vector<34x32xf32>
    %32 = vector.broadcast %11 : vector<1x32xf32> to vector<34x32xf32>
    %33 = arith.addf %31, %32 : vector<34x32xf32>
    %34 = arith.truncf %33 : vector<34x32xf32> to vector<34x32xbf16>
    %c0_18 = arith.constant 0 : index
    %c0_19 = arith.constant 0 : index
    %35 = vector.load %arg7[%c0_18, %c0_19] : memref<32x96xbf16, #tpu.memory_space<vmem>>, vector<32x96xbf16>
    %cst_20 = arith.constant dense<0.000000e+00> : vector<34x96xf32>
    %36 = tpu.matmul %34, %35, %cst_20 {dimension_numbers = #tpu.dot_dimension_numbers<[1], [0], [0], [1], [0, 0, 1, 1], [], []>} : vector<34x32xbf16>, vector<32x96xbf16>, vector<34x96xf32> -> vector<34x96xf32>
    %c0_21 = arith.constant 0 : index
    %c0_22 = arith.constant 0 : index
    %37 = vector.load %arg8[%c0_21, %c0_22] : memref<1x96xf32, #tpu.memory_space<vmem>>, vector<1x96xf32>
    %38 = vector.broadcast %37 : vector<1x96xf32> to vector<34x96xf32>
    %39 = arith.addf %36, %38 : vector<34x96xf32>
    %c0_23 = arith.constant 0 : index
    %c0_24 = arith.constant 0 : index
    %40 = vector.load %arg10[%c0_23, %c0_24] : memref<34x96xf32, #tpu.memory_space<vmem>>, vector<34x96xf32>
    tpu.vector_store %arg10[%c0_23, %c0_24], %39 {strides = array<i32>} : memref<34x96xf32, #tpu.memory_space<vmem>>, vector<34x96xf32>,
    return
  }
  func.func @transform_0(%arg0: i32) -> (i32, i32) {
    %c0_i32 = arith.constant 0 : i32
    %c0_i32_0 = arith.constant 0 : i32
    return %arg0, %c0_i32 : i32, i32
  }
  func.func @transform_1(%arg0: i32) -> (i32, i32) {
    %c0_i32 = arith.constant 0 : i32
    %c0_i32_0 = arith.constant 0 : i32
    %c0_i32_1 = arith.constant 0 : i32
    return %c0_i32, %c0_i32_0 : i32, i32
  }
  func.func @transform_2(%arg0: i32) -> (i32, i32) {
    %c0_i32 = arith.constant 0 : i32
    %c0_i32_0 = arith.constant 0 : i32
    %c0_i32_1 = arith.constant 0 : i32
    return %c0_i32, %c0_i32_0 : i32, i32
  }
  func.func @transform_3(%arg0: i32) -> (i32, i32) {
    %c0_i32 = arith.constant 0 : i32
    %c0_i32_0 = arith.constant 0 : i32
    return %arg0, %c0_i32 : i32, i32
  }
  func.func @transform_4(%arg0: i32) -> (i32, i32) {
    %c0_i32 = arith.constant 0 : i32
    %c0_i32_0 = arith.constant 0 : i32
    %c0_i32_1 = arith.constant 0 : i32
    return %c0_i32, %c0_i32_0 : i32, i32
  }
  func.func @transform_5(%arg0: i32) -> (i32, i32) {
    %c0_i32 = arith.constant 0 : i32
    %c0_i32_0 = arith.constant 0 : i32
    %c0_i32_1 = arith.constant 0 : i32
    return %c0_i32, %c0_i32_0 : i32, i32
  }
  func.func @transform_6(%arg0: i32) -> (i32, i32) {
    %c0_i32 = arith.constant 0 : i32
    %c0_i32_0 = arith.constant 0 : i32
    %c0_i32_1 = arith.constant 0 : i32
    return %c0_i32, %c0_i32_0 : i32, i32
  }
  func.func @transform_7(%arg0: i32) -> (i32, i32) {
    %c0_i32 = arith.constant 0 : i32
    %c0_i32_0 = arith.constant 0 : i32
    %c0_i32_1 = arith.constant 0 : i32
    return %c0_i32, %c0_i32_0 : i32, i32
  }
  func.func @transform_8(%arg0: i32) -> (i32, i32) {
    %c0_i32 = arith.constant 0 : i32
    %c0_i32_0 = arith.constant 0 : i32
    return %arg0, %c0_i32 : i32, i32
  }
  func.func @transform_9(%arg0: i32) -> (i32, i32) {
    %c0_i32 = arith.constant 0 : i32
    %c0_i32_0 = arith.constant 0 : i32
    return %arg0, %c0_i32 : i32, i32
  }
}

</mosaic_0001>

<bundles_post_ra>
// kernel: masked_decoder_forward.8
= control target key start
LH: loop header
LB: loop body
LE: loop exit
PB: predicated region body
PF: predicated region fallthrough
CT: control target
= control target key end

     0   :  { %vm40_vm0 = vcmask 261120   ;;  %vm67_vm1 = vcmask 254976   ;;  %s135_s1 = inlined_call_operand.vmem [shape: bf16[32,32], index: 1, kind: input, shape index: {}]   ;;  %s136_s0 = inlined_call_operand.vmem [shape: f32[18,32], index: 0, kind: input, shape index: {}]   ;;  %s137_s2 = inlined_call_operand.vmem [shape: f32[1,32], index: 2, kind: input, shape index: {}]   ;;  %s138_s3 = inlined_call_operand.vmem [shape: f32[18,32], index: 3, kind: output, shape index: {}]  }
   0x1   :  { %v84_v0 = vld [vmem:[%s135_s1 + $0x8] sm:$0xff]  ;;  %v83_v1 = vld [vmem:[%s135_s1] sm:$0xff]  ;;  %v17_v4 = vld [vmem:[%s136_s0 + $0x10] sm:$0x3] }
   0x2   :  { %53 = vmatpush.bf16.msra.mxu0 %v84_v0  ;;  %85 = vmatpush.bf16.msra.mxu1 %v84_v0  ;;  %v15_v2 = vld [vmem:[%s136_s0] sm:$0xff]  ;;  %v16_v3 = vld [vmem:[%s136_s0 + $0x8] sm:$0xff]  ;;  %v19_v6 = vpack.c.bf16 %v17_v4, %v17_v4 }
   0x3   :  { %v18_v5 = vpack.c.bf16 %v16_v3, %v15_v2  ;;  %v87_v7 = vld [vmem:[%s137_s2] ss:$0 sm:$0xff] }
   0x6   :  { %54 = vmatpush.bf16.msra.mxu0 %v83_v1  ;;  %86 = vmatpush.bf16.msra.mxu1 %v83_v1 }
   0x9   :  { %81 = vmatmul.msk.bf16.vlgmr.msra.gmra.mxu0 %vm40_vm0, %v18_v5  ;;  %82 = vmatmul.msk.bf16.vlgmr.msra.gmra.mxu1 %vm40_vm0, %v19_v6 }
  0x86   :  { %v56_v8 = vpop.f32.mrf.mxu0  ;;  %v61_v9 = vpop.f32.mrf.mxu1 }
  0x87   :  { %v57_v10 = vadd.f32 %v87_v7, %v56_v8  ;;  %v62_v11 = vadd.f32 %v87_v7, %v61_v9 }
  0x89   :  { %65 = vst.msk [vmem:[%s138_s3] sm:$0xff] %vm40_vm0, %v57_v10 }
  0x8a   :  { %68 = vst.msk [vmem:[%s138_s3 + $0x10] sm:$0x3] %vm67_vm1, %v62_v11 }
  0x8e   :  { %v58_v12 = vpop.f32.mrf.mxu0  ;;  %v63_v13 = vpop.f32.mrf.mxu1 }
  0x8f   :  { %v59_v14 = vadd.f32 %v87_v7, %v58_v12 }
  0x91   :  { %66 = vst.msk [vmem:[%s138_s3 + $0x8] sm:$0xff] %vm40_vm0, %v59_v14 }

// kernel: masked_decoder_forward.9
= control target key start
LH: loop header
LB: loop body
LE: loop exit
PB: predicated region body
PF: predicated region fallthrough
CT: control target
= control target key end

     0   :  { %vm41_vm0 = vcmask 254976   ;;  %vm28_vm1 = vcmask 261120   ;;  %v262_v10 = vmov 32.0   ;;  %s388_s0 = inlined_call_operand.vmem [shape: f32[34,32], index: 0, kind: input, shape index: {}]   ;;  %s389_s1 = inlined_call_operand.vmem [shape: f32[1,32], index: 1, kind: input, shape index: {}]   ;;  %s390_s2 = inlined_call_operand.vmem [shape: f32[1,32], index: 2, kind: input, shape index: {}]   ;;  %s391_s4 = inlined_call_operand.vmem [shape: f32[1,96], index: 4, kind: input, shape index: {}]   ;;  %s392_s3 = inlined_call_operand.vmem [shape: bf16[32,96], index: 3, kind: input, shape index: {}]   ;;  %s393_s5 = inlined_call_operand.vmem [shape: f32[34,96], index: 5, kind: output, shape index: {}]  }
   0x1   :  { %v25_v0 = vld [vmem:[%s388_s0 + $0x20] sm:$0x3]  ;;  %v22_v1 = vld [vmem:[%s388_s0 + $0x8] sm:$0xff]  ;;  %v24_v4 = vld [vmem:[%s388_s0 + $0x18] sm:$0xff]  ;;  %250 = vrcp.f32 %v262_v10 }
   0x2   :  { %v42_v2 = vsel %vm41_vm0, %v25_v0, 0.0  ;;  %v32_v3 = vsel %vm28_vm1, %v22_v1, 0.0  ;;  %v38_v5 = vsel %vm28_vm1, %v24_v4, 0.0  ;;  %v23_v6 = vld [vmem:[%s388_s0 + $0x10] sm:$0xff]  ;;  %v21_v7 = vld [vmem:[%s388_s0] sm:$0xff]  ;;  %v241_v42 = vld [vmem:[%s392_s3 + $0x8] sm:$0xff] }
   0x3   :  { %43 = vadd.xlane.f32.xlu0 %v42_v2  ;;  %33 = vadd.xlane.f32.xlu1 %v32_v3  ;;  %v35_v8 = vsel %vm28_vm1, %v23_v6, 0.0  ;;  %v29_v9 = vsel %vm28_vm1, %v21_v7, 0.0  ;;  %v240_v43 = vld [vmem:[%s392_s3] sm:$0xff] }
   0x4   :  { %39 = vadd.xlane.f32.xlu2 %v38_v5  ;;  %243 = vmatpush.bf16.msra.mxu2 %v241_v42 }
   0x5   :  { %201 = vmatpush.bf16.msra.mxu0 %v241_v42  ;;  %242 = vmatpush.bf16.msra.mxu1 %v241_v42 }
   0x7   :  { %v251_v11 = vpop.eup %250 }
   0x8   :  { %v46_v12 = vmul.f32 32.0, %v251_v11  ;;  %vm50_vm2 = vweird.f32 %v251_v11  ;;  %245 = vmatpush.bf16.msra.mxu2 %v240_v43 }
   0x9   :  { %202 = vmatpush.bf16.msra.mxu0 %v240_v43  ;;  %244 = vmatpush.bf16.msra.mxu1 %v240_v43 }
   0xa   :  { %v47_v13 = vsub.f32 1.0, %v46_v12 }
   0xb   :  { %36 = vadd.xlane.f32.xlu1 %v35_v8  ;;  %30 = vadd.xlane.f32.xlu0 %v29_v9 }
   0xc   :  { %v48_v14 = vmul.f32 %v251_v11, %v47_v13 }
   0xe   :  { %v49_v15 = vadd.f32 %v251_v11, %v48_v14 }
  0x10   :  { %v313_v16 = vsel %vm50_vm2, %v251_v11, %v49_v15  ;;  %v247_v11 = vld [vmem:[%s389_s1] ss:$0 sm:$0xff] }
  0x76   :  { %v44_v17 = vpop.xlane.xlu0 %43  ;;  %v34_v18 = vpop.xlane.xlu1 %33 }
  0x77   :  { %v56_v19 = vmul.f32 %v313_v16, %v44_v17  ;;  %v53_v20 = vmul.f32 %v313_v16, %v34_v18  ;;  %v40_v25 = vpop.xlane.xlu2 %39 }
  0x78   :  { %v55_v32 = vmul.f32 %v313_v16, %v40_v25 }
  0x79   :  { %v317_v21 = vsub.f32 %v25_v0, %v56_v19  ;;  %v319_v22 = vsub.f32 %v22_v1, %v53_v20 }
  0x7a   :  { %v334_v35 = vsub.f32 %v24_v4, %v55_v32 }
  0x7b   :  { %v66_v23 = vmul.f32 %v317_v21, %v317_v21  ;;  %v63_v24 = vmul.f32 %v319_v22, %v319_v22 }
  0x7c   :  { %v65_v40 = vmul.f32 %v334_v35, %v334_v35 }
  0x7d   :  { %v79_v26 = vsel %vm41_vm0, %v66_v23, 0.0  ;;  %v70_v27 = vsel %vm28_vm1, %v63_v24, 0.0 }
  0x7e   :  { %80 = vadd.xlane.f32.xlu2 %v79_v26  ;;  %71 = vadd.xlane.f32.xlu1 %v70_v27  ;;  %v37_v28 = vpop.xlane.xlu1 %36  ;;  %v31_v29 = vpop.xlane.xlu0 %30  ;;  %v76_v41 = vsel %vm28_vm1, %v65_v40, 0.0 }
  0x7f   :  { %v54_v30 = vmul.f32 %v313_v16, %v37_v28  ;;  %v52_v31 = vmul.f32 %v313_v16, %v31_v29 }
  0x81   :  { %v330_v33 = vsub.f32 %v23_v6, %v54_v30  ;;  %v332_v34 = vsub.f32 %v21_v7, %v52_v31 }
  0x83   :  { %v64_v36 = vmul.f32 %v330_v33, %v330_v33  ;;  %v62_v37 = vmul.f32 %v332_v34, %v332_v34 }
  0x85   :  { %v73_v38 = vsel %vm28_vm1, %v64_v36, 0.0  ;;  %v67_v39 = vsel %vm28_vm1, %v62_v37, 0.0 }
  0x86   :  { %74 = vadd.xlane.f32.xlu2 %v73_v38  ;;  %68 = vadd.xlane.f32.xlu0 %v67_v39 }
  0x8e   :  { %77 = vadd.xlane.f32.xlu0 %v76_v41 }
  0xf1   :  { %v81_v44 = vpop.xlane.xlu2 %80  ;;  %v72_v45 = vpop.xlane.xlu1 %71 }
  0xf2   :  { %v86_v46 = vmul.f32 %v81_v44, %v313_v16  ;;  %v83_v47 = vmul.f32 %v72_v45, %v313_v16 }
  0xf4   :  { %v91_v48 = vadd.f32 1e-05, %v86_v46  ;;  %v88_v49 = vadd.f32 1e-05, %v83_v47 }
  0xf6   :  { %252 = vrsqrt.f32 %v91_v48  ;;  %vm138_vm4 = vweird.f32 %v91_v48  ;;  %vm108_vm5 = vweird.f32 %v88_v49 }
  0xf7   :  { %254 = vrsqrt.f32 %v88_v49 }
  0xf9   :  { %v75_v50 = vpop.xlane.xlu2 %74  ;;  %v69_v51 = vpop.xlane.xlu0 %68 }
  0xfa   :  { %v84_v52 = vmul.f32 %v75_v50, %v313_v16  ;;  %v82_v53 = vmul.f32 %v69_v51, %v313_v16 }
  0xfc   :  { %v253_v54 = vpop.eup %252  ;;  %v89_v55 = vadd.f32 1e-05, %v84_v52  ;;  %v87_v56 = vadd.f32 1e-05, %v82_v53 }
  0xfd   :  { %v255_v57 = vpop.eup %254  ;;  %v133_v58 = vmul.f32 %v253_v54, %v91_v48  ;;  %vm139_vm3 = vweird.f32 %v253_v54 }
  0xfe   :  { %v103_v59 = vmul.f32 %v255_v57, %v88_v49  ;;  %256 = vrsqrt.f32 %v89_v55  ;;  %vm140_vm6 = vmor %vm138_vm4, %vm139_vm3  ;;  %vm109_vm7 = vweird.f32 %v255_v57  ;;  %vm118_vm9 = vweird.f32 %v89_v55 }
  0xff   :  { %v134_v60 = vmul.f32 %v253_v54, %v133_v58  ;;  %258 = vrsqrt.f32 %v87_v56  ;;  %vm110_vm8 = vmor %vm108_vm5, %vm109_vm7  ;;  %vm98_vm12 = vweird.f32 %v87_v56  ;;  %vm223_vm3 = vcmask 779264  }
 0x100   :  { %v104_v61 = vmul.f32 %v255_v57, %v103_v59  ;;  %vm218_vm4 = vcmask 785408  }
 0x101   :  { %v135_v62 = vmul.f32 0.5, %v134_v60  ;;  %v78_v63 = vpop.xlane.xlu0 %77 }
 0x102   :  { %v105_v0 = vmul.f32 0.5, %v104_v61  ;;  %v85_v1 = vmul.f32 %v78_v63, %v313_v16  ;;  %v248_v16 = vld [vmem:[%s390_s2] ss:$0 sm:$0xff] }
 0x103   :  { %v136_v2 = vsub.f32 1.5, %v135_v62 }
 0x104   :  { %v257_v3 = vpop.eup %256  ;;  %v106_v4 = vsub.f32 1.5, %v105_v0  ;;  %v90_v5 = vadd.f32 1e-05, %v85_v1 }
 0x105   :  { %v259_v6 = vpop.eup %258  ;;  %v137_v7 = vmul.f32 %v253_v54, %v136_v2  ;;  %v113_v8 = vmul.f32 %v257_v3, %v89_v55  ;;  %vm119_vm11 = vweird.f32 %v257_v3 }
 0x106   :  { %v107_v9 = vmul.f32 %v255_v57, %v106_v4  ;;  %v93_v10 = vmul.f32 %v259_v6, %v87_v56  ;;  %260 = vrsqrt.f32 %v90_v5  ;;  %vm99_vm10 = vweird.f32 %v259_v6  ;;  %vm120_vm14 = vmor %vm118_vm9, %vm119_vm11 }
 0x107   :  { %v141_v12 = vsel %vm140_vm6, %v253_v54, %v137_v7  ;;  %v114_v13 = vmul.f32 %v257_v3, %v113_v8  ;;  %vm100_vm13 = vmor %vm98_vm12, %vm99_vm10  ;;  %vm128_vm0 = vweird.f32 %v90_v5 }
 0x108   :  { %v94_v14 = vmul.f32 %v259_v6, %v93_v10  ;;  %v146_v15 = vmul.f32 %v141_v12, %v317_v21  ;;  %v111_v18 = vsel %vm110_vm8, %v255_v57, %v107_v9 }
 0x109   :  { %v115_v17 = vmul.f32 0.5, %v114_v13  ;;  %v143_v27 = vmul.f32 %v111_v18, %v319_v22 }
 0x10a   :  { %v95_v19 = vmul.f32 0.5, %v94_v14  ;;  %v154_v20 = vmul.f32 %v247_v11, %v146_v15 }
 0x10b   :  { %v116_v23 = vsub.f32 1.5, %v115_v17  ;;  %v151_v39 = vmul.f32 %v247_v11, %v143_v27 }
 0x10c   :  { %v261_v24 = vpop.eup %260  ;;  %v96_v25 = vsub.f32 1.5, %v95_v19  ;;  %v162_v26 = vadd.f32 %v248_v16, %v154_v20 }
 0x10d   :  { %v117_v28 = vmul.f32 %v257_v3, %v116_v23  ;;  %v123_v21 = vmul.f32 %v261_v24, %v90_v5  ;;  %vm129_vm15 = vweird.f32 %v261_v24  ;;  %v159_v44 = vadd.f32 %v248_v16, %v151_v39 }
 0x10e   :  { %v97_v29 = vmul.f32 %v259_v6, %v96_v25  ;;  %v165_v30 = vpack.c.bf16 %v162_v26, %v162_v26  ;;  %vm130_vm2 = vmor %vm128_vm0, %vm129_vm15 }
 0x10f   :  { %v124_v31 = vmul.f32 %v261_v24, %v123_v21  ;;  %v121_v36 = vsel %vm120_vm14, %v257_v3, %v117_v28 }
 0x110   :  { %v101_v32 = vsel %vm100_vm13, %v259_v6, %v97_v29  ;;  %239 = vmatmul.msk.bf16.vlgmr.msra.gmra.mxu2 %vm28_vm1, %v165_v30  ;;  %v144_v41 = vmul.f32 %v121_v36, %v330_v33  ;;  %v249_v33 = vld [vmem:[%s391_s4] ss:$0 sm:$0xff] }
 0x111   :  { %v142_v37 = vmul.f32 %v101_v32, %v332_v34  ;;  %v125_v38 = vmul.f32 0.5, %v124_v31 }
 0x112   :  { %v152_v48 = vmul.f32 %v247_v11, %v144_v41 }
 0x113   :  { %v126_v40 = vsub.f32 1.5, %v125_v38  ;;  %v150_v22 = vmul.f32 %v247_v11, %v142_v37 }
 0x114   :  { %v160_v49 = vadd.f32 %v248_v16, %v152_v48 }
 0x115   :  { %v127_v42 = vmul.f32 %v261_v24, %v126_v40  ;;  %v158_v43 = vadd.f32 %v248_v16, %v150_v22 }
 0x117   :  { %v131_v45 = vsel %vm130_vm2, %v261_v24, %v127_v42  ;;  %v163_v46 = vpack.c.bf16 %v159_v44, %v158_v43 }
 0x118   :  { %v145_v47 = vmul.f32 %v131_v45, %v334_v35 }
 0x119   :  { %237 = vmatmul.msk.bf16.vlgmr.msra.gmra.mxu0 %vm28_vm1, %v163_v46 }
 0x11a   :  { %v153_v34 = vmul.f32 %v247_v11, %v145_v47 }
 0x11c   :  { %v161_v50 = vadd.f32 %v248_v16, %v153_v34 }
 0x11e   :  { %v164_v51 = vpack.c.bf16 %v161_v50, %v160_v49 }
 0x120   :  { %238 = vmatmul.msk.bf16.vlgmr.msra.gmra.mxu1 %vm28_vm1, %v164_v51 }
 0x193   :  { %v214_v52 = vpop.f32.mrf.mxu2 }
 0x194   :  { %v215_v53 = vadd.f32 %v249_v33, %v214_v52 }
 0x196   :  { %224 = vst.msk [vmem:[%s393_s5 + $0x20] sm:$0x3] %vm223_vm3, %v215_v53  ;;  %v204_v35 = vpop.f32.mrf.mxu0 }
 0x197   :  { %v205_v54 = vadd.f32 %v249_v33, %v204_v35 }
 0x199   :  { %219 = vst.msk [vmem:[%s393_s5] sm:$0xff] %vm218_vm4, %v205_v54 }
 0x19b   :  { %v216_v55 = vpop.f32.mrf.mxu2 }
 0x19d   :  { %v209_v56 = vpop.f32.mrf.mxu1 }
 0x19e   :  { %v206_v57 = vpop.f32.mrf.mxu0  ;;  %v210_v58 = vadd.f32 %v249_v33, %v209_v56 }
 0x19f   :  { %v207_v59 = vadd.f32 %v249_v33, %v206_v57 }
 0x1a0   :  { %221 = vst.msk [vmem:[%s393_s5 + $0x10] sm:$0xff] %vm218_vm4, %v210_v58 }
 0x1a1   :  { %220 = vst.msk [vmem:[%s393_s5 + $0x8] sm:$0xff] %vm218_vm4, %v207_v59 }
 0x1a5   :  { %v211_v60 = vpop.f32.mrf.mxu1 }
 0x1a6   :  { %v212_v61 = vadd.f32 %v249_v33, %v211_v60 }
 0x1a8   :  { %222 = vst.msk [vmem:[%s393_s5 + $0x18] sm:$0xff] %vm218_vm4, %v212_v61 }

// kernel: masked_decoder_forward.11
= control target key start
LH: loop header
LB: loop body
LE: loop exit
PB: predicated region body
PF: predicated region fallthrough
CT: control target
= control target key end

     0   :  { %vm60_vm0 = vcmask 261120   ;;  %vm107_vm1 = vcmask 254976   ;;  %v579_v37 = vmov 32.0   ;;  %s878_s1 = inlined_call_operand.vmem [shape: bf16[32,32], index: 1, kind: input, shape index: {}]   ;;  %s879_s0 = inlined_call_operand.vmem [shape: f32[34,32], index: 0, kind: input, shape index: {}]   ;;  %s880_s2 = inlined_call_operand.vmem [shape: f32[1,32], index: 2, kind: input, shape index: {}]   ;;  %s881_s3 = inlined_call_operand.vmem [shape: f32[34,32], index: 3, kind: input, shape index: {}]   ;;  %s882_s8 = inlined_call_operand.vmem [shape: f32[34,32], index: 8, kind: output, shape index: {0}]   ;;  %s883_s4 = inlined_call_operand.vmem [shape: f32[1,32], index: 4, kind: input, shape index: {}]   ;;  %s884_s5 = inlined_call_operand.vmem [shape: f32[1,32], index: 5, kind: input, shape index: {}]   ;;  %s885_s7 = inlined_call_operand.vmem [shape: f32[1,128], index: 7, kind: input, shape index: {}]   ;;  %s886_s6 = inlined_call_operand.vmem [shape: bf16[32,128], index: 6, kind: input, shape index: {}]   ;;  %s887_s9 = inlined_call_operand.vmem [shape: f32[34,128], index: 9, kind: output, shape index: {1}]  }
   0x1   :  { %v535_v0 = vld [vmem:[%s878_s1 + $0x8] sm:$0xff]  ;;  %v534_v1 = vld [vmem:[%s878_s1] sm:$0xff]  ;;  %v34_v4 = vld [vmem:[%s879_s0 + $0x10] sm:$0xff]  ;;  %547 = vrcp.f32 %v579_v37 }
   0x2   :  { %v32_v2 = vld [vmem:[%s879_s0] sm:$0xff]  ;;  %v33_v3 = vld [vmem:[%s879_s0 + $0x8] sm:$0xff]  ;;  %76 = vmatpush.bf16.msra.mxu0 %v535_v0  ;;  %538 = vmatpush.bf16.msra.mxu2 %v535_v0  ;;  %v35_v5 = vld [vmem:[%s879_s0 + $0x18] sm:$0xff] }
   0x3   :  { %v37_v6 = vpack.c.bf16 %v33_v3, %v32_v2  ;;  %v38_v7 = vpack.c.bf16 %v35_v5, %v34_v4  ;;  %v36_v8 = vld [vmem:[%s879_s0 + $0x20] sm:$0x3]  ;;  %v95_v17 = vld [vmem:[%s881_s3 + $0x10] sm:$0xff]  ;;  %v94_v20 = vld [vmem:[%s881_s3 + $0x8] sm:$0xff] }
   0x4   :  { %v39_v9 = vpack.c.bf16 %v36_v8, %v36_v8  ;;  %v543_v10 = vld [vmem:[%s880_s2] ss:$0 sm:$0xff]  ;;  %v96_v27 = vld [vmem:[%s881_s3 + $0x18] sm:$0xff]  ;;  %v537_v8 = vld [vmem:[%s886_s6 + $0x8] sm:$0xff] }
   0x5   :  { %v93_v12 = vld [vmem:[%s881_s3] sm:$0xff]  ;;  %282 = vmatpush.bf16.msra.mxu1 %v537_v8  ;;  %540 = vmatpush.bf16.msra.mxu3 %v537_v8 }
   0x6   :  { %77 = vmatpush.bf16.msra.mxu0 %v534_v1  ;;  %539 = vmatpush.bf16.msra.mxu2 %v534_v1  ;;  %v97_v32 = vld [vmem:[%s881_s3 + $0x20] sm:$0x3] }
   0x7   :  { %v548_v38 = vpop.eup %547 }
   0x8   :  { %v127_v39 = vmul.f32 32.0, %v548_v38  ;;  %vm131_vm2 = vweird.f32 %v548_v38 }
   0x9   :  { %520 = vmatmul.msk.bf16.vlgmr.msra.gmra.mxu0 %vm60_vm0, %v37_v6  ;;  %521 = vmatmul.msk.bf16.vlgmr.msra.gmra.mxu2 %vm60_vm0, %v38_v7 }
   0xa   :  { %v128_v40 = vsub.f32 1.0, %v127_v39 }
   0xc   :  { %v129_v41 = vmul.f32 %v548_v38, %v128_v40 }
   0xe   :  { %v130_v42 = vadd.f32 %v548_v38, %v129_v41 }
  0x10   :  { %v697_v43 = vsel %vm131_vm2, %v548_v38, %v130_v42 }
  0x19   :  { %522 = vmatmul.msk.bf16.gmra.mxu2 %vm60_vm0, %v39_v9 }
  0x86   :  { %v79_v11 = vpop.f32.mrf.mxu0 }
  0x87   :  { %v80_v13 = vadd.f32 %v543_v10, %v79_v11 }
  0x89   :  { %v98_v14 = vadd.f32 %v93_v12, %v80_v13  ;;  %v536_v12 = vld [vmem:[%s886_s6] sm:$0xff] }
  0x8a   :  { %283 = vmatpush.bf16.msra.mxu1 %v536_v12  ;;  %541 = vmatpush.bf16.msra.mxu3 %v536_v12 }
  0x8b   :  { %103 = vst.msk [vmem:[%s882_s8] sm:$0xff] %vm60_vm0, %v98_v14  ;;  %v111_v15 = vsel %vm60_vm0, %v98_v14, 0.0 }
  0x8c   :  { %v84_v16 = vpop.f32.mrf.mxu2  ;;  %112 = vadd.xlane.f32.xlu1 %v111_v15 }
  0x8d   :  { %v85_v18 = vadd.f32 %v543_v10, %v84_v16 }
  0x8e   :  { %v81_v19 = vpop.f32.mrf.mxu0 }
  0x8f   :  { %v100_v21 = vadd.f32 %v95_v17, %v85_v18  ;;  %v82_v22 = vadd.f32 %v543_v10, %v81_v19 }
  0x91   :  { %105 = vst.msk [vmem:[%s882_s8 + $0x10] sm:$0xff] %vm60_vm0, %v100_v21  ;;  %v99_v23 = vadd.f32 %v94_v20, %v82_v22  ;;  %v117_v24 = vsel %vm60_vm0, %v100_v21, 0.0 }
  0x92   :  { %118 = vadd.xlane.f32.xlu0 %v117_v24 }
  0x93   :  { %104 = vst.msk [vmem:[%s882_s8 + $0x8] sm:$0xff] %vm60_vm0, %v99_v23  ;;  %v114_v25 = vsel %vm60_vm0, %v99_v23, 0.0 }
  0x94   :  { %v86_v26 = vpop.f32.mrf.mxu2  ;;  %115 = vadd.xlane.f32.xlu1 %v114_v25 }
  0x95   :  { %v87_v28 = vadd.f32 %v543_v10, %v86_v26 }
  0x97   :  { %v101_v29 = vadd.f32 %v96_v27, %v87_v28 }
  0x99   :  { %106 = vst.msk [vmem:[%s882_s8 + $0x18] sm:$0xff] %vm60_vm0, %v101_v29  ;;  %v120_v30 = vsel %vm60_vm0, %v101_v29, 0.0 }
  0x9a   :  { %121 = vadd.xlane.f32.xlu0 %v120_v30 }
  0x9c   :  { %v89_v31 = vpop.f32.mrf.mxu2 }
  0x9d   :  { %v90_v33 = vadd.f32 %v543_v10, %v89_v31 }
  0x9f   :  { %v102_v34 = vadd.f32 %v97_v32, %v90_v33 }
  0xa1   :  { %v123_v35 = vsel %vm107_vm1, %v102_v34, 0.0  ;;  %108 = vst.msk [vmem:[%s882_s8 + $0x20] sm:$0x3] %vm107_vm1, %v102_v34 }
  0xa2   :  { %124 = vadd.xlane.f32.xlu2 %v123_v35 }
  0xa4   :  { %v91_v36 = vpop.f32.mrf.mxu2 }
  0xff   :  { %v113_v44 = vpop.xlane.xlu1 %112 }
 0x100   :  { %v133_v45 = vmul.f32 %v697_v43, %v113_v44 }
 0x102   :  { %v700_v46 = vsub.f32 %v98_v14, %v133_v45 }
 0x104   :  { %v143_v47 = vmul.f32 %v700_v46, %v700_v46 }
 0x105   :  { %v119_v48 = vpop.xlane.xlu0 %118 }
 0x106   :  { %v135_v49 = vmul.f32 %v697_v43, %v119_v48  ;;  %v148_v50 = vsel %vm60_vm0, %v143_v47, 0.0 }
 0x107   :  { %149 = vadd.xlane.f32.xlu1 %v148_v50  ;;  %v116_v51 = vpop.xlane.xlu1 %115 }
 0x108   :  { %v706_v52 = vsub.f32 %v100_v21, %v135_v49  ;;  %v134_v53 = vmul.f32 %v697_v43, %v116_v51 }
 0x10a   :  { %v145_v54 = vmul.f32 %v706_v52, %v706_v52  ;;  %v711_v55 = vsub.f32 %v99_v23, %v134_v53  ;;  %v544_v53 = vld [vmem:[%s883_s4] ss:$0 sm:$0xff] }
 0x10c   :  { %v154_v56 = vsel %vm60_vm0, %v145_v54, 0.0  ;;  %v144_v60 = vmul.f32 %v711_v55, %v711_v55 }
 0x10d   :  { %155 = vadd.xlane.f32.xlu2 %v154_v56  ;;  %v122_v57 = vpop.xlane.xlu0 %121 }
 0x10e   :  { %v136_v58 = vmul.f32 %v697_v43, %v122_v57  ;;  %v151_v63 = vsel %vm60_vm0, %v144_v60, 0.0 }
 0x110   :  { %v715_v59 = vsub.f32 %v101_v29, %v136_v58 }
 0x112   :  { %v146_v61 = vmul.f32 %v715_v59, %v715_v59 }
 0x114   :  { %v157_v62 = vsel %vm60_vm0, %v146_v61, 0.0 }
 0x115   :  { %v125_v0 = vpop.xlane.xlu2 %124  ;;  %158 = vadd.xlane.f32.xlu0 %v157_v62  ;;  %152 = vadd.xlane.f32.xlu2 %v151_v63  ;;  %v545_v63 = vld [vmem:[%s884_s5] ss:$0 sm:$0xff] }
 0x116   :  { %v137_v1 = vmul.f32 %v697_v43, %v125_v0 }
 0x118   :  { %v724_v2 = vsub.f32 %v102_v34, %v137_v1 }
 0x11a   :  { %v147_v3 = vmul.f32 %v724_v2, %v724_v2 }
 0x11c   :  { %v160_v4 = vsel %vm107_vm1, %v147_v3, 0.0 }
 0x11d   :  { %161 = vadd.xlane.f32.xlu0 %v160_v4 }
 0x17a   :  { %v150_v5 = vpop.xlane.xlu1 %149 }
 0x17b   :  { %v163_v6 = vmul.f32 %v150_v5, %v697_v43 }
 0x17d   :  { %v168_v7 = vadd.f32 1e-05, %v163_v6 }
 0x17f   :  { %549 = vrsqrt.f32 %v168_v7  ;;  %vm179_vm6 = vweird.f32 %v168_v7 }
 0x180   :  { %v156_v9 = vpop.xlane.xlu2 %155 }
 0x181   :  { %v165_v10 = vmul.f32 %v156_v9, %v697_v43 }
 0x183   :  { %v170_v11 = vadd.f32 1e-05, %v165_v10 }
 0x185   :  { %v550_v13 = vpop.eup %549  ;;  %551 = vrsqrt.f32 %v170_v11  ;;  %vm199_vm5 = vweird.f32 %v170_v11 }
 0x186   :  { %v174_v14 = vmul.f32 %v550_v13, %v168_v7  ;;  %vm180_vm4 = vweird.f32 %v550_v13 }
 0x187   :  { %vm181_vm8 = vmor %vm179_vm6, %vm180_vm4 }
 0x188   :  { %v159_v15 = vpop.xlane.xlu0 %158  ;;  %v153_v16 = vpop.xlane.xlu2 %152  ;;  %v175_v17 = vmul.f32 %v550_v13, %v174_v14  ;;  %v546_v14 = vld [vmem:[%s885_s7] ss:$0 sm:$0xff] }
 0x189   :  { %v166_v18 = vmul.f32 %v159_v15, %v697_v43  ;;  %v164_v19 = vmul.f32 %v153_v16, %v697_v43 }
 0x18a   :  { %v176_v24 = vmul.f32 0.5, %v175_v17 }
 0x18b   :  { %v552_v20 = vpop.eup %551  ;;  %v171_v21 = vadd.f32 1e-05, %v166_v18  ;;  %v169_v22 = vadd.f32 1e-05, %v164_v19 }
 0x18c   :  { %v194_v23 = vmul.f32 %v552_v20, %v170_v11  ;;  %v177_v28 = vsub.f32 1.5, %v176_v24  ;;  %vm200_vm3 = vweird.f32 %v552_v20 }
 0x18d   :  { %553 = vrsqrt.f32 %v171_v21  ;;  %vm201_vm7 = vmor %vm199_vm5, %vm200_vm3  ;;  %vm209_vm11 = vweird.f32 %v171_v21  ;;  %vm189_vm13 = vweird.f32 %v169_v22 }
 0x18e   :  { %v195_v25 = vmul.f32 %v552_v20, %v194_v23  ;;  %555 = vrsqrt.f32 %v169_v22  ;;  %v178_v36 = vmul.f32 %v550_v13, %v177_v28 }
 0x190   :  { %v196_v26 = vmul.f32 0.5, %v195_v25  ;;  %v162_v27 = vpop.xlane.xlu0 %161  ;;  %v182_v42 = vsel %vm181_vm8, %v550_v13, %v178_v36 }
 0x191   :  { %v167_v29 = vmul.f32 %v162_v27, %v697_v43  ;;  %v223_v49 = vmul.f32 %v182_v42, %v700_v46 }
 0x192   :  { %v197_v30 = vsub.f32 1.5, %v196_v26 }
 0x193   :  { %v554_v31 = vpop.eup %553  ;;  %v172_v32 = vadd.f32 1e-05, %v167_v29  ;;  %v231_v62 = vmul.f32 %v544_v53, %v223_v49 }
 0x194   :  { %v556_v33 = vpop.eup %555  ;;  %v198_v34 = vmul.f32 %v552_v20, %v197_v30  ;;  %v204_v35 = vmul.f32 %v554_v31, %v171_v21  ;;  %vm210_vm9 = vweird.f32 %v554_v31 }
 0x195   :  { %v184_v37 = vmul.f32 %v556_v33, %v169_v22  ;;  %557 = vrsqrt.f32 %v172_v32  ;;  %vm190_vm10 = vweird.f32 %v556_v33  ;;  %vm211_vm12 = vmor %vm209_vm11, %vm210_vm9  ;;  %vm219_vm1 = vweird.f32 %v172_v32 }
 0x196   :  { %v205_v38 = vmul.f32 %v554_v31, %v204_v35  ;;  %v202_v40 = vsel %vm201_vm7, %v552_v20, %v198_v34  ;;  %vm191_vm14 = vmor %vm189_vm13, %vm190_vm10  ;;  %v239_v7 = vadd.f32 %v545_v63, %v231_v62 }
 0x197   :  { %v185_v39 = vmul.f32 %v556_v33, %v184_v37  ;;  %v225_v47 = vmul.f32 %v202_v40, %v706_v52 }
 0x198   :  { %v206_v41 = vmul.f32 0.5, %v205_v38 }
 0x199   :  { %v186_v43 = vmul.f32 0.5, %v185_v39  ;;  %v233_v60 = vmul.f32 %v544_v53, %v225_v47 }
 0x19a   :  { %v207_v44 = vsub.f32 1.5, %v206_v41 }
 0x19b   :  { %v558_v45 = vpop.eup %557  ;;  %v187_v48 = vsub.f32 1.5, %v186_v43  ;;  %v241_v4 = vadd.f32 %v545_v63, %v233_v60 }
 0x19c   :  { %v208_v50 = vmul.f32 %v554_v31, %v207_v44  ;;  %v214_v51 = vmul.f32 %v558_v45, %v172_v32  ;;  %vm220_vm15 = vweird.f32 %v558_v45 }
 0x19d   :  { %v188_v54 = vmul.f32 %v556_v33, %v187_v48  ;;  %vm221_vm2 = vmor %vm219_vm1, %vm220_vm15 }
 0x19e   :  { %v212_v56 = vsel %vm211_vm12, %v554_v31, %v208_v50  ;;  %v215_v57 = vmul.f32 %v558_v45, %v214_v51 }
 0x19f   :  { %v226_v58 = vmul.f32 %v212_v56, %v715_v59  ;;  %v192_v52 = vsel %vm191_vm14, %v556_v33, %v188_v54 }
 0x1a0   :  { %v224_v61 = vmul.f32 %v192_v52, %v711_v55  ;;  %v216_v46 = vmul.f32 0.5, %v215_v57 }
 0x1a1   :  { %v234_v0 = vmul.f32 %v544_v53, %v226_v58 }
 0x1a2   :  { %v217_v1 = vsub.f32 1.5, %v216_v46  ;;  %v232_v3 = vmul.f32 %v544_v53, %v224_v61 }
 0x1a3   :  { %v242_v5 = vadd.f32 %v545_v63, %v234_v0 }
 0x1a4   :  { %v218_v6 = vmul.f32 %v558_v45, %v217_v1  ;;  %v240_v59 = vadd.f32 %v545_v63, %v232_v3 }
 0x1a5   :  { %v245_v8 = vpack.c.bf16 %v242_v5, %v241_v4 }
 0x1a6   :  { %v222_v9 = vsel %vm221_vm2, %v558_v45, %v218_v6  ;;  %v244_v55 = vpack.c.bf16 %v240_v59, %v239_v7 }
 0x1a7   :  { %532 = vmatmul.msk.bf16.vlgmr.msra.gmra.mxu3 %vm60_vm0, %v245_v8  ;;  %v227_v10 = vmul.f32 %v222_v9, %v724_v2 }
 0x1a8   :  { %531 = vmatmul.msk.bf16.vlgmr.msra.gmra.mxu1 %vm60_vm0, %v244_v55 }
 0x1a9   :  { %v235_v11 = vmul.f32 %v544_v53, %v227_v10 }
 0x1ab   :  { %v243_v12 = vadd.f32 %v545_v63, %v235_v11 }
 0x1ad   :  { %v246_v13 = vpack.c.bf16 %v243_v12, %v243_v12 }
 0x1b7   :  { %533 = vmatmul.msk.bf16.gmra.mxu3 %vm60_vm0, %v246_v13 }
 0x225   :  { %v285_v15 = vpop.f32.mrf.mxu1 }
 0x226   :  { %v757_v16 = vadd.f32 %v546_v14, %v285_v15 }
 0x228   :  { %v760_v17 = vmul.f32 0.70710677, %v757_v16 }
 0x22a   :  { %v309_v18 = vand.u32 2147483647, %v760_v17  ;;  %v290_v19 = vpop.f32.mrf.mxu3 }
 0x22b   :  { %v763_v20 = vadd.f32 %v546_v14, %v290_v19 }
 0x22c   :  { %v314_v2 = vmul.f32 0.3275911, %v309_v18  ;;  %v444_v44 = vsub.f32 0.0, %v309_v18 }
 0x22d   :  { %v766_v21 = vmul.f32 0.70710677, %v763_v20  ;;  %v287_v22 = vpop.f32.mrf.mxu1 }
 0x22e   :  { %v319_v23 = vadd.f32 1.0, %v314_v2  ;;  %v768_v24 = vadd.f32 %v546_v14, %v287_v22  ;;  %v449_v0 = vmul.f32 %v444_v44, %v309_v18 }
 0x22f   :  { %v311_v25 = vand.u32 2147483647, %v766_v21 }
 0x230   :  { %559 = vrcp.f32 %v319_v23  ;;  %v772_v27 = vmul.f32 0.70710677, %v768_v24  ;;  %v333_v38 = vand.u32 2147483647, %v319_v23  ;;  %v335_v39 = vand.u32 2147483648, %v319_v23 }
 0x231   :  { %v316_v26 = vmul.f32 0.3275911, %v311_v25  ;;  %vm329_vm3 = vweird.f32 %v319_v23  ;;  %v446_v48 = vsub.f32 0.0, %v311_v25  ;;  %v454_v13 = vmul.f32 1.442695, %v449_v0 }
 0x232   :  { %v292_v28 = vpop.f32.mrf.mxu3  ;;  %v775_v30 = vand.u32 2147483647, %v772_v27  ;;  %vm334_vm5 = vcmp.eq.f32.partialorder %v333_v38, 8.507059e+37  ;;  %v336_v50 = vor.u32 1.1754944e-38, %v335_v39 }
 0x233   :  { %v321_v29 = vadd.f32 1.0, %v316_v26  ;;  %v777_v31 = vadd.f32 %v546_v14, %v292_v28  ;;  %v451_v3 = vmul.f32 %v446_v48, %v311_v25 }
 0x234   :  { %v315_v33 = vmul.f32 0.3275911, %v775_v30 }
 0x235   :  { %561 = vrcp.f32 %v321_v29  ;;  %v783_v36 = vmul.f32 0.70710677, %v777_v31  ;;  %v363_v56 = vand.u32 2147483647, %v321_v29  ;;  %v365_v57 = vand.u32 2147483648, %v321_v29 }
 0x236   :  { %v560_v32 = vpop.eup %559  ;;  %v780_v35 = vadd.f32 1.0, %v315_v33  ;;  %vm359_vm7 = vweird.f32 %v321_v29  ;;  %v458_v2 = vmul.f32 1.442695, %v451_v3  ;;  %v445_v33 = vsub.f32 0.0, %v775_v30 }
 0x237   :  { %v325_v34 = vmul.f32 %v560_v32, %v319_v23  ;;  %vm330_vm0 = vweird.f32 %v560_v32  ;;  %v787_v43 = vand.u32 2147483647, %v783_v36  ;;  %vm364_vm9 = vcmp.eq.f32.partialorder %v363_v56, 8.507059e+37 }
 0x238   :  { %563 = vrcp.f32 %v780_v35  ;;  %vm331_vm4 = vmor %vm329_vm3, %vm330_vm0  ;;  %v366_v6 = vor.u32 1.1754944e-38, %v365_v57  ;;  %v348_v8 = vand.u32 2147483647, %v780_v35  ;;  %v350_v9 = vand.u32 2147483648, %v780_v35 }
 0x239   :  { %v326_v37 = vsub.f32 1.0, %v325_v34  ;;  %v317_v49 = vmul.f32 0.3275911, %v787_v43  ;;  %vm344_vm11 = vweird.f32 %v780_v35  ;;  %v450_v48 = vmul.f32 %v445_v33, %v775_v30 }
 0x23a   :  { %v295_v40 = vpop.f32.mrf.mxu3  ;;  %v351_v25 = vor.u32 1.1754944e-38, %v350_v9  ;;  %vm349_vm13 = vcmp.eq.f32.partialorder %v348_v8, 8.507059e+37  ;;  %vm474_vm0 = vcmp.ge.f32.partialorder %v760_v17, 0.0 }
 0x23b   :  { %v562_v41 = vpop.eup %561  ;;  %v327_v42 = vmul.f32 %v560_v32, %v326_v37  ;;  %v790_v53 = vadd.f32 %v546_v14, %v295_v40  ;;  %v792_v58 = vadd.f32 1.0, %v317_v49 }
 0x23c   :  { %v355_v45 = vmul.f32 %v562_v41, %v321_v29  ;;  %vm360_vm6 = vweird.f32 %v562_v41 }
 0x23d   :  { %v328_v47 = vadd.f32 %v560_v32, %v327_v42  ;;  %v797_v46 = vmul.f32 0.70710677, %v790_v53  ;;  %565 = vrcp.f32 %v792_v58  ;;  %vm361_vm8 = vmor %vm359_vm7, %vm360_vm6  ;;  %v380_v40 = vand.u32 2147483648, %v792_v58 }
 0x23e   :  { %v356_v51 = vsub.f32 1.0, %v355_v45  ;;  %v564_v52 = vpop.eup %563  ;;  %v378_v44 = vand.u32 2147483647, %v792_v58  ;;  %vm374_vm15 = vweird.f32 %v792_v58  ;;  %vm476_vm7 = vcmp.ge.f32.partialorder %v766_v21, 0.0 }
 0x23f   :  { %v332_v54 = vsel %vm331_vm4, %v560_v32, %v328_v47  ;;  %v340_v63 = vmul.f32 %v564_v52, %v780_v35  ;;  %v805_v55 = vand.u32 2147483647, %v797_v46  ;;  %vm345_vm10 = vweird.f32 %v564_v52 }
 0x240   :  { %v794_v60 = vsel %vm334_vm5, %v336_v50, %v332_v54  ;;  %v357_v61 = vmul.f32 %v562_v41, %v356_v51  ;;  %vm346_vm12 = vmor %vm344_vm11, %vm345_vm10  ;;  %v447_v51 = vsub.f32 0.0, %v787_v43  ;;  %v299_v54 = vmul.f32 0.5, %v757_v16 }
 0x241   :  { %v399_v62 = vmul.f32 1.0614054, %v794_v60  ;;  %v341_v7 = vsub.f32 1.0, %v340_v63  ;;  %v318_v15 = vmul.f32 0.3275911, %v805_v55  ;;  %vm379_vm2 = vcmp.eq.f32.partialorder %v378_v44, 8.507059e+37 }
 0x242   :  { %v358_v1 = vadd.f32 %v562_v41, %v357_v61  ;;  %v297_v4 = vpop.f32.mrf.mxu3  ;;  %v448_v33 = vsub.f32 0.0, %v805_v55  ;;  %vm478_vm10 = vcmp.ge.f32.partialorder %v797_v46, 0.0 }
 0x243   :  { %v404_v5 = vadd.f32 -1.4531521, %v399_v62  ;;  %v342_v12 = vmul.f32 %v564_v52, %v341_v7  ;;  %v566_v18 = vpop.eup %565  ;;  %v814_v28 = vadd.f32 1.0, %v318_v15  ;;  %v456_v4 = vmul.f32 1.442695, %v450_v48 }
 0x244   :  { %v362_v59 = vsel %vm361_vm8, %v562_v41, %v358_v1  ;;  %v370_v26 = vmul.f32 %v566_v18, %v792_v58  ;;  %vm375_vm14 = vweird.f32 %v566_v18  ;;  %vm475_vm8 = vcmp.ge.f32.partialorder %v772_v27, 0.0 }
 0x245   :  { %v409_v10 = vmul.f32 %v404_v5, %v794_v60  ;;  %v808_v11 = vsel %vm364_vm9, %v366_v6, %v362_v59  ;;  %v343_v22 = vadd.f32 %v564_v52, %v342_v12  ;;  %567 = vrcp.f32 %v814_v28  ;;  %vm376_vm1 = vmor %vm374_vm15, %vm375_vm14 }
 0x246   :  { %v401_v14 = vmul.f32 1.0614054, %v808_v11  ;;  %v371_v38 = vsub.f32 1.0, %v370_v26  ;;  %569 = vpow2.f32 %v454_v13  ;;  %v452_v6 = vmul.f32 %v447_v51, %v787_v43 }
 0x247   :  { %v414_v19 = vadd.f32 1.4214138, %v409_v10  ;;  %v347_v32 = vsel %vm346_vm12, %v564_v52, %v343_v22  ;;  %v381_v52 = vor.u32 1.1754944e-38, %v380_v40  ;;  %571 = vpow2.f32 %v458_v2 }
 0x248   :  { %v406_v23 = vadd.f32 -1.4531521, %v401_v14  ;;  %v819_v37 = vsel %vm349_vm13, %v351_v25, %v347_v32  ;;  %v372_v42 = vmul.f32 %v566_v18, %v371_v38  ;;  %v393_v9 = vand.u32 2147483647, %v814_v28 }
 0x249   :  { %v419_v29 = vmul.f32 %v414_v19, %v794_v60  ;;  %v400_v39 = vmul.f32 1.0614054, %v819_v37  ;;  %v395_v12 = vand.u32 2147483648, %v814_v28  ;;  %573 = vpow2.f32 %v456_v4 }
 0x24a   :  { %v411_v34 = vmul.f32 %v406_v23, %v808_v11  ;;  %v373_v50 = vadd.f32 %v566_v18, %v372_v42  ;;  %v460_v2 = vmul.f32 1.442695, %v452_v6  ;;  %vm389_vm4 = vweird.f32 %v814_v28 }
 0x24b   :  { %v424_v35 = vadd.f32 -0.28449672, %v419_v29  ;;  %v405_v47 = vadd.f32 -1.4531521, %v400_v39  ;;  %v568_v61 = vpop.eup %567  ;;  %v396_v32 = vor.u32 1.1754944e-38, %v395_v12  ;;  %vm394_vm6 = vcmp.eq.f32.partialorder %v393_v9, 8.507059e+37 }
 0x24c   :  { %v416_v41 = vadd.f32 1.4214138, %v411_v34  ;;  %v377_v63 = vsel %vm376_vm1, %v566_v18, %v373_v50  ;;  %v570_v30 = vpop.eup %569  ;;  %v385_v58 = vmul.f32 %v568_v61, %v814_v28  ;;  %vm390_vm3 = vweird.f32 %v568_v61 }
 0x24d   :  { %v429_v45 = vmul.f32 %v424_v35, %v794_v60  ;;  %v410_v57 = vmul.f32 %v405_v47, %v819_v37  ;;  %v833_v3 = vsel %vm379_vm2, %v381_v52, %v377_v63  ;;  %v572_v18 = vpop.eup %571  ;;  %vm391_vm5 = vmor %vm389_vm4, %vm390_vm3  ;;  %575 = vpow2.f32 %v460_v2 }
 0x24e   :  { %v421_v49 = vmul.f32 %v416_v41, %v808_v11  ;;  %v402_v5 = vmul.f32 1.0614054, %v833_v3  ;;  %v386_v8 = vsub.f32 1.0, %v385_v58  ;;  %vm477_vm9 = vcmp.ge.f32.partialorder %v783_v36, 0.0 }
 0x24f   :  { %v434_v56 = vadd.f32 0.2548296, %v429_v45  ;;  %v415_v1 = vadd.f32 1.4214138, %v410_v57  ;;  %v574_v44 = vpop.eup %573  ;;  %v302_v9 = vmul.f32 0.5, %v777_v31  ;;  %v303_v36 = vmul.f32 0.5, %v790_v53 }
 0x250   :  { %v426_v62 = vadd.f32 -0.28449672, %v421_v49  ;;  %v407_v10 = vadd.f32 -1.4531521, %v402_v5  ;;  %v387_v15 = vmul.f32 %v568_v61, %v386_v8 }
 0x251   :  { %v439_v0 = vmul.f32 %v434_v56, %v794_v60  ;;  %v420_v59 = vmul.f32 %v415_v1, %v819_v37  ;;  %v453_v56 = vmul.f32 %v448_v33, %v805_v55 }
 0x252   :  { %v431_v16 = vmul.f32 %v426_v62, %v808_v11  ;;  %v412_v43 = vmul.f32 %v407_v10, %v833_v3  ;;  %v388_v25 = vadd.f32 %v568_v61, %v387_v15 }
 0x253   :  { %v464_v7 = vmul.f32 %v570_v30, %v439_v0  ;;  %v425_v14 = vadd.f32 -0.28449672, %v420_v59  ;;  %v462_v0 = vmul.f32 1.442695, %v453_v56  ;;  %v576_v1 = vpop.eup %575 }
 0x254   :  { %v436_v60 = vadd.f32 0.2548296, %v431_v16  ;;  %v417_v29 = vadd.f32 1.4214138, %v412_v43  ;;  %v392_v38 = vsel %vm391_vm5, %v568_v61, %v388_v25 }
 0x255   :  { %v469_v13 = vsub.f32 1.0, %v464_v7  ;;  %v430_v23 = vmul.f32 %v425_v14, %v819_v37  ;;  %v397_v41 = vsel %vm394_vm6, %v396_v32, %v392_v38  ;;  %577 = vpow2.f32 %v462_v0 }
 0x256   :  { %v441_v19 = vmul.f32 %v436_v60, %v808_v11  ;;  %v422_v40 = vmul.f32 %v417_v29, %v833_v3  ;;  %v403_v28 = vmul.f32 1.0614054, %v397_v41 }
 0x257   :  { %v479_v22 = vsub.f32 0.0, %v469_v13  ;;  %v435_v11 = vadd.f32 0.2548296, %v430_v23 }
 0x258   :  { %v466_v26 = vmul.f32 %v572_v18, %v441_v19  ;;  %v427_v48 = vadd.f32 -0.28449672, %v422_v40  ;;  %v408_v17 = vadd.f32 -1.4531521, %v403_v28 }
 0x259   :  { %v484_v34 = vsel %vm474_vm0, %v469_v13, %v479_v22  ;;  %v440_v42 = vmul.f32 %v435_v11, %v819_v37  ;;  %v301_v37 = vmul.f32 0.5, %v763_v20  ;;  %v300_v20 = vmul.f32 0.5, %v768_v24 }
 0x25a   :  { %v489_v35 = vadd.f32 1.0, %v484_v34  ;;  %v471_v39 = vsub.f32 1.0, %v466_v26  ;;  %v432_v51 = vmul.f32 %v427_v48, %v833_v3  ;;  %v413_v52 = vmul.f32 %v408_v17, %v397_v41 }
 0x25b   :  { %v465_v49 = vmul.f32 %v574_v44, %v440_v42  ;;  %v578_v10 = vpop.eup %577 }
 0x25c   :  { %v494_v45 = vmul.f32 %v489_v35, %v299_v54  ;;  %v481_v47 = vsub.f32 0.0, %v471_v39  ;;  %v437_v61 = vadd.f32 0.2548296, %v432_v51  ;;  %v418_v63 = vadd.f32 1.4214138, %v413_v52 }
 0x25d   :  { %v470_v54 = vsub.f32 1.0, %v465_v49 }
 0x25e   :  { %499 = vst [vmem:[%s887_s9] sm:$0xff] %v494_v45  ;;  %v486_v50 = vsel %vm476_vm7, %v471_v39, %v481_v47  ;;  %v442_v30 = vmul.f32 %v437_v61, %v833_v3  ;;  %v423_v58 = vmul.f32 %v418_v63, %v397_v41 }
 0x25f   :  { %v491_v57 = vadd.f32 1.0, %v486_v50  ;;  %v480_v21 = vsub.f32 0.0, %v470_v54 }
 0x260   :  { %v467_v4 = vmul.f32 %v576_v1, %v442_v30  ;;  %v428_v5 = vadd.f32 -0.28449672, %v423_v58 }
 0x261   :  { %v496_v62 = vmul.f32 %v491_v57, %v301_v37  ;;  %v485_v55 = vsel %vm475_vm8, %v470_v54, %v480_v21 }
 0x262   :  { %v490_v16 = vadd.f32 1.0, %v485_v55  ;;  %v472_v7 = vsub.f32 1.0, %v467_v4  ;;  %v433_v59 = vmul.f32 %v428_v5, %v397_v41 }
 0x263   :  { %501 = vst [vmem:[%s887_s9 + $0x10] sm:$0xff] %v496_v62 }
 0x264   :  { %v495_v6 = vmul.f32 %v490_v16, %v300_v20  ;;  %v482_v27 = vsub.f32 0.0, %v472_v7  ;;  %v438_v3 = vadd.f32 0.2548296, %v433_v59 }
 0x266   :  { %500 = vst [vmem:[%s887_s9 + $0x8] sm:$0xff] %v495_v6  ;;  %v487_v8 = vsel %vm477_vm9, %v472_v7, %v482_v27  ;;  %v443_v24 = vmul.f32 %v438_v3, %v397_v41 }
 0x267   :  { %v492_v60 = vadd.f32 1.0, %v487_v8 }
 0x268   :  { %v468_v13 = vmul.f32 %v578_v10, %v443_v24 }
 0x269   :  { %v497_v12 = vmul.f32 %v492_v60, %v302_v9 }
 0x26a   :  { %v473_v14 = vsub.f32 1.0, %v468_v13 }
 0x26b   :  { %502 = vst [vmem:[%s887_s9 + $0x18] sm:$0xff] %v497_v12 }
 0x26c   :  { %v483_v15 = vsub.f32 0.0, %v473_v14 }
 0x26e   :  { %v488_v18 = vsel %vm478_vm10, %v473_v14, %v483_v15 }
 0x26f   :  { %v493_v19 = vadd.f32 1.0, %v488_v18 }
 0x271   :  { %v498_v43 = vmul.f32 %v493_v19, %v303_v36 }
 0x273   :  { %503 = vst [vmem:[%s887_s9 + $0x20] sm:$0x3] %v498_v43 }

// kernel: masked_decoder_forward.15
= control target key start
LH: loop header
LB: loop body
LE: loop exit
PB: predicated region body
PF: predicated region fallthrough
CT: control target
= control target key end

     0   :  { %s675_s0 = inlined_call_operand.vmem [shape: f32[34,128], index: 0, kind: input, shape index: {}]   ;;  %s676_s1 = inlined_call_operand.vmem [shape: bf16[128,32], index: 1, kind: input, shape index: {}]   ;;  %s677_s2 = inlined_call_operand.vmem [shape: f32[1,32], index: 2, kind: input, shape index: {}]   ;;  %s678_s3 = inlined_call_operand.vmem [shape: f32[34,32], index: 3, kind: input, shape index: {}]   ;;  %s679_s4 = inlined_call_operand.vmem [shape: f32[1,32], index: 4, kind: input, shape index: {}]   ;;  %s680_s5 = inlined_call_operand.vmem [shape: f32[1,32], index: 5, kind: input, shape index: {}]   ;;  %s681_s6 = inlined_call_operand.vmem [shape: bf16[32,48], index: 6, kind: input, shape index: {}]   ;;  %s682_s7 = inlined_call_operand.vmem [shape: f32[1,48], index: 7, kind: input, shape index: {}]   ;;  %s683_s8 = inlined_call_operand.hbm [shape: f32[34,32], index: 8, kind: output, shape index: {0}]   ;;  %s684_s9 = inlined_call_operand.vmem [shape: f32[34,48], index: 9, kind: output, shape index: {1}]  }
   0x1   :  { %v418_v0 = vld [vmem:[%s676_s1 + $0x38] sm:$0xff]  ;;  %v417_v1 = vld [vmem:[%s676_s1 + $0x30] sm:$0xff]  ;;  %v416_v2 = vld [vmem:[%s676_s1 + $0x28] sm:$0xff] }
   0x2   :  { %109 = vmatpush.bf16.msra.mxu0 %v418_v0  ;;  %421 = vmatpush.bf16.msra.mxu2 %v418_v0 }
   0x3   :  { %422 = vmatpush.bf16.msra.mxu3 %v418_v0 }
   0x6   :  { %110 = vmatpush.bf16.msra.mxu0 %v417_v1  ;;  %423 = vmatpush.bf16.msra.mxu2 %v417_v1 }
   0x7   :  { %15 = vsyncpa [#allocation3], 0  ;;  %424 = vmatpush.bf16.msra.mxu3 %v417_v1  ;;  %v415_v3 = vld [vmem:[%s676_s1 + $0x20] sm:$0xff]  ;;  %v414_v4 = vld [vmem:[%s676_s1 + $0x18] sm:$0xff]  ;;  %vm142_vm0 = vcmask 261120   ;;  %vm147_vm1 = vcmask 254976  }
   0x8   :  { %v413_v5 = vld [vmem:[%s676_s1 + $0x10] sm:$0xff]  ;;  %v412_v6 = vld [vmem:[%s676_s1 + $0x8] sm:$0xff]  ;;  %v411_v7 = vld [vmem:[%s676_s1] sm:$0xff]  ;;  %v483_v43 = vmov 32.0   ;;  %s352_s10 = sshll.u32 %s683_s8, 4  ;;  %s485_s11 = smov 128   ;;  %s353_s10 = int_to_ptr.hbm [resolvable:$true] %s352_s10 }
   0x9   :  { %v33_v8 = vld [vmem:[%s675_s0] sm:$0xff]  ;;  %v34_v9 = vld [vmem:[%s675_s0 + $0x8] sm:$0xff]  ;;  %v35_v10 = vld [vmem:[%s675_s0 + $0x10] sm:$0xff]  ;;  %445 = vrcp.f32 %v483_v43  ;;  %s486_s1 = smov 8  }
   0xa   :  { %111 = vmatpush.bf16.msra.mxu0 %v416_v2  ;;  %425 = vmatpush.bf16.msra.mxu2 %v416_v2  ;;  %v36_v11 = vld [vmem:[%s675_s0 + $0x18] sm:$0xff]  ;;  %v37_v12 = vld [vmem:[%s675_s0 + $0x20] sm:$0x3]  ;;  %v38_v13 = vpack.c.bf16 %v34_v9, %v33_v8  ;;  %v134_v23 = vld [vmem:[%s678_s3 + $0x10] sm:$0xff] }
   0xb   :  { %426 = vmatpush.bf16.msra.mxu3 %v416_v2  ;;  %v39_v14 = vpack.c.bf16 %v36_v11, %v35_v10  ;;  %v40_v15 = vpack.c.bf16 %v37_v12, %v37_v12  ;;  %v441_v16 = vld [vmem:[%s677_s2] ss:$0 sm:$0xff]  ;;  %v133_v29 = vld [vmem:[%s678_s3 + $0x8] sm:$0xff]  ;;  %v135_v38 = vld [vmem:[%s678_s3 + $0x18] sm:$0xff] }
   0xc   :  { %v132_v18 = vld [vmem:[%s678_s3] sm:$0xff]  ;;  %v420_v11 = vld [vmem:[%s681_s6 + $0x8] sm:$0xff] }
   0xd   :  { %v136_v26 = vld [vmem:[%s678_s3 + $0x20] sm:$0x3]  ;;  %322 = vmatpush.bf16.msra.mxu1 %v420_v11 }
   0xe   :  { %112 = vmatpush.bf16.msra.mxu0 %v415_v3  ;;  %427 = vmatpush.bf16.msra.mxu2 %v415_v3 }
   0xf   :  { %428 = vmatpush.bf16.msra.mxu3 %v415_v3  ;;  %v446_v44 = vpop.eup %445 }
  0x10   :  { %v167_v45 = vmul.f32 32.0, %v446_v44  ;;  %vm171_vm2 = vweird.f32 %v446_v44 }
  0x12   :  { %113 = vmatpush.bf16.msra.mxu0 %v414_v4  ;;  %429 = vmatpush.bf16.msra.mxu2 %v414_v4  ;;  %v168_v46 = vsub.f32 1.0, %v167_v45 }
  0x13   :  { %430 = vmatpush.bf16.msra.mxu3 %v414_v4 }
  0x14   :  { %v169_v47 = vmul.f32 %v446_v44, %v168_v46  ;;  %v442_v46 = vld [vmem:[%s679_s4] ss:$0 sm:$0xff]  ;;  %s484_s4 = smov [#allocation2]  }
  0x16   :  { %114 = vmatpush.bf16.msra.mxu0 %v413_v5  ;;  %431 = vmatpush.bf16.msra.mxu2 %v413_v5  ;;  %v170_v48 = vadd.f32 %v446_v44, %v169_v47 }
  0x17   :  { %432 = vmatpush.bf16.msra.mxu3 %v413_v5 }
  0x18   :  { %v172_v49 = vsel %vm171_vm2, %v446_v44, %v170_v48 }
  0x1a   :  { %115 = vmatpush.bf16.msra.mxu0 %v412_v6  ;;  %433 = vmatpush.bf16.msra.mxu2 %v412_v6 }
  0x1b   :  { %434 = vmatpush.bf16.msra.mxu3 %v412_v6 }
  0x1e   :  { %116 = vmatpush.bf16.msra.mxu0 %v411_v7  ;;  %435 = vmatpush.bf16.msra.mxu2 %v411_v7 }
  0x1f   :  { %436 = vmatpush.bf16.msra.mxu3 %v411_v7 }
  0x21   :  { %117 = vmatmul.bf16.vlgmr.msra.gmra.mxu0 %v38_v13  ;;  %122 = vmatmul.bf16.vlgmr.msra.gmra.mxu2 %v39_v14 }
  0x22   :  { %127 = vmatmul.bf16.vlgmr.msra.gmra.mxu3 %v40_v15  ;;  %v419_v15 = vld [vmem:[%s681_s6] sm:$0xff] }
  0x23   :  { %323 = vmatpush.bf16.msra.mxu1 %v419_v15 }
  0x9e   :  { %v118_v17 = vpop.f32.mrf.mxu0 }
  0x9f   :  { %v119_v19 = vadd.f32 %v441_v16, %v118_v17 }
  0xa1   :  { %v137_v20 = vadd.f32 %v132_v18, %v119_v19 }
  0xa3   :  { %143 = vst.msk [vmem:[#allocation2] sm:$0xff] %vm142_vm0, %v137_v20  ;;  %v151_v21 = vsel %vm142_vm0, %v137_v20, 0.0 }
  0xa4   :  { %v123_v22 = vpop.f32.mrf.mxu2  ;;  %152 = vadd.xlane.f32.xlu0 %v151_v21 }
  0xa5   :  { %v124_v24 = vadd.f32 %v441_v16, %v123_v22  ;;  %v128_v25 = vpop.f32.mrf.mxu3 }
  0xa6   :  { %v129_v27 = vadd.f32 %v441_v16, %v128_v25  ;;  %v120_v28 = vpop.f32.mrf.mxu0 }
  0xa7   :  { %v139_v30 = vadd.f32 %v134_v23, %v124_v24  ;;  %v121_v31 = vadd.f32 %v441_v16, %v120_v28 }
  0xa8   :  { %v141_v32 = vadd.f32 %v136_v26, %v129_v27 }
  0xa9   :  { %145 = vst.msk [vmem:[#allocation2 + $0x10] sm:$0xff] %vm142_vm0, %v139_v30  ;;  %v138_v33 = vadd.f32 %v133_v29, %v121_v31  ;;  %v157_v34 = vsel %vm142_vm0, %v139_v30, 0.0 }
  0xaa   :  { %v163_v35 = vsel %vm147_vm1, %v141_v32, 0.0  ;;  %148 = vst.msk [vmem:[#allocation2 + $0x20] sm:$0x3] %vm147_vm1, %v141_v32  ;;  %158 = vadd.xlane.f32.xlu1 %v157_v34 }
  0xab   :  { %144 = vst.msk [vmem:[#allocation2 + $0x8] sm:$0xff] %vm142_vm0, %v138_v33  ;;  %164 = vadd.xlane.f32.xlu2 %v163_v35  ;;  %v154_v36 = vsel %vm142_vm0, %v138_v33, 0.0 }
  0xac   :  { %v125_v37 = vpop.f32.mrf.mxu2  ;;  %155 = vadd.xlane.f32.xlu0 %v154_v36 }
  0xad   :  { %v126_v39 = vadd.f32 %v441_v16, %v125_v37  ;;  %v130_v40 = vpop.f32.mrf.mxu3 }
  0xaf   :  { %v140_v41 = vadd.f32 %v135_v38, %v126_v39 }
  0xb1   :  { %146 = vst.msk [vmem:[#allocation2 + $0x18] sm:$0xff] %vm142_vm0, %v140_v41  ;;  %v160_v42 = vsel %vm142_vm0, %v140_v41, 0.0 }
  0xb2   :  { %161 = vadd.xlane.f32.xlu1 %v160_v42 }
 0x117   :  { %v153_v50 = vpop.xlane.xlu0 %152 }
 0x118   :  { %v173_v51 = vmul.f32 %v172_v49, %v153_v50 }
 0x11a   :  { %v604_v52 = vsub.f32 %v137_v20, %v173_v51 }
 0x11c   :  { %v183_v53 = vmul.f32 %v604_v52, %v604_v52 }
 0x11d   :  { %v159_v54 = vpop.xlane.xlu1 %158 }
 0x11e   :  { %v175_v55 = vmul.f32 %v172_v49, %v159_v54  ;;  %v188_v56 = vsel %vm142_vm0, %v183_v53, 0.0  ;;  %v165_v57 = vpop.xlane.xlu2 %164 }
 0x11f   :  { %189 = vadd.xlane.f32.xlu2 %v188_v56  ;;  %v156_v58 = vpop.xlane.xlu0 %155  ;;  %v177_v61 = vmul.f32 %v172_v49, %v165_v57  ;;  %v443_v56 = vld [vmem:[%s680_s5] ss:$0 sm:$0xff]  ;;  %s350_s5 = sshll.u32 %s484_s4, 4  ;;  %s351_s5 = int_to_ptr.vmem [resolvable:$true] %s350_s5 }
 0x120   :  { %v609_v59 = vsub.f32 %v139_v30, %v175_v55  ;;  %v174_v60 = vmul.f32 %v172_v49, %v156_v58  ;;  %358 = dma.vmem_to_hbm [thread:$0]  %s351_s5, 640, %s353_s10, [#allocation3], %s485_s11, %s485_s11, %s486_s1  }
 0x121   :  { %v618_v3 = vsub.f32 %v141_v32, %v177_v61 }
 0x122   :  { %v611_v62 = vsub.f32 %v138_v33, %v174_v60  ;;  %v185_v63 = vmul.f32 %v609_v59, %v609_v59 }
 0x123   :  { %v187_v8 = vmul.f32 %v618_v3, %v618_v3 }
 0x124   :  { %v194_v0 = vsel %vm142_vm0, %v185_v63, 0.0  ;;  %v184_v1 = vmul.f32 %v611_v62, %v611_v62 }
 0x125   :  { %195 = vadd.xlane.f32.xlu1 %v194_v0  ;;  %v162_v2 = vpop.xlane.xlu1 %161  ;;  %v200_v10 = vsel %vm147_vm1, %v187_v8, 0.0 }
 0x126   :  { %v176_v4 = vmul.f32 %v172_v49, %v162_v2  ;;  %v191_v5 = vsel %vm142_vm0, %v184_v1, 0.0 }
 0x127   :  { %192 = vadd.xlane.f32.xlu0 %v191_v5 }
 0x128   :  { %v621_v6 = vsub.f32 %v140_v41, %v176_v4 }
 0x12a   :  { %v186_v7 = vmul.f32 %v621_v6, %v621_v6 }
 0x12c   :  { %v197_v9 = vsel %vm142_vm0, %v186_v7, 0.0 }
 0x12d   :  { %198 = vadd.xlane.f32.xlu2 %v197_v9 }
 0x12f   :  { %201 = vadd.xlane.f32.xlu0 %v200_v10 }
 0x192   :  { %v190_v12 = vpop.xlane.xlu2 %189 }
 0x193   :  { %v203_v13 = vmul.f32 %v190_v12, %v172_v49 }
 0x195   :  { %v208_v14 = vadd.f32 1e-05, %v203_v13 }
 0x197   :  { %447 = vrsqrt.f32 %v208_v14  ;;  %vm219_vm4 = vweird.f32 %v208_v14 }
 0x198   :  { %v196_v16 = vpop.xlane.xlu1 %195 }
 0x199   :  { %v205_v17 = vmul.f32 %v196_v16, %v172_v49 }
 0x19a   :  { %v193_v18 = vpop.xlane.xlu0 %192 }
 0x19b   :  { %v635_v19 = vadd.f32 1e-05, %v205_v17  ;;  %v204_v20 = vmul.f32 %v193_v18, %v172_v49 }
 0x19d   :  { %v448_v21 = vpop.eup %447  ;;  %449 = vrsqrt.f32 %v635_v19  ;;  %v209_v22 = vadd.f32 1e-05, %v204_v20  ;;  %vm239_vm13 = vweird.f32 %v635_v19 }
 0x19e   :  { %v214_v23 = vmul.f32 %v448_v21, %v208_v14  ;;  %vm220_vm3 = vweird.f32 %v448_v21 }
 0x19f   :  { %451 = vrsqrt.f32 %v209_v22  ;;  %vm221_vm5 = vmor %vm219_vm4, %vm220_vm3  ;;  %vm229_vm7 = vweird.f32 %v209_v22  ;;  %vm339_vm3 = vcmask 392192  }
 0x1a0   :  { %v215_v24 = vmul.f32 %v448_v21, %v214_v23  ;;  %v199_v25 = vpop.xlane.xlu2 %198 }
 0x1a1   :  { %v206_v26 = vmul.f32 %v199_v25, %v172_v49 }
 0x1a2   :  { %v216_v27 = vmul.f32 0.5, %v215_v24  ;;  %v202_v28 = vpop.xlane.xlu0 %201 }
 0x1a3   :  { %v450_v29 = vpop.eup %449  ;;  %v211_v30 = vadd.f32 1e-05, %v206_v26  ;;  %v207_v31 = vmul.f32 %v202_v28, %v172_v49 }
 0x1a4   :  { %v217_v32 = vsub.f32 1.5, %v216_v27  ;;  %v234_v35 = vmul.f32 %v450_v29, %v635_v19  ;;  %vm240_vm10 = vweird.f32 %v450_v29 }
 0x1a5   :  { %v452_v33 = vpop.eup %451  ;;  %453 = vrsqrt.f32 %v211_v30  ;;  %v212_v37 = vadd.f32 1e-05, %v207_v31  ;;  %vm249_vm11 = vweird.f32 %v211_v30  ;;  %vm241_vm14 = vmor %vm239_vm13, %vm240_vm10 }
 0x1a6   :  { %v218_v34 = vmul.f32 %v448_v21, %v217_v32  ;;  %v224_v36 = vmul.f32 %v452_v33, %v209_v22  ;;  %v235_v40 = vmul.f32 %v450_v29, %v234_v35  ;;  %vm230_vm6 = vweird.f32 %v452_v33 }
 0x1a7   :  { %455 = vrsqrt.f32 %v212_v37  ;;  %vm231_vm8 = vmor %vm229_vm7, %vm230_vm6  ;;  %vm259_vm1 = vweird.f32 %v212_v37 }
 0x1a8   :  { %v225_v38 = vmul.f32 %v452_v33, %v224_v36  ;;  %v222_v39 = vsel %vm221_vm5, %v448_v21, %v218_v34  ;;  %v236_v47 = vmul.f32 0.5, %v235_v40 }
 0x1a9   :  { %v263_v45 = vmul.f32 %v222_v39, %v604_v52 }
 0x1aa   :  { %v226_v41 = vmul.f32 0.5, %v225_v38  ;;  %v237_v52 = vsub.f32 1.5, %v236_v47 }
 0x1ab   :  { %v454_v42 = vpop.eup %453  ;;  %v271_v55 = vmul.f32 %v442_v46, %v263_v45 }
 0x1ac   :  { %v227_v43 = vsub.f32 1.5, %v226_v41  ;;  %v244_v44 = vmul.f32 %v454_v42, %v211_v30  ;;  %vm250_vm9 = vweird.f32 %v454_v42  ;;  %v238_v1 = vmul.f32 %v450_v29, %v237_v52 }
 0x1ad   :  { %v456_v53 = vpop.eup %455  ;;  %v279_v63 = vadd.f32 %v443_v56, %v271_v55  ;;  %vm251_vm12 = vmor %vm249_vm11, %vm250_vm9 }
 0x1ae   :  { %v228_v48 = vmul.f32 %v452_v33, %v227_v43  ;;  %v245_v49 = vmul.f32 %v454_v42, %v244_v44  ;;  %v254_v61 = vmul.f32 %v456_v53, %v212_v37  ;;  %v242_v5 = vsel %vm241_vm14, %v450_v29, %v238_v1 }
 0x1af   :  { %v265_v9 = vmul.f32 %v242_v5, %v609_v59  ;;  %vm260_vm15 = vweird.f32 %v456_v53  ;;  %v444_v59 = vld [vmem:[%s682_s7] ss:$0 sm:$0xff] }
 0x1b0   :  { %v232_v50 = vsel %vm231_vm8, %v452_v33, %v228_v48  ;;  %v246_v51 = vmul.f32 0.5, %v245_v49  ;;  %v255_v4 = vmul.f32 %v456_v53, %v254_v61  ;;  %vm261_vm2 = vmor %vm259_vm1, %vm260_vm15 }
 0x1b1   :  { %v264_v54 = vmul.f32 %v232_v50, %v611_v62  ;;  %v273_v12 = vmul.f32 %v442_v46, %v265_v9 }
 0x1b2   :  { %v247_v57 = vsub.f32 1.5, %v246_v51  ;;  %v256_v8 = vmul.f32 0.5, %v255_v4 }
 0x1b3   :  { %v272_v58 = vmul.f32 %v442_v46, %v264_v54  ;;  %v281_v15 = vadd.f32 %v443_v56, %v273_v12 }
 0x1b4   :  { %v248_v60 = vmul.f32 %v454_v42, %v247_v57  ;;  %v257_v11 = vsub.f32 1.5, %v256_v8 }
 0x1b5   :  { %v280_v0 = vadd.f32 %v443_v56, %v272_v58 }
 0x1b6   :  { %v252_v62 = vsel %vm251_vm12, %v454_v42, %v248_v60  ;;  %v258_v14 = vmul.f32 %v456_v53, %v257_v11 }
 0x1b7   :  { %v284_v2 = vpack.c.bf16 %v280_v0, %v279_v63  ;;  %v266_v7 = vmul.f32 %v252_v62, %v621_v6 }
 0x1b8   :  { %v262_v17 = vsel %vm261_vm2, %v456_v53, %v258_v14 }
 0x1b9   :  { %408 = vmatmul.msk.bf16.vlgmr.msra.gmra.mxu1 %vm142_vm0, %v284_v2  ;;  %v274_v10 = vmul.f32 %v442_v46, %v266_v7  ;;  %v267_v18 = vmul.f32 %v262_v17, %v618_v3 }
 0x1bb   :  { %v282_v13 = vadd.f32 %v443_v56, %v274_v10  ;;  %v275_v19 = vmul.f32 %v442_v46, %v267_v18 }
 0x1bd   :  { %v285_v16 = vpack.c.bf16 %v282_v13, %v281_v15  ;;  %v283_v6 = vadd.f32 %v443_v56, %v275_v19 }
 0x1bf   :  { %v286_v20 = vpack.c.bf16 %v283_v6, %v283_v6 }
 0x1c9   :  { %409 = vmatmul.msk.bf16.gmra.mxu1 %vm142_vm0, %v285_v16 }
 0x1d9   :  { %410 = vmatmul.msk.bf16.gmra.mxu1 %vm142_vm0, %v286_v20  ;;  %vm344_vm0 = vcmask 386048  }
 0x236   :  { %v325_v3 = vpop.f32.mrf.mxu1 }
 0x237   :  { %v326_v21 = vadd.f32 %v444_v59, %v325_v3 }
 0x239   :  { %340 = vst.msk [vmem:[%s684_s9] sm:$0xff] %vm339_vm3, %v326_v21 }
 0x23e   :  { %v327_v22 = vpop.f32.mrf.mxu1 }
 0x23f   :  { %v328_v23 = vadd.f32 %v444_v59, %v327_v22 }
 0x241   :  { %341 = vst.msk [vmem:[%s684_s9 + $0x8] sm:$0xff] %vm339_vm3, %v328_v23 }
 0x246   :  { %v330_v24 = vpop.f32.mrf.mxu1 }
 0x247   :  { %v331_v25 = vadd.f32 %v444_v59, %v330_v24 }
 0x249   :  { %342 = vst.msk [vmem:[%s684_s9 + $0x10] sm:$0xff] %vm339_vm3, %v331_v25 }
 0x24e   :  { %v332_v26 = vpop.f32.mrf.mxu1 }
 0x24f   :  { %v333_v27 = vadd.f32 %v444_v59, %v332_v26 }
 0x251   :  { %343 = vst.msk [vmem:[%s684_s9 + $0x18] sm:$0xff] %vm339_vm3, %v333_v27 }
 0x256   :  { %v335_v28 = vpop.f32.mrf.mxu1 }
 0x257   :  { %v336_v29 = vadd.f32 %v444_v59, %v335_v28 }
 0x259   :  { %345 = vst.msk [vmem:[%s684_s9 + $0x20] sm:$0x3] %vm344_vm0, %v336_v29 }
 0x25e   :  { %v337_v30 = vpop.f32.mrf.mxu1 }
 0x25f   :  { %481 = dma.done.wait [#allocation3], 640  }
 0x260   :  { %482 = vsyncadd [#allocation3], 4294966656 }
 0x261   :  { %367 = vsyncpa [#allocation3], 1 }

// kernel: masked_decoder_forward.10
= control target key start
LH: loop header
LB: loop body
LE: loop exit
PB: predicated region body
PF: predicated region fallthrough
CT: control target
= control target key end

     0   :  { %s1281_s18 = smov 120   ;;  %vm33_vm0 = vcmask 64512   ;;  %vm106_vm1 = vcmask 138240   ;;  %s1282_s19 = smov 112   ;;  %vm113_vm2 = vcmask 131072   ;;  %vm199_vm3 = vcmask 1040384   ;;  %s1770_s0 = inlined_call_operand.vmem [shape: f32[2,17,96], index: 0, kind: input, shape index: {}]   ;;  %s1771_s1 = inlined_call_operand.vmem [shape: f32[2,17,32], index: 1, kind: output, shape index: {}]  }
   0x1   :  { %v11_v0 = vld [vmem:[%s1770_s0 + $0x10] sm:$0x1]  ;;  %v14_v1 = vld [vmem:[%s1770_s0 + $0x28] sm:$0x1]  ;;  %v9_v2 = vld [vmem:[%s1770_s0] sm:$0xff]  ;;  %v1283_v60 = vmov 0  }
   0x2   :  { %v17_v3 = vpack.c.bf16 %v11_v0, %v11_v0  ;;  %v10_v4 = vld [vmem:[%s1770_s0 + $0x8] sm:$0xff]  ;;  %v15_v5 = vpack.c.bf16 %v9_v2, %v9_v2  ;;  %v12_v6 = vld [vmem:[%s1770_s0 + $0x18] sm:$0xff]  ;;  %v13_v7 = vld [vmem:[%s1770_s0 + $0x20] sm:$0xff]  ;;  %v20_v10 = vpack.c.bf16 %v14_v1, %v14_v1  ;;  %v1362_v61 = vsel %vm199_vm3, 65535, %v1283_v60  ;;  %s1284_s22 = smov 96   ;;  %s1285_s25 = smov 104  }
   0x3   :  { %v16_v8 = vpack.c.bf16 %v10_v4, %v10_v4  ;;  %v18_v13 = vpack.c.bf16 %v12_v6, %v12_v6  ;;  %v19_v14 = vpack.c.bf16 %v13_v7, %v13_v7  ;;  %s1286_s28 = smov 72   ;;  %s1287_s6 = smov 80   ;;  %vm265_vm4 = vcmask 57344  }
   0x4   :  { %v26_v9 = vunpack.c.l.b16 %v17_v3  ;;  %v24_v11 = vunpack.c.l.b16 %v15_v5  ;;  %v69_v17 = vunpack.c.l.b16 %v20_v10  ;;  %v272_v5 = vld [vmem:[%s1770_s0 + $0x10] sm:$0x1]  ;;  %s1289_s7 = smov 56   ;;  %s1290_s8 = smov 88   ;;  %vm550_vm5 = vcmask 130112  }
   0x5   :  { %v25_v12 = vunpack.c.l.b16 %v16_v8  ;;  %v67_v18 = vunpack.c.l.b16 %v18_v13  ;;  %v68_v19 = vunpack.c.l.b16 %v19_v14  ;;  %v278_v6 = vpack.c.bf16 %v272_v5, %v272_v5  ;;  %s1291_s9 = smov 64   ;;  %s1293_s23 = smov 8  }
   0x6   :  { %v28_v15 = vpack.c.b16 %v26_v9, %v26_v9  ;;  %v71_v20 = vpack.c.b16 %v69_v17, %v69_v17  ;;  %v275_v9 = vld [vmem:[%s1770_s0 + $0x28] sm:$0x1]  ;;  %s1294_s24 = smov 16   ;;  %s1295_s27 = smov 24   ;;  %vm553_vm6 = vcmask 122944   ;;  %vm838_vm7 = vcmask 195712  }
   0x7   :  { %v1324_v16 = vpack.c.b16 %v25_v12, %v24_v11  ;;  %v1327_v21 = vpack.c.b16 %v68_v19, %v67_v18  ;;  %v287_v7 = vunpack.c.l.b16 %v278_v6  ;;  %v281_v10 = vpack.c.bf16 %v275_v9, %v275_v9 }
   0x8   :  { %31 = vrot.lane.b32.xlu0 %v28_v15, %s1281_s18  ;;  %vm841_vm8 = vcmask 188544   ;;  %vm1126_vm9 = vcmask 261312   ;;  %vm1129_vm10 = vcmask 254144  }
   0x9   :  { %29 = vrot.lane.b32.xlu1 %v1324_v16, %s1281_s18  ;;  %v1376_v8 = vpack.c.b16 %v287_v7, %v287_v7  ;;  %v333_v11 = vunpack.c.l.b16 %v281_v10 }
   0xb   :  { %v1382_v12 = vpack.c.b16 %v333_v11, %v333_v11 }
  0x10   :  { %74 = vrot.lane.b32.xlu0 %v71_v20, %s1281_s18 }
  0x11   :  { %72 = vrot.lane.b32.xlu1 %v1327_v21, %s1281_s18 }
  0x7a   :  { %v32_v22 = vpop.permute.xlu0 %31 }
  0x7b   :  { %v44_v23 = vsel %vm33_vm0, %v32_v22, 0  ;;  %v30_v24 = vpop.permute.xlu1 %29 }
  0x7c   :  { %52 = vmatpush.bf16.xpose.msra.mxu0 %v44_v23  ;;  %v41_v25 = vsel %vm33_vm0, %v30_v24, 0 }
  0x82   :  { %v75_v26 = vpop.permute.xlu0 %74 }
  0x83   :  { %v86_v27 = vsel %vm33_vm0, %v75_v26, 0  ;;  %v73_v28 = vpop.permute.xlu1 %72 }
  0x84   :  { %53 = vmatpush.bf16.xpose.msra.mxu0 %v41_v25  ;;  %94 = vmatpush.bf16.xpose.msra.mxu1 %v86_v27  ;;  %v83_v29 = vsel %vm33_vm0, %v73_v28, 0  ;;  %v560_v25 = vld [vmem:[%s1770_s0 + $0x10] sm:$0x1] }
  0x85   :  { %v566_v26 = vpack.c.bf16 %v560_v25, %v560_v25 }
  0x87   :  { %v575_v27 = vunpack.c.l.b16 %v566_v26 }
  0x89   :  { %v1403_v28 = vpack.c.b16 %v575_v27, %v575_v27 }
  0x8b   :  { %1138 = vmatmul.msk.bf16.vlgmr.msra.gmra.mxu0 %vm33_vm0, %v1324_v16 }
  0x8c   :  { %95 = vmatpush.bf16.xpose.msra.mxu1 %v83_v29  ;;  %v563_v29 = vld [vmem:[%s1770_s0 + $0x28] sm:$0x1] }
  0x93   :  { %1140 = vmatmul.msk.bf16.vlgmr.msra.gmra.mxu1 %vm33_vm0, %v1327_v21 }
  0x9b   :  { %1139 = vmatmul.msk.bf16.gmra.mxu0 %vm33_vm0, %v28_v15 }
  0xa3   :  { %1141 = vmatmul.msk.bf16.gmra.mxu1 %vm33_vm0, %v71_v20 }
 0x108   :  { %v55_v30 = vpop.f32.mrf.mxu0 }
 0x109   :  { %v107_v31 = vsel %vm106_vm1, %v55_v30, -inf }
 0x10a   :  { %108 = vmax.xlane.f32.xlu2 %v107_v31 }
 0x110   :  { %v57_v32 = vpop.f32.mrf.mxu0  ;;  %v97_v33 = vpop.f32.mrf.mxu1 }
 0x111   :  { %v110_v34 = vsel %vm106_vm1, %v57_v32, -inf  ;;  %v117_v35 = vsel %vm106_vm1, %v97_v33, -inf }
 0x112   :  { %111 = vmax.xlane.f32.xlu2 %v110_v34  ;;  %118 = vmax.xlane.f32.xlu0 %v117_v35  ;;  %v848_v35 = vld [vmem:[%s1770_s0 + $0x10] sm:$0x1] }
 0x118   :  { %v99_v36 = vpop.f32.mrf.mxu1  ;;  %v1343_v37 = vpop.f32.mrf.mxu0 }
 0x119   :  { %v120_v38 = vsel %vm106_vm1, %v99_v36, -inf  ;;  %v114_v42 = vsel %vm113_vm2, %v1343_v37, -inf }
 0x11a   :  { %121 = vmax.xlane.f32.xlu1 %v120_v38 }
 0x120   :  { %v62_v39 = vpop.f32.mrf.mxu0  ;;  %v1346_v40 = vpop.f32.mrf.mxu1 }
 0x121   :  { %v123_v43 = vsel %vm113_vm2, %v1346_v40, -inf }
 0x126   :  { %190 = vrot.lane.b32.xlu0 %v28_v15, %s1282_s19 }
 0x128   :  { %v104_v41 = vpop.f32.mrf.mxu1 }
 0x12a   :  { %188 = vrot.lane.b32.xlu2 %v1324_v16, %s1282_s19 }
 0x12e   :  { %231 = vrot.lane.b32.xlu0 %v1327_v21, %s1282_s19 }
 0x133   :  { %233 = vrot.lane.b32.xlu1 %v71_v20, %s1282_s19 }
 0x153   :  { %115 = vmax.xlane.f32.xlu2 %v114_v42 }
 0x15b   :  { %124 = vmax.xlane.f32.xlu2 %v123_v43 }
 0x17d   :  { %v109_v44 = vpop.xlane.xlu2 %108 }
 0x17e   :  { %v126_v45 = vsub.f32 %v55_v30, %v109_v44  ;;  %v569_v30 = vpack.c.bf16 %v563_v29, %v563_v29 }
 0x180   :  { %v132_v46 = vmul.f32 1.442695, %v126_v45  ;;  %v621_v31 = vunpack.c.l.b16 %v569_v30 }
 0x182   :  { %1185 = vpow2.f32 %v132_v46 }
 0x185   :  { %v119_v47 = vpop.xlane.xlu0 %118  ;;  %v112_v48 = vpop.xlane.xlu2 %111 }
 0x186   :  { %v129_v49 = vsub.f32 %v97_v33, %v119_v47  ;;  %v127_v52 = vsub.f32 %v57_v32, %v112_v48  ;;  %v1411_v32 = vpack.c.b16 %v621_v31, %v621_v31  ;;  %v851_v33 = vld [vmem:[%s1770_s0 + $0x28] sm:$0x1]  ;;  %s1288_s0 = smov 48  }
 0x187   :  { %v857_v34 = vpack.c.bf16 %v851_v33, %v851_v33 }
 0x188   :  { %v1354_v50 = vpop.eup %1185  ;;  %v138_v51 = vmul.f32 1.442695, %v129_v49  ;;  %v134_v54 = vmul.f32 1.442695, %v127_v52 }
 0x189   :  { %v144_v53 = vsel %vm106_vm1, %v1354_v50, 0.0  ;;  %v909_v38 = vunpack.c.l.b16 %v857_v34 }
 0x18a   :  { %145 = vadd.xlane.f32.xlu2 %v144_v53  ;;  %1187 = vpow2.f32 %v138_v51 }
 0x18b   :  { %1189 = vpow2.f32 %v134_v54  ;;  %v1425_v42 = vpack.c.b16 %v909_v38, %v909_v38 }
 0x18d   :  { %v122_v55 = vpop.xlane.xlu1 %121  ;;  %v189_v2 = vpop.permute.xlu2 %188 }
 0x18e   :  { %v130_v57 = vsub.f32 %v99_v36, %v122_v55 }
 0x190   :  { %v1358_v56 = vpop.eup %1187  ;;  %v140_v59 = vmul.f32 1.442695, %v130_v57 }
 0x191   :  { %v153_v58 = vsel %vm106_vm1, %v1358_v56, 0.0  ;;  %v1364_v62 = vpop.eup %1189 }
 0x192   :  { %154 = vadd.xlane.f32.xlu2 %v153_v58  ;;  %1191 = vpow2.f32 %v140_v59  ;;  %v147_v1 = vsel %vm106_vm1, %v1364_v62, 0.0 }
 0x198   :  { %v191_v63 = vpop.permute.xlu0 %190  ;;  %v1369_v3 = vpop.eup %1191 }
 0x199   :  { %v203_v0 = vand.u32 %v1362_v61, %v191_v63  ;;  %v156_v4 = vsel %vm106_vm1, %v1369_v3, 0.0 }
 0x19a   :  { %148 = vadd.xlane.f32.xlu2 %v147_v1 }
 0x19b   :  { %211 = vmatpush.bf16.msra.mxu2 %v203_v0 }
 0x19f   :  { %212 = vmatpush.bf16.msra.mxu2 %v189_v2 }
 0x1a0   :  { %v232_v43 = vpop.permute.xlu0 %231 }
 0x1a2   :  { %157 = vadd.xlane.f32.xlu2 %v156_v4 }
 0x1a5   :  { %v234_v36 = vpop.permute.xlu1 %233 }
 0x1ba   :  { %296 = vrot.lane.b32.xlu2 %v1376_v8, %s1284_s22 }
 0x1c2   :  { %342 = vrot.lane.b32.xlu2 %v1382_v12, %s1284_s22 }
 0x1c6   :  { %v116_v13 = vpop.xlane.xlu2 %115 }
 0x1c7   :  { %v128_v14 = vsub.f32 %v1343_v37, %v116_v13  ;;  %v854_v37 = vpack.c.bf16 %v848_v35, %v848_v35 }
 0x1c9   :  { %v136_v15 = vmul.f32 1.442695, %v128_v14  ;;  %v863_v41 = vunpack.c.l.b16 %v854_v37 }
 0x1ca   :  { %294 = vrot.lane.b32.xlu2 %v1324_v16, %s1284_s22 }
 0x1cb   :  { %1193 = vpow2.f32 %v136_v15  ;;  %v1427_v44 = vpack.c.b16 %v863_v41, %v863_v41 }
 0x1ce   :  { %v125_v17 = vpop.xlane.xlu2 %124 }
 0x1cf   :  { %v131_v18 = vsub.f32 %v1346_v40, %v125_v17  ;;  %v243_v40 = vand.u32 %v234_v36, %v1362_v61 }
 0x1d1   :  { %v1388_v19 = vpop.eup %1193  ;;  %v142_v20 = vmul.f32 1.442695, %v131_v18  ;;  %251 = vmatpush.bf16.msra.mxu3 %v243_v40 }
 0x1d2   :  { %v150_v22 = vsel %vm113_vm2, %v1388_v19, 0.0  ;;  %340 = vrot.lane.b32.xlu2 %v1327_v21, %s1284_s22  ;;  %s1292_s22 = smov 40  }
 0x1d3   :  { %1195 = vpow2.f32 %v142_v20  ;;  %151 = vadd.xlane.f32.xlu1 %v150_v22 }
 0x1d5   :  { %252 = vmatpush.bf16.msra.mxu3 %v232_v43 }
 0x1d9   :  { %v1393_v23 = vpop.eup %1195 }
 0x1da   :  { %v159_v24 = vsel %vm113_vm2, %v1393_v23, 0.0  ;;  %290 = vrot.lane.b32.xlu2 %v1324_v16, %s1285_s25 }
 0x1db   :  { %160 = vadd.xlane.f32.xlu0 %v159_v24 }
 0x1e2   :  { %338 = vrot.lane.b32.xlu2 %v1382_v12, %s1285_s25 }
 0x1ea   :  { %584 = vrot.lane.b32.xlu2 %v1403_v28, %s1286_s28 }
 0x1ec   :  { %336 = vrot.lane.b32.xlu1 %v1327_v21, %s1285_s25 }
 0x1ef   :  { %292 = vrot.lane.b32.xlu0 %v1376_v8, %s1285_s25 }
 0x1f2   :  { %630 = vrot.lane.b32.xlu2 %v1411_v32, %s1286_s28 }
 0x1f4   :  { %628 = vrot.lane.b32.xlu1 %v1327_v21, %s1286_s28 }
 0x1f7   :  { %582 = vrot.lane.b32.xlu0 %v1324_v16, %s1286_s28 }
 0x1fa   :  { %578 = vrot.lane.b32.xlu2 %v1324_v16, %s1287_s6 }
 0x1fc   :  { %580 = vrot.lane.b32.xlu1 %v1403_v28, %s1287_s6 }
 0x1fd   :  { %v146_v39 = vpop.xlane.xlu2 %145 }
 0x1fe   :  { %1197 = vrcp.f32 %v146_v39 }
 0x1ff   :  { %624 = vrot.lane.b32.xlu0 %v1327_v21, %s1287_s6 }
 0x202   :  { %626 = vrot.lane.b32.xlu2 %v1411_v32, %s1287_s6 }
 0x204   :  { %918 = vrot.lane.b32.xlu1 %v1425_v42, %s1288_s0  ;;  %v1198_v47 = vpop.eup %1197 }
 0x205   :  { %v155_v45 = vpop.xlane.xlu2 %154  ;;  %v168_v48 = vmul.f32 %v1198_v47, %v1354_v50 }
 0x207   :  { %872 = vrot.lane.b32.xlu0 %v1427_v44, %s1288_s0  ;;  %v174_v53 = vpack.c.bf16 %v168_v48, %v168_v48 }
 0x209   :  { %v183_v57 = vunpack.c.l.b16 %v174_v53 }
 0x20a   :  { %870 = vrot.lane.b32.xlu2 %v1324_v16, %s1288_s0 }
 0x20c   :  { %866 = vrot.lane.b32.xlu1 %v1324_v16, %s1289_s7 }
 0x20d   :  { %v149_v46 = vpop.xlane.xlu2 %148 }
 0x20e   :  { %1199 = vrcp.f32 %v149_v46 }
 0x20f   :  { %916 = vrot.lane.b32.xlu0 %v1327_v21, %s1288_s0  ;;  %1201 = vrcp.f32 %v155_v45 }
 0x212   :  { %912 = vrot.lane.b32.xlu2 %v1327_v21, %s1289_s7 }
 0x214   :  { %914 = vrot.lane.b32.xlu1 %v1425_v42, %s1289_s7  ;;  %v1200_v49 = vpop.eup %1199 }
 0x215   :  { %v158_v51 = vpop.xlane.xlu2 %157  ;;  %v169_v52 = vmul.f32 %v1200_v49, %v1364_v62  ;;  %v1202_v54 = vpop.eup %1201 }
 0x216   :  { %1203 = vrcp.f32 %v158_v51  ;;  %v171_v59 = vmul.f32 %v1202_v54, %v1358_v56 }
 0x217   :  { %868 = vrot.lane.b32.xlu0 %v1427_v44, %s1289_s7  ;;  %v175_v55 = vpack.c.bf16 %v169_v52, %v169_v52 }
 0x218   :  { %v177_v0 = vpack.c.bf16 %v171_v59, %v171_v59 }
 0x219   :  { %v184_v58 = vunpack.c.l.b16 %v175_v55 }
 0x21a   :  { %v226_v4 = vunpack.c.l.b16 %v177_v0  ;;  %494 = vrot.lane.b32.xlu2 %v1327_v21, %s1290_s8 }
 0x21b   :  { %v186_v60 = vpack.c.b16 %v184_v58, %v183_v57 }
 0x21c   :  { %v1204_v50 = vpop.eup %1203  ;;  %496 = vrot.lane.b32.xlu1 %v1382_v12, %s1290_s8 }
 0x21d   :  { %1142 = vmatmul.msk.bf16.vlgmr.msra.gmra.mxu2 %vm106_vm1, %v186_v60  ;;  %v172_v63 = vmul.f32 %v1204_v50, %v1369_v3  ;;  %v297_v62 = vpop.permute.xlu2 %296 }
 0x21e   :  { %v308_v1 = vsel %vm33_vm0, %v297_v62, 0 }
 0x21f   :  { %v178_v2 = vpack.c.bf16 %v172_v63, %v172_v63  ;;  %316 = vmatpush.bf16.xpose.msrb.mxu2 %v308_v1  ;;  %456 = vrot.lane.b32.xlu0 %v1376_v8, %s1290_s8 }
 0x221   :  { %v227_v5 = vunpack.c.l.b16 %v178_v2 }
 0x222   :  { %744 = vrot.lane.b32.xlu2 %v1403_v28, %s1291_s9 }
 0x223   :  { %v229_v6 = vpack.c.b16 %v227_v5, %v226_v4 }
 0x224   :  { %454 = vrot.lane.b32.xlu1 %v1324_v16, %s1290_s8 }
 0x225   :  { %1144 = vmatmul.msk.bf16.vlgmr.msra.gmra.mxu3 %vm106_vm1, %v229_v6  ;;  %v343_v7 = vpop.permute.xlu2 %342 }
 0x226   :  { %v354_v56 = vsel %vm33_vm0, %v343_v7, 0 }
 0x227   :  { %362 = vmatpush.bf16.xpose.msrb.mxu3 %v354_v56  ;;  %742 = vrot.lane.b32.xlu0 %v1324_v16, %s1291_s9 }
 0x22c   :  { %784 = vrot.lane.b32.xlu1 %v1411_v32, %s1291_s9 }
 0x22d   :  { %v295_v9 = vpop.permute.xlu2 %294 }
 0x22e   :  { %v305_v10 = vsel %vm33_vm0, %v295_v9, 0 }
 0x22f   :  { %317 = vmatpush.bf16.xpose.msrb.mxu2 %v305_v10  ;;  %782 = vrot.lane.b32.xlu0 %v1327_v21, %s1291_s9 }
 0x235   :  { %v341_v3 = vpop.permute.xlu2 %340 }
 0x236   :  { %v351_v11 = vsel %vm33_vm0, %v341_v3, 0 }
 0x237   :  { %363 = vmatpush.bf16.xpose.msrb.mxu3 %v351_v11 }
 0x23d   :  { %v291_v13 = vpop.permute.xlu2 %290 }
 0x245   :  { %v339_v8 = vpop.permute.xlu2 %338 }
 0x246   :  { %v152_v12 = vpop.xlane.xlu1 %151 }
 0x247   :  { %1205 = vrcp.f32 %v152_v12 }
 0x24d   :  { %v1206_v14 = vpop.eup %1205  ;;  %v585_v18 = vpop.permute.xlu2 %584 }
 0x24e   :  { %v161_v15 = vpop.xlane.xlu0 %160  ;;  %v170_v17 = vmul.f32 %v1206_v14, %v1388_v19  ;;  %v596_v20 = vsel %vm33_vm0, %v585_v18, 0 }
 0x24f   :  { %1207 = vrcp.f32 %v161_v15  ;;  %604 = vmatpush.bf16.xpose.msra.mxu2 %v596_v20 }
 0x250   :  { %v176_v22 = vpack.c.bf16 %v170_v17, %v170_v17 }
 0x252   :  { %v185_v24 = vunpack.c.l.b16 %v176_v22 }
 0x254   :  { %v187_v25 = vpack.c.b16 %v185_v24, %v185_v24 }
 0x255   :  { %v1208_v26 = vpop.eup %1207  ;;  %v631_v28 = vpop.permute.xlu2 %630 }
 0x256   :  { %1143 = vmatmul.msk.bf16.gmra.mxu2 %vm106_vm1, %v187_v25  ;;  %v173_v27 = vmul.f32 %v1208_v26, %v1393_v23  ;;  %v642_v29 = vsel %vm33_vm0, %v631_v28, 0 }
 0x257   :  { %650 = vmatpush.bf16.xpose.msra.mxu3 %v642_v29 }
 0x258   :  { %v179_v30 = vpack.c.bf16 %v173_v27, %v173_v27 }
 0x25a   :  { %v228_v31 = vunpack.c.l.b16 %v179_v30 }
 0x25c   :  { %v230_v19 = vpack.c.b16 %v228_v31, %v228_v31 }
 0x25d   :  { %v579_v37 = vpop.permute.xlu2 %578 }
 0x25e   :  { %1145 = vmatmul.msk.bf16.gmra.mxu3 %vm106_vm1, %v230_v19  ;;  %v337_v32 = vpop.permute.xlu1 %336 }
 0x261   :  { %v293_v33 = vpop.permute.xlu0 %292 }
 0x265   :  { %v627_v40 = vpop.permute.xlu2 %626 }
 0x266   :  { %1146 = vmatmul.msk.bf16.vlgmr.msrb.gmra.mxu2 %vm33_vm0, %v291_v13  ;;  %v629_v34 = vpop.permute.xlu1 %628 }
 0x267   :  { %v639_v35 = vsel %vm33_vm0, %v629_v34, 0 }
 0x268   :  { %651 = vmatpush.bf16.xpose.msra.mxu3 %v639_v35 }
 0x269   :  { %v583_v36 = vpop.permute.xlu0 %582 }
 0x26a   :  { %v593_v23 = vsel %vm33_vm0, %v583_v36, 0 }
 0x26b   :  { %605 = vmatpush.bf16.xpose.msra.mxu2 %v593_v23 }
 0x26d   :  { %v871_v47 = vpop.permute.xlu2 %870 }
 0x26e   :  { %1148 = vmatmul.msk.bf16.vlgmr.msrb.gmra.mxu3 %vm33_vm0, %v337_v32  ;;  %v581_v38 = vpop.permute.xlu1 %580  ;;  %v881_v48 = vsel %vm33_vm0, %v871_v47, 0 }
 0x271   :  { %v625_v39 = vpop.permute.xlu0 %624 }
 0x275   :  { %v913_v57 = vpop.permute.xlu2 %912 }
 0x276   :  { %1147 = vmatmul.msk.bf16.gmra.mxu2 %vm33_vm0, %v293_v33  ;;  %v919_v41 = vpop.permute.xlu1 %918 }
 0x277   :  { %v930_v43 = vsel %vm33_vm0, %v919_v41, 0 }
 0x278   :  { %938 = vmatpush.bf16.xpose.msrb.mxu3 %v930_v43 }
 0x279   :  { %v873_v45 = vpop.permute.xlu0 %872 }
 0x27a   :  { %v884_v46 = vsel %vm33_vm0, %v873_v45, 0 }
 0x27b   :  { %892 = vmatpush.bf16.xpose.msrb.mxu2 %v884_v46 }
 0x27d   :  { %v495_v26 = vpop.permute.xlu2 %494 }
 0x27e   :  { %1149 = vmatmul.msk.bf16.gmra.mxu3 %vm33_vm0, %v339_v8  ;;  %v867_v53 = vpop.permute.xlu1 %866 }
 0x281   :  { %v917_v49 = vpop.permute.xlu0 %916 }
 0x282   :  { %v927_v51 = vsel %vm33_vm0, %v917_v49, 0 }
 0x283   :  { %893 = vmatpush.bf16.xpose.msrb.mxu2 %v881_v48  ;;  %939 = vmatpush.bf16.xpose.msrb.mxu3 %v927_v51 }
 0x285   :  { %v745_v32 = vpop.permute.xlu2 %744 }
 0x286   :  { %1154 = vmatmul.msk.bf16.vlgmr.msra.gmra.mxu2 %vm33_vm0, %v579_v37  ;;  %v915_v60 = vpop.permute.xlu1 %914  ;;  %v754_v34 = vand.u32 %v745_v32, %v1362_v61 }
 0x289   :  { %v869_v59 = vpop.permute.xlu0 %868 }
 0x28e   :  { %1156 = vmatmul.msk.bf16.vlgmr.msra.gmra.mxu3 %vm33_vm0, %v625_v39  ;;  %v497_v17 = vpop.permute.xlu1 %496 }
 0x28f   :  { %v506_v18 = vand.u32 %v497_v17, %v1362_v61 }
 0x291   :  { %514 = vmatpush.bf16.msrb.mxu1 %v506_v18  ;;  %v457_v27 = vpop.permute.xlu0 %456 }
 0x292   :  { %v466_v28 = vand.u32 %v457_v27, %v1362_v61 }
 0x294   :  { %474 = vmatpush.bf16.msrb.mxu0 %v466_v28 }
 0x295   :  { %515 = vmatpush.bf16.msrb.mxu1 %v495_v26 }
 0x296   :  { %1155 = vmatmul.msk.bf16.gmra.mxu2 %vm33_vm0, %v581_v38  ;;  %v455_v33 = vpop.permute.xlu1 %454 }
 0x298   :  { %475 = vmatpush.bf16.msrb.mxu0 %v455_v33 }
 0x29c   :  { %762 = vmatpush.bf16.msra.mxu0 %v754_v34 }
 0x29e   :  { %1157 = vmatmul.msk.bf16.gmra.mxu3 %vm33_vm0, %v627_v40  ;;  %v743_v40 = vpop.permute.xlu0 %742  ;;  %v785_v41 = vpop.permute.xlu1 %784 }
 0x29f   :  { %v794_v43 = vand.u32 %v785_v41, %v1362_v61 }
 0x2a0   :  { %v214_v52 = vpop.f32.mrf.mxu2  ;;  %763 = vmatpush.bf16.msra.mxu0 %v743_v40 }
 0x2a1   :  { %263 = vst.msk [vmem:[%s1771_s1] sm:$0xff] %vm33_vm0, %v214_v52  ;;  %802 = vmatpush.bf16.msra.mxu1 %v794_v43 }
 0x2a6   :  { %1162 = vmatmul.msk.bf16.vlgmr.msrb.gmra.mxu2 %vm33_vm0, %v867_v53  ;;  %v783_v48 = vpop.permute.xlu0 %782 }
 0x2a7   :  { %803 = vmatpush.bf16.msra.mxu1 %v783_v48 }
 0x2a8   :  { %v216_v54 = vpop.f32.mrf.mxu2  ;;  %v254_v55 = vpop.f32.mrf.mxu3 }
 0x2a9   :  { %264 = vst.msk [vmem:[%s1771_s1 + $0x8] sm:$0xff] %vm33_vm0, %v216_v54 }
 0x2aa   :  { %267 = vst.msk [vmem:[%s1771_s1 + $0x18] sm:$0xff] %vm33_vm0, %v254_v55 }
 0x2ae   :  { %1164 = vmatmul.msk.bf16.vlgmr.msrb.gmra.mxu3 %vm33_vm0, %v913_v57 }
 0x2b0   :  { %v256_v58 = vpop.f32.mrf.mxu3 }
 0x2b1   :  { %268 = vst.msk [vmem:[%s1771_s1 + $0x20] sm:$0xff] %vm33_vm0, %v256_v58 }
 0x2b6   :  { %1163 = vmatmul.msk.bf16.gmra.mxu2 %vm33_vm0, %v869_v59 }
 0x2be   :  { %1165 = vmatmul.msk.bf16.gmra.mxu3 %vm33_vm0, %v915_v60 }
 0x2d9   :  { %v219_v50 = vpop.f32.mrf.mxu2 }
 0x2da   :  { %266 = vst.msk [vmem:[%s1771_s1 + $0x10] sm:$0x1] %vm265_vm4, %v219_v50 }
 0x2e1   :  { %v221_v63 = vpop.f32.mrf.mxu2  ;;  %v259_v0 = vpop.f32.mrf.mxu3 }
 0x2e2   :  { %269 = vst.msk [vmem:[%s1771_s1 + $0x28] sm:$0x1] %vm265_vm4, %v259_v0 }
 0x2e9   :  { %v261_v62 = vpop.f32.mrf.mxu3  ;;  %v1502_v1 = vpop.f32.mrf.mxu2 }
 0x2ea   :  { %v374_v2 = vsel %vm106_vm1, %v1502_v1, -inf }
 0x2eb   :  { %375 = vmax.xlane.f32.xlu2 %v374_v2 }
 0x2f1   :  { %v1506_v4 = vpop.f32.mrf.mxu2  ;;  %v1508_v5 = vpop.f32.mrf.mxu3 }
 0x2f2   :  { %v383_v6 = vsel %vm106_vm1, %v1508_v5, -inf  ;;  %v377_v7 = vsel %vm106_vm1, %v1506_v4, -inf }
 0x2f3   :  { %384 = vmax.xlane.f32.xlu1 %v383_v6  ;;  %378 = vmax.xlane.f32.xlu0 %v377_v7 }
 0x2f9   :  { %v1514_v56 = vpop.f32.mrf.mxu2  ;;  %v1516_v9 = vpop.f32.mrf.mxu3 }
 0x2fa   :  { %v386_v10 = vsel %vm106_vm1, %v1516_v9, -inf  ;;  %v380_v3 = vsel %vm113_vm2, %v1514_v56, -inf }
 0x2fb   :  { %387 = vmax.xlane.f32.xlu2 %v386_v10  ;;  %381 = vmax.xlane.f32.xlu0 %v380_v3 }
 0x301   :  { %v326_v11 = vpop.f32.mrf.mxu2  ;;  %v1522_v13 = vpop.f32.mrf.mxu3 }
 0x302   :  { %v389_v12 = vsel %vm113_vm2, %v1522_v13, -inf }
 0x303   :  { %390 = vmax.xlane.f32.xlu1 %v389_v12 }
 0x309   :  { %v372_v8 = vpop.f32.mrf.mxu3  ;;  %v1526_v14 = vpop.f32.mrf.mxu2 }
 0x30a   :  { %v662_v15 = vsel %vm106_vm1, %v1526_v14, -inf }
 0x30b   :  { %663 = vmax.xlane.f32.xlu2 %v662_v15 }
 0x311   :  { %v1531_v20 = vpop.f32.mrf.mxu2  ;;  %v1533_v22 = vpop.f32.mrf.mxu3 }
 0x312   :  { %v671_v24 = vsel %vm106_vm1, %v1533_v22, -inf  ;;  %v665_v25 = vsel %vm106_vm1, %v1531_v20, -inf }
 0x313   :  { %672 = vmax.xlane.f32.xlu1 %v671_v24  ;;  %666 = vmax.xlane.f32.xlu0 %v665_v25 }
 0x319   :  { %v1540_v29 = vpop.f32.mrf.mxu2  ;;  %v1542_v30 = vpop.f32.mrf.mxu3 }
 0x31a   :  { %v674_v31 = vsel %vm106_vm1, %v1542_v30, -inf  ;;  %v668_v19 = vsel %vm113_vm2, %v1540_v29, -inf }
 0x31b   :  { %675 = vmax.xlane.f32.xlu2 %v674_v31  ;;  %669 = vmax.xlane.f32.xlu0 %v668_v19 }
 0x321   :  { %v614_v35 = vpop.f32.mrf.mxu2  ;;  %v1549_v36 = vpop.f32.mrf.mxu3 }
 0x322   :  { %v677_v23 = vsel %vm113_vm2, %v1549_v36, -inf }
 0x323   :  { %678 = vmax.xlane.f32.xlu1 %v677_v23 }
 0x329   :  { %v660_v37 = vpop.f32.mrf.mxu3  ;;  %v1553_v38 = vpop.f32.mrf.mxu2 }
 0x32a   :  { %v950_v39 = vsel %vm106_vm1, %v1553_v38, -inf }
 0x32b   :  { %951 = vmax.xlane.f32.xlu2 %v950_v39 }
 0x331   :  { %v1558_v45 = vpop.f32.mrf.mxu2  ;;  %v1560_v46 = vpop.f32.mrf.mxu3 }
 0x332   :  { %v959_v47 = vsel %vm106_vm1, %v1560_v46, -inf  ;;  %v953_v52 = vsel %vm106_vm1, %v1558_v45, -inf }
 0x333   :  { %960 = vmax.xlane.f32.xlu2 %v959_v47 }
 0x339   :  { %v1564_v49 = vpop.f32.mrf.mxu3  ;;  %v1566_v51 = vpop.f32.mrf.mxu2 }
 0x33a   :  { %v962_v53 = vsel %vm106_vm1, %v1564_v49, -inf  ;;  %v956_v54 = vsel %vm113_vm2, %v1566_v51, -inf }
 0x33b   :  { %954 = vmax.xlane.f32.xlu2 %v953_v52  ;;  %963 = vmax.xlane.f32.xlu0 %v962_v53 }
 0x341   :  { %v1574_v55 = vpop.f32.mrf.mxu3  ;;  %v902_v57 = vpop.f32.mrf.mxu2 }
 0x342   :  { %v965_v58 = vsel %vm113_vm2, %v1574_v55, -inf }
 0x343   :  { %957 = vmax.xlane.f32.xlu0 %v956_v54 }
 0x349   :  { %v948_v59 = vpop.f32.mrf.mxu3 }
 0x34b   :  { %966 = vmax.xlane.f32.xlu0 %v965_v58 }
 0x35e   :  { %v376_v60 = vpop.xlane.xlu2 %375 }
 0x35f   :  { %v392_v50 = vsub.f32 %v1502_v1, %v376_v60 }
 0x361   :  { %v398_v63 = vmul.f32 1.442695, %v392_v50 }
 0x363   :  { %1209 = vpow2.f32 %v398_v63 }
 0x366   :  { %v385_v0 = vpop.xlane.xlu1 %384  ;;  %v379_v62 = vpop.xlane.xlu0 %378 }
 0x367   :  { %v395_v2 = vsub.f32 %v1508_v5, %v385_v0  ;;  %v393_v6 = vsub.f32 %v1506_v4, %v379_v62 }
 0x369   :  { %v1581_v7 = vpop.eup %1209  ;;  %v404_v10 = vmul.f32 1.442695, %v395_v2  ;;  %v400_v3 = vmul.f32 1.442695, %v393_v6 }
 0x36a   :  { %v410_v11 = vsel %vm106_vm1, %v1581_v7, 0.0 }
 0x36b   :  { %1211 = vpow2.f32 %v404_v10  ;;  %411 = vadd.xlane.f32.xlu2 %v410_v11 }
 0x36c   :  { %1213 = vpow2.f32 %v400_v3 }
 0x36e   :  { %v382_v12 = vpop.xlane.xlu0 %381  ;;  %v388_v1 = vpop.xlane.xlu2 %387 }
 0x36f   :  { %v394_v8 = vsub.f32 %v1514_v56, %v382_v12  ;;  %v396_v15 = vsub.f32 %v1516_v9, %v388_v1 }
 0x371   :  { %v1587_v17 = vpop.eup %1211  ;;  %v402_v5 = vmul.f32 1.442695, %v394_v8  ;;  %v406_v4 = vmul.f32 1.442695, %v396_v15 }
 0x372   :  { %v1589_v18 = vpop.eup %1213  ;;  %v419_v24 = vsel %vm106_vm1, %v1587_v17, 0.0 }
 0x373   :  { %1215 = vpow2.f32 %v402_v5  ;;  %420 = vadd.xlane.f32.xlu1 %v419_v24  ;;  %v413_v25 = vsel %vm106_vm1, %v1589_v18, 0.0 }
 0x374   :  { %1217 = vpow2.f32 %v406_v4  ;;  %414 = vadd.xlane.f32.xlu0 %v413_v25 }
 0x376   :  { %v391_v26 = vpop.xlane.xlu1 %390 }
 0x377   :  { %v397_v56 = vsub.f32 %v1522_v13, %v391_v26 }
 0x379   :  { %v1596_v9 = vpop.eup %1215  ;;  %v408_v27 = vmul.f32 1.442695, %v397_v56 }
 0x37a   :  { %v1598_v28 = vpop.eup %1217  ;;  %v416_v31 = vsel %vm113_vm2, %v1596_v9, 0.0 }
 0x37b   :  { %1219 = vpow2.f32 %v408_v27  ;;  %417 = vadd.xlane.f32.xlu1 %v416_v31  ;;  %v422_v19 = vsel %vm106_vm1, %v1598_v28, 0.0 }
 0x37c   :  { %423 = vadd.xlane.f32.xlu2 %v422_v19 }
 0x37e   :  { %v664_v32 = vpop.xlane.xlu2 %663 }
 0x37f   :  { %v680_v33 = vsub.f32 %v1526_v14, %v664_v32 }
 0x381   :  { %v1605_v34 = vpop.eup %1219  ;;  %v686_v13 = vmul.f32 1.442695, %v680_v33 }
 0x382   :  { %v425_v35 = vsel %vm113_vm2, %v1605_v34, 0.0 }
 0x383   :  { %1221 = vpow2.f32 %v686_v13 }
 0x384   :  { %426 = vadd.xlane.f32.xlu2 %v425_v35 }
 0x386   :  { %v673_v23 = vpop.xlane.xlu1 %672  ;;  %v667_v37 = vpop.xlane.xlu0 %666 }
 0x387   :  { %v683_v39 = vsub.f32 %v1533_v22, %v673_v23  ;;  %v681_v40 = vsub.f32 %v1531_v20, %v667_v37 }
 0x389   :  { %v1611_v41 = vpop.eup %1221  ;;  %v692_v43 = vmul.f32 1.442695, %v683_v39  ;;  %v688_v47 = vmul.f32 1.442695, %v681_v40 }
 0x38a   :  { %v698_v14 = vsel %vm106_vm1, %v1611_v41, 0.0 }
 0x38b   :  { %1223 = vpow2.f32 %v692_v43  ;;  %699 = vadd.xlane.f32.xlu1 %v698_v14 }
 0x38c   :  { %1225 = vpow2.f32 %v688_v47 }
 0x38e   :  { %v676_v48 = vpop.xlane.xlu2 %675  ;;  %v670_v6 = vpop.xlane.xlu0 %669 }
 0x38f   :  { %v684_v52 = vsub.f32 %v1542_v30, %v676_v48  ;;  %v682_v4 = vsub.f32 %v1540_v29, %v670_v6 }
 0x391   :  { %v1616_v53 = vpop.eup %1223  ;;  %v694_v54 = vmul.f32 1.442695, %v684_v52 }
 0x392   :  { %v1618_v57 = vpop.eup %1225  ;;  %v707_v20 = vsel %vm106_vm1, %v1616_v53, 0.0 }
 0x393   :  { %v701_v22 = vsel %vm106_vm1, %v1618_v57, 0.0  ;;  %708 = vadd.xlane.f32.xlu1 %v707_v20  ;;  %1227 = vpow2.f32 %v694_v54 }
 0x394   :  { %702 = vadd.xlane.f32.xlu0 %v701_v22 }
 0x396   :  { %v679_v58 = vpop.xlane.xlu1 %678 }
 0x397   :  { %v685_v59 = vsub.f32 %v1549_v36, %v679_v58 }
 0x399   :  { %v696_v60 = vmul.f32 1.442695, %v685_v59  ;;  %v1625_v50 = vpop.eup %1227 }
 0x39a   :  { %v710_v30 = vsel %vm106_vm1, %v1625_v50, 0.0 }
 0x39b   :  { %1229 = vpow2.f32 %v696_v60 }
 0x39c   :  { %1032 = vrot.lane.b32.xlu2 %v1427_v44, %s1292_s22  ;;  %711 = vadd.xlane.f32.xlu0 %v710_v30 }
 0x39e   :  { %v952_v63 = vpop.xlane.xlu2 %951 }
 0x39f   :  { %v968_v0 = vsub.f32 %v1553_v38, %v952_v63 }
 0x3a1   :  { %v1632_v62 = vpop.eup %1229  ;;  %v974_v2 = vmul.f32 1.442695, %v968_v0 }
 0x3a2   :  { %v713_v36 = vsel %vm113_vm2, %v1632_v62, 0.0 }
 0x3a3   :  { %1231 = vpow2.f32 %v974_v2  ;;  %714 = vadd.xlane.f32.xlu1 %v713_v36 }
 0x3a6   :  { %v961_v10 = vpop.xlane.xlu2 %960 }
 0x3a7   :  { %v971_v3 = vsub.f32 %v1560_v46, %v961_v10  ;;  %v690_v46 = vmul.f32 1.442695, %v682_v4 }
 0x3a9   :  { %v1637_v11 = vpop.eup %1231  ;;  %v980_v12 = vmul.f32 1.442695, %v971_v3 }
 0x3aa   :  { %v986_v44 = vsel %vm106_vm1, %v1637_v11, 0.0 }
 0x3ab   :  { %1233 = vpow2.f32 %v980_v12  ;;  %987 = vadd.xlane.f32.xlu0 %v986_v44 }
 0x3ae   :  { %v964_v38 = vpop.xlane.xlu0 %963  ;;  %v955_v24 = vpop.xlane.xlu2 %954 }
 0x3af   :  { %v972_v1 = vsub.f32 %v1564_v49, %v964_v38  ;;  %v969_v49 = vsub.f32 %v1558_v45, %v955_v24 }
 0x3b1   :  { %v1642_v8 = vpop.eup %1233  ;;  %v982_v15 = vmul.f32 1.442695, %v972_v1  ;;  %v976_v56 = vmul.f32 1.442695, %v969_v49 }
 0x3b2   :  { %v995_v5 = vsel %vm106_vm1, %v1642_v8, 0.0 }
 0x3b3   :  { %1235 = vpow2.f32 %v982_v15  ;;  %996 = vadd.xlane.f32.xlu1 %v995_v5 }
 0x3b4   :  { %1237 = vpow2.f32 %v690_v46 }
 0x3b5   :  { %1239 = vpow2.f32 %v976_v56 }
 0x3b6   :  { %v958_v45 = vpop.xlane.xlu0 %957 }
 0x3b7   :  { %v970_v35 = vsub.f32 %v1566_v51, %v958_v45 }
 0x3b9   :  { %v1647_v25 = vpop.eup %1235  ;;  %v978_v40 = vmul.f32 1.442695, %v970_v35 }
 0x3ba   :  { %v998_v26 = vsel %vm106_vm1, %v1647_v25, 0.0  ;;  %v1652_v27 = vpop.eup %1237 }
 0x3bb   :  { %999 = vadd.xlane.f32.xlu0 %v998_v26  ;;  %v704_v29 = vsel %vm113_vm2, %v1652_v27, 0.0  ;;  %v1656_v31 = vpop.eup %1239 }
 0x3bc   :  { %v989_v19 = vsel %vm106_vm1, %v1656_v31, 0.0 }
 0x3be   :  { %v967_v32 = vpop.xlane.xlu0 %966 }
 0x3bf   :  { %v973_v13 = vsub.f32 %v1574_v55, %v967_v32 }
 0x3c1   :  { %v984_v39 = vmul.f32 1.442695, %v973_v13 }
 0x3c5   :  { %705 = vadd.xlane.f32.xlu2 %v704_v29 }
 0x3cc   :  { %1072 = vrot.lane.b32.xlu1 %v1425_v42, %s1292_s22 }
 0x3cd   :  { %990 = vadd.xlane.f32.xlu2 %v989_v19 }
 0x3cf   :  { %1030 = vrot.lane.b32.xlu0 %v1324_v16, %s1292_s22 }
 0x3de   :  { %v412_v33 = vpop.xlane.xlu2 %411 }
 0x3df   :  { %1241 = vrcp.f32 %v412_v33 }
 0x3e5   :  { %1070 = vrot.lane.b32.xlu2 %v1327_v21, %s1292_s22  ;;  %v1242_v37 = vpop.eup %1241 }
 0x3e6   :  { %v421_v23 = vpop.xlane.xlu1 %420  ;;  %v434_v16 = vmul.f32 %v1242_v37, %v1581_v7 }
 0x3e7   :  { %v415_v42 = vpop.xlane.xlu0 %414 }
 0x3e8   :  { %1243 = vrcp.f32 %v415_v42  ;;  %v440_v14 = vpack.c.bf16 %v434_v16, %v434_v16 }
 0x3e9   :  { %1245 = vrcp.f32 %v421_v23 }
 0x3ea   :  { %1247 = vpow2.f32 %v984_v39  ;;  %v449_v54 = vunpack.c.l.b16 %v440_v14 }
 0x3eb   :  { %1249 = vpow2.f32 %v978_v40 }
 0x3ee   :  { %v1244_v43 = vpop.eup %1243  ;;  %v418_v47 = vpop.xlane.xlu1 %417 }
 0x3ef   :  { %v435_v55 = vmul.f32 %v1244_v43, %v1589_v18  ;;  %1251 = vrcp.f32 %v418_v47  ;;  %v424_v21 = vpop.xlane.xlu2 %423  ;;  %v1246_v48 = vpop.eup %1245 }
 0x3f0   :  { %1253 = vrcp.f32 %v424_v21  ;;  %v1670_v52 = vpop.eup %1247  ;;  %v437_v20 = vmul.f32 %v1246_v48, %v1587_v17 }
 0x3f1   :  { %v441_v51 = vpack.c.bf16 %v435_v55, %v435_v55  ;;  %v1673_v58 = vpop.eup %1249  ;;  %v1001_v59 = vsel %vm113_vm2, %v1670_v52, 0.0 }
 0x3f2   :  { %v443_v18 = vpack.c.bf16 %v437_v20, %v437_v20  ;;  %v992_v17 = vsel %vm113_vm2, %v1673_v58, 0.0 }
 0x3f3   :  { %v450_v22 = vunpack.c.l.b16 %v441_v51 }
 0x3f4   :  { %v489_v6 = vunpack.c.l.b16 %v443_v18 }
 0x3f5   :  { %v1252_v7 = vpop.eup %1251  ;;  %v452_v60 = vpack.c.b16 %v450_v22, %v449_v54 }
 0x3f6   :  { %v1254_v30 = vpop.eup %1253  ;;  %1002 = vadd.xlane.f32.xlu1 %v1001_v59  ;;  %v436_v36 = vmul.f32 %v1252_v7, %v1596_v9 }
 0x3f7   :  { %v438_v63 = vmul.f32 %v1254_v30, %v1598_v28  ;;  %1150 = vmatmul.msk.bf16.vlgmr.msrb.gmra.mxu0 %vm106_vm1, %v452_v60  ;;  %v427_v0 = vpop.xlane.xlu2 %426 }
 0x3f8   :  { %1255 = vrcp.f32 %v427_v0  ;;  %v442_v12 = vpack.c.bf16 %v436_v36, %v436_v36 }
 0x3f9   :  { %v444_v2 = vpack.c.bf16 %v438_v63, %v438_v63  ;;  %993 = vadd.xlane.f32.xlu0 %v992_v17 }
 0x3fa   :  { %v451_v15 = vunpack.c.l.b16 %v442_v12 }
 0x3fb   :  { %v490_v10 = vunpack.c.l.b16 %v444_v2 }
 0x3fc   :  { %v453_v4 = vpack.c.b16 %v451_v15, %v451_v15 }
 0x3fd   :  { %v492_v3 = vpack.c.b16 %v490_v10, %v489_v6 }
 0x3fe   :  { %v1256_v44 = vpop.eup %1255  ;;  %v700_v38 = vpop.xlane.xlu1 %699 }
 0x3ff   :  { %1152 = vmatmul.msk.bf16.vlgmr.msrb.gmra.mxu1 %vm106_vm1, %v492_v3  ;;  %v1033_v28 = vpop.permute.xlu2 %1032  ;;  %v439_v5 = vmul.f32 %v1256_v44, %v1605_v34  ;;  %1257 = vrcp.f32 %v700_v38 }
 0x400   :  { %v1042_v1 = vand.u32 %v1033_v28, %v1362_v61 }
 0x401   :  { %v445_v46 = vpack.c.bf16 %v439_v5, %v439_v5 }
 0x402   :  { %1050 = vmatpush.bf16.msrb.mxu0 %v1042_v1 }
 0x403   :  { %v491_v49 = vunpack.c.l.b16 %v445_v46 }
 0x405   :  { %v1258_v26 = vpop.eup %1257  ;;  %v493_v29 = vpack.c.b16 %v491_v49, %v491_v49 }
 0x406   :  { %v709_v9 = vpop.xlane.xlu1 %708  ;;  %v722_v56 = vmul.f32 %v1258_v26, %v1611_v41 }
 0x407   :  { %v703_v24 = vpop.xlane.xlu0 %702  ;;  %1151 = vmatmul.msk.bf16.gmra.mxu0 %vm106_vm1, %v453_v4 }
 0x408   :  { %1259 = vrcp.f32 %v703_v24  ;;  %v728_v45 = vpack.c.bf16 %v722_v56, %v722_v56 }
 0x409   :  { %1261 = vrcp.f32 %v709_v9 }
 0x40a   :  { %v737_v35 = vunpack.c.l.b16 %v728_v45 }
 0x40e   :  { %v1260_v19 = vpop.eup %1259 }
 0x40f   :  { %v723_v32 = vmul.f32 %v1260_v19, %v1618_v57  ;;  %v712_v34 = vpop.xlane.xlu0 %711  ;;  %1153 = vmatmul.msk.bf16.gmra.mxu1 %vm106_vm1, %v493_v29  ;;  %v1262_v33 = vpop.eup %1261 }
 0x410   :  { %1263 = vrcp.f32 %v712_v34  ;;  %v725_v42 = vmul.f32 %v1262_v33, %v1616_v53 }
 0x411   :  { %v729_v13 = vpack.c.bf16 %v723_v32, %v723_v32 }
 0x412   :  { %v731_v16 = vpack.c.bf16 %v725_v42, %v725_v42 }
 0x413   :  { %v738_v23 = vunpack.c.l.b16 %v729_v13 }
 0x414   :  { %v777_v43 = vunpack.c.l.b16 %v731_v16 }
 0x415   :  { %v740_v37 = vpack.c.b16 %v738_v23, %v737_v35 }
 0x416   :  { %v1264_v39 = vpop.eup %1263  ;;  %v715_v40 = vpop.xlane.xlu1 %714 }
 0x417   :  { %v726_v41 = vmul.f32 %v1264_v39, %v1625_v50  ;;  %1158 = vmatmul.msk.bf16.vlgmr.msra.gmra.mxu0 %vm106_vm1, %v740_v37  ;;  %1265 = vrcp.f32 %v715_v40 }
 0x419   :  { %v732_v57 = vpack.c.bf16 %v726_v41, %v726_v41 }
 0x41b   :  { %v778_v47 = vunpack.c.l.b16 %v732_v57 }
 0x41d   :  { %v780_v14 = vpack.c.b16 %v778_v47, %v777_v43  ;;  %v1266_v55 = vpop.eup %1265 }
 0x41e   :  { %v727_v21 = vmul.f32 %v1266_v55, %v1632_v62  ;;  %v988_v51 = vpop.xlane.xlu0 %987 }
 0x41f   :  { %1160 = vmatmul.msk.bf16.vlgmr.msra.gmra.mxu1 %vm106_vm1, %v780_v14 }
 0x420   :  { %v733_v48 = vpack.c.bf16 %v727_v21, %v727_v21 }
 0x422   :  { %v779_v53 = vunpack.c.l.b16 %v733_v48 }
 0x424   :  { %v781_v54 = vpack.c.b16 %v779_v53, %v779_v53 }
 0x426   :  { %v997_v50 = vpop.xlane.xlu1 %996 }
 0x42e   :  { %v1000_v20 = vpop.xlane.xlu0 %999 }
 0x42f   :  { %1161 = vmatmul.msk.bf16.gmra.mxu1 %vm106_vm1, %v781_v54  ;;  %1267 = vrcp.f32 %v1000_v20 }
 0x430   :  { %1269 = vrcp.f32 %v997_v50 }
 0x435   :  { %v1268_v7 = vpop.eup %1267 }
 0x436   :  { %v1270_v59 = vpop.eup %1269  ;;  %v1014_v60 = vmul.f32 %v1268_v7, %v1647_v25 }
 0x437   :  { %v1013_v63 = vmul.f32 %v1270_v59, %v1642_v8 }
 0x438   :  { %v706_v22 = vpop.xlane.xlu2 %705  ;;  %v1020_v36 = vpack.c.bf16 %v1014_v60, %v1014_v60 }
 0x439   :  { %1271 = vrcp.f32 %v706_v22  ;;  %v1019_v10 = vpack.c.bf16 %v1013_v63, %v1013_v63 }
 0x43a   :  { %v1066_v12 = vunpack.c.l.b16 %v1020_v36 }
 0x43b   :  { %v1065_v38 = vunpack.c.l.b16 %v1019_v10 }
 0x43d   :  { %v1068_v28 = vpack.c.b16 %v1066_v12, %v1065_v38 }
 0x43e   :  { %v1073_v30 = vpop.permute.xlu1 %1072 }
 0x43f   :  { %v1272_v18 = vpop.eup %1271  ;;  %v1082_v62 = vand.u32 %v1073_v30, %v1362_v61 }
 0x440   :  { %v991_v0 = vpop.xlane.xlu2 %990  ;;  %v724_v17 = vmul.f32 %v1272_v18, %v1652_v27 }
 0x441   :  { %1273 = vrcp.f32 %v991_v0  ;;  %v1031_v2 = vpop.permute.xlu0 %1030  ;;  %1090 = vmatpush.bf16.msrb.mxu1 %v1082_v62 }
 0x442   :  { %1051 = vmatpush.bf16.msrb.mxu0 %v1031_v2  ;;  %v730_v6 = vpack.c.bf16 %v724_v17, %v724_v17  ;;  %1275 = vrcp.f32 %v988_v51 }
 0x444   :  { %v739_v3 = vunpack.c.l.b16 %v730_v6 }
 0x446   :  { %v741_v25 = vpack.c.b16 %v739_v3, %v739_v3 }
 0x447   :  { %v1274_v44 = vpop.eup %1273 }
 0x448   :  { %1159 = vmatmul.msk.bf16.gmra.mxu0 %vm106_vm1, %v741_v25  ;;  %v1071_v61 = vpop.permute.xlu2 %1070  ;;  %v1276_v8 = vpop.eup %1275  ;;  %v1011_v27 = vmul.f32 %v1274_v44, %v1656_v31 }
 0x449   :  { %1091 = vmatpush.bf16.msrb.mxu1 %v1071_v61  ;;  %v1010_v1 = vmul.f32 %v1276_v8, %v1637_v11 }
 0x44a   :  { %v1017_v15 = vpack.c.bf16 %v1011_v27, %v1011_v27 }
 0x44b   :  { %v1016_v5 = vpack.c.bf16 %v1010_v1, %v1010_v1 }
 0x44c   :  { %1168 = vmatmul.msk.bf16.vlgmr.msrb.gmra.mxu1 %vm106_vm1, %v1068_v28  ;;  %v1026_v4 = vunpack.c.l.b16 %v1017_v15 }
 0x44d   :  { %v1025_v46 = vunpack.c.l.b16 %v1016_v5 }
 0x44f   :  { %v1028_v24 = vpack.c.b16 %v1026_v4, %v1025_v46 }
 0x458   :  { %1166 = vmatmul.msk.bf16.vlgmr.msrb.gmra.mxu0 %vm106_vm1, %v1028_v24 }
 0x469   :  { %v1003_v9 = vpop.xlane.xlu1 %1002 }
 0x46a   :  { %1277 = vrcp.f32 %v1003_v9 }
 0x46c   :  { %v994_v26 = vpop.xlane.xlu0 %993 }
 0x46d   :  { %1279 = vrcp.f32 %v994_v26 }
 0x470   :  { %v1278_v49 = vpop.eup %1277 }
 0x471   :  { %v1015_v56 = vmul.f32 %v1278_v49, %v1670_v52 }
 0x473   :  { %v1280_v29 = vpop.eup %1279  ;;  %v1021_v31 = vpack.c.bf16 %v1015_v56, %v1015_v56 }
 0x474   :  { %v477_v19 = vpop.f32.mrf.mxu0  ;;  %v1012_v11 = vmul.f32 %v1280_v29, %v1673_v58 }
 0x475   :  { %532 = vrot.lane.b32.xlu2 %v477_v19, %s1293_s23  ;;  %v1067_v45 = vunpack.c.l.b16 %v1021_v31 }
 0x476   :  { %v1018_v32 = vpack.c.bf16 %v1012_v11, %v1012_v11 }
 0x477   :  { %v1069_v34 = vpack.c.b16 %v1067_v45, %v1067_v45 }
 0x478   :  { %v1027_v33 = vunpack.c.l.b16 %v1018_v32 }
 0x479   :  { %1169 = vmatmul.msk.bf16.gmra.mxu1 %vm106_vm1, %v1069_v34 }
 0x47a   :  { %v1029_v13 = vpack.c.b16 %v1027_v33, %v1027_v33 }
 0x47c   :  { %v479_v35 = vpop.f32.mrf.mxu0  ;;  %v517_v23 = vpop.f32.mrf.mxu1  ;;  %1167 = vmatmul.msk.bf16.gmra.mxu0 %vm106_vm1, %v1029_v13 }
 0x47d   :  { %538 = vrot.lane.b32.xlu2 %v517_v23, %s1293_s23 }
 0x484   :  { %v482_v52 = vpop.f32.mrf.mxu0  ;;  %v519_v42 = vpop.f32.mrf.mxu1 }
 0x485   :  { %534 = vrot.lane.b32.xlu2 %v479_v35, %s1293_s23 }
 0x48c   :  { %v484_v37 = vpop.f32.mrf.mxu0  ;;  %v522_v39 = vpop.f32.mrf.mxu1 }
 0x48d   :  { %540 = vrot.lane.b32.xlu2 %v519_v42, %s1293_s23  ;;  %542 = vrot.lane.b32.xlu0 %v522_v39, %s1293_s23 }
 0x494   :  { %v524_v58 = vpop.f32.mrf.mxu1  ;;  %v765_v40 = vpop.f32.mrf.mxu0 }
 0x495   :  { %820 = vrot.lane.b32.xlu1 %v765_v40, %s1294_s24  ;;  %536 = vrot.lane.b32.xlu2 %v482_v52, %s1293_s23 }
 0x49c   :  { %v805_v16 = vpop.f32.mrf.mxu1  ;;  %v767_v41 = vpop.f32.mrf.mxu0 }
 0x49d   :  { %826 = vrot.lane.b32.xlu2 %v805_v16, %s1294_s24 }
 0x4a4   :  { %v807_v57 = vpop.f32.mrf.mxu1 }
 0x4a5   :  { %822 = vrot.lane.b32.xlu2 %v767_v41, %s1294_s24  ;;  %828 = vrot.lane.b32.xlu0 %v807_v57, %s1294_s24 }
 0x4ac   :  { %v810_v43 = vpop.f32.mrf.mxu1 }
 0x4ad   :  { %830 = vrot.lane.b32.xlu1 %v810_v43, %s1294_s24 }
 0x4b4   :  { %v812_v47 = vpop.f32.mrf.mxu1 }
 0x4c5   :  { %v770_v14 = vpop.f32.mrf.mxu0 }
 0x4c6   :  { %824 = vrot.lane.b32.xlu2 %v770_v14, %s1294_s24 }
 0x4c9   :  { %v1093_v51 = vpop.f32.mrf.mxu1 }
 0x4cd   :  { %v772_v55 = vpop.f32.mrf.mxu0 }
 0x4cf   :  { %v533_v21 = vpop.permute.xlu2 %532 }
 0x4d0   :  { %551 = vst.msk [vmem:[%s1771_s1] sm:$0xff] %vm550_vm5, %v533_v21 }
 0x4d1   :  { %v1095_v50 = vpop.f32.mrf.mxu1 }
 0x4d5   :  { %v1053_v48 = vpop.f32.mrf.mxu0 }
 0x4d6   :  { %1108 = vrot.lane.b32.xlu2 %v1053_v48, %s1295_s27 }
 0x4d7   :  { %v539_v53 = vpop.permute.xlu2 %538 }
 0x4d8   :  { %555 = vst.msk [vmem:[%s1771_s1 + $0x18] sm:$0xff] %vm550_vm5, %v539_v53 }
 0x4dd   :  { %v1055_v54 = vpop.f32.mrf.mxu0 }
 0x4de   :  { %1110 = vrot.lane.b32.xlu0 %v1055_v54, %s1295_s27  ;;  %1114 = vrot.lane.b32.xlu2 %v1093_v51, %s1295_s27 }
 0x4df   :  { %v535_v20 = vpop.permute.xlu2 %534 }
 0x4e0   :  { %552 = vst.msk [vmem:[%s1771_s1 + $0x8] sm:$0xff] %vm550_vm5, %v535_v20 }
 0x4e6   :  { %1116 = vrot.lane.b32.xlu0 %v1095_v50, %s1295_s27 }
 0x4e7   :  { %v541_v22 = vpop.permute.xlu2 %540 }
 0x4e8   :  { %556 = vst.msk [vmem:[%s1771_s1 + $0x20] sm:$0xff] %vm550_vm5, %v541_v22 }
 0x4ef   :  { %v537_v7 = vpop.permute.xlu2 %536 }
 0x4f0   :  { %554 = vst.msk [vmem:[%s1771_s1 + $0x10] sm:$0x1] %vm553_vm6, %v537_v7 }
 0x4f6   :  { %v1098_v59 = vpop.f32.mrf.mxu1 }
 0x4f7   :  { %v827_v60 = vpop.permute.xlu2 %826 }
 0x4f8   :  { %843 = vst.msk [vmem:[%s1771_s1 + $0x18] sm:$0xff] %vm838_vm7, %v827_v60 }
 0x4f9   :  { %v1058_v30 = vpop.f32.mrf.mxu0 }
 0x4fa   :  { %1112 = vrot.lane.b32.xlu1 %v1058_v30, %s1295_s27 }
 0x4fe   :  { %v1100_v18 = vpop.f32.mrf.mxu1 }
 0x4ff   :  { %v543_v62 = vpop.permute.xlu0 %542  ;;  %v823_v63 = vpop.permute.xlu2 %822 }
 0x500   :  { %557 = vst.msk [vmem:[%s1771_s1 + $0x28] sm:$0x1] %vm553_vm6, %v543_v62 }
 0x501   :  { %840 = vst.msk [vmem:[%s1771_s1 + $0x8] sm:$0xff] %vm838_vm7, %v823_v63  ;;  %v1060_v0 = vpop.f32.mrf.mxu0 }
 0x502   :  { %1118 = vrot.lane.b32.xlu1 %v1098_v59, %s1295_s27 }
 0x507   :  { %v821_v17 = vpop.permute.xlu1 %820 }
 0x508   :  { %839 = vst.msk [vmem:[%s1771_s1] sm:$0xff] %vm838_vm7, %v821_v17 }
 0x517   :  { %v829_v2 = vpop.permute.xlu0 %828 }
 0x518   :  { %844 = vst.msk [vmem:[%s1771_s1 + $0x20] sm:$0xff] %vm838_vm7, %v829_v2 }
 0x51f   :  { %v831_v36 = vpop.permute.xlu1 %830 }
 0x520   :  { %845 = vst.msk [vmem:[%s1771_s1 + $0x28] sm:$0x1] %vm841_vm8, %v831_v36  ;;  %v825_v6 = vpop.permute.xlu2 %824 }
 0x521   :  { %842 = vst.msk [vmem:[%s1771_s1 + $0x10] sm:$0x1] %vm841_vm8, %v825_v6 }
 0x530   :  { %v1109_v10 = vpop.permute.xlu2 %1108 }
 0x531   :  { %1127 = vst.msk [vmem:[%s1771_s1] sm:$0xff] %vm1126_vm9, %v1109_v10 }
 0x538   :  { %v1115_v3 = vpop.permute.xlu2 %1114 }
 0x539   :  { %1131 = vst.msk [vmem:[%s1771_s1 + $0x18] sm:$0xff] %vm1126_vm9, %v1115_v3 }
 0x550   :  { %v1111_v12 = vpop.permute.xlu0 %1110 }
 0x551   :  { %1128 = vst.msk [vmem:[%s1771_s1 + $0x8] sm:$0xff] %vm1126_vm9, %v1111_v12 }
 0x558   :  { %v1117_v25 = vpop.permute.xlu0 %1116 }
 0x559   :  { %1132 = vst.msk [vmem:[%s1771_s1 + $0x20] sm:$0xff] %vm1126_vm9, %v1117_v25 }
 0x56c   :  { %v1113_v44 = vpop.permute.xlu1 %1112 }
 0x56d   :  { %1130 = vst.msk [vmem:[%s1771_s1 + $0x10] sm:$0x1] %vm1129_vm10, %v1113_v44 }
 0x574   :  { %v1119_v38 = vpop.permute.xlu1 %1118 }
 0x575   :  { %1133 = vst.msk [vmem:[%s1771_s1 + $0x28] sm:$0x1] %vm1129_vm10, %v1119_v38 }

// kernel: masked_decoder_forward.12
= control target key start
LH: loop header
LB: loop body
LE: loop exit
PB: predicated region body
PF: predicated region fallthrough
CT: control target
= control target key end

     0   :  { %vm141_vm0 = vcmask 261120   ;;  %vm146_vm1 = vcmask 254976   ;;  %v439_v43 = vmov 32.0   ;;  %s640_s1 = inlined_call_operand.vmem [shape: bf16[128,32], index: 1, kind: input, shape index: {}]   ;;  %s641_s2 = inlined_call_operand.vmem [shape: f32[1,32], index: 2, kind: input, shape index: {}]   ;;  %s642_s0 = inlined_call_operand.vmem [shape: f32[34,128], index: 0, kind: input, shape index: {}]   ;;  %s643_s3 = inlined_call_operand.vmem [shape: f32[34,32], index: 3, kind: input, shape index: {}]   ;;  %s644_s8 = inlined_call_operand.vmem [shape: f32[34,32], index: 8, kind: output, shape index: {0}]   ;;  %s645_s4 = inlined_call_operand.vmem [shape: f32[1,32], index: 4, kind: input, shape index: {}]   ;;  %s646_s5 = inlined_call_operand.vmem [shape: f32[1,32], index: 5, kind: input, shape index: {}]   ;;  %s647_s7 = inlined_call_operand.vmem [shape: f32[1,96], index: 7, kind: input, shape index: {}]   ;;  %s648_s6 = inlined_call_operand.vmem [shape: bf16[32,96], index: 6, kind: input, shape index: {}]   ;;  %s649_s9 = inlined_call_operand.vmem [shape: f32[34,96], index: 9, kind: output, shape index: {1}]  }
   0x1   :  { %v403_v0 = vld [vmem:[%s640_s1 + $0x38] sm:$0xff]  ;;  %v402_v1 = vld [vmem:[%s640_s1 + $0x30] sm:$0xff]  ;;  %v401_v2 = vld [vmem:[%s640_s1 + $0x28] sm:$0xff]  ;;  %427 = vrcp.f32 %v439_v43 }
   0x2   :  { %108 = vmatpush.bf16.msra.mxu0 %v403_v0  ;;  %406 = vmatpush.bf16.msra.mxu2 %v403_v0  ;;  %v400_v3 = vld [vmem:[%s640_s1 + $0x20] sm:$0xff]  ;;  %v399_v4 = vld [vmem:[%s640_s1 + $0x18] sm:$0xff]  ;;  %v398_v5 = vld [vmem:[%s640_s1 + $0x10] sm:$0xff] }
   0x3   :  { %407 = vmatpush.bf16.msra.mxu3 %v403_v0  ;;  %v397_v6 = vld [vmem:[%s640_s1 + $0x8] sm:$0xff]  ;;  %v396_v7 = vld [vmem:[%s640_s1] sm:$0xff]  ;;  %v34_v10 = vld [vmem:[%s642_s0 + $0x10] sm:$0xff] }
   0x4   :  { %v32_v8 = vld [vmem:[%s642_s0] sm:$0xff]  ;;  %v33_v9 = vld [vmem:[%s642_s0 + $0x8] sm:$0xff]  ;;  %v35_v11 = vld [vmem:[%s642_s0 + $0x18] sm:$0xff] }
   0x5   :  { %v36_v12 = vld [vmem:[%s642_s0 + $0x20] sm:$0x3]  ;;  %v37_v13 = vpack.c.bf16 %v33_v9, %v32_v8  ;;  %v38_v14 = vpack.c.bf16 %v35_v11, %v34_v10  ;;  %v133_v23 = vld [vmem:[%s643_s3 + $0x10] sm:$0xff]  ;;  %v132_v29 = vld [vmem:[%s643_s3 + $0x8] sm:$0xff] }
   0x6   :  { %109 = vmatpush.bf16.msra.mxu0 %v402_v1  ;;  %408 = vmatpush.bf16.msra.mxu2 %v402_v1  ;;  %v39_v15 = vpack.c.bf16 %v36_v12, %v36_v12  ;;  %v423_v16 = vld [vmem:[%s641_s2] ss:$0 sm:$0xff]  ;;  %v134_v38 = vld [vmem:[%s643_s3 + $0x18] sm:$0xff]  ;;  %v405_v11 = vld [vmem:[%s648_s6 + $0x8] sm:$0xff] }
   0x7   :  { %409 = vmatpush.bf16.msra.mxu3 %v402_v1  ;;  %v131_v18 = vld [vmem:[%s643_s3] sm:$0xff]  ;;  %v428_v44 = vpop.eup %427  ;;  %321 = vmatpush.bf16.msra.mxu1 %v405_v11 }
   0x8   :  { %v135_v26 = vld [vmem:[%s643_s3 + $0x20] sm:$0x3]  ;;  %v166_v45 = vmul.f32 32.0, %v428_v44  ;;  %vm170_vm2 = vweird.f32 %v428_v44 }
   0xa   :  { %110 = vmatpush.bf16.msra.mxu0 %v401_v2  ;;  %410 = vmatpush.bf16.msra.mxu2 %v401_v2  ;;  %v167_v46 = vsub.f32 1.0, %v166_v45 }
   0xb   :  { %411 = vmatpush.bf16.msra.mxu3 %v401_v2 }
   0xc   :  { %v168_v47 = vmul.f32 %v428_v44, %v167_v46  ;;  %v424_v46 = vld [vmem:[%s645_s4] ss:$0 sm:$0xff] }
   0xe   :  { %111 = vmatpush.bf16.msra.mxu0 %v400_v3  ;;  %412 = vmatpush.bf16.msra.mxu2 %v400_v3  ;;  %v169_v48 = vadd.f32 %v428_v44, %v168_v47 }
   0xf   :  { %413 = vmatpush.bf16.msra.mxu3 %v400_v3 }
  0x10   :  { %v171_v49 = vsel %vm170_vm2, %v428_v44, %v169_v48 }
  0x12   :  { %112 = vmatpush.bf16.msra.mxu0 %v399_v4  ;;  %414 = vmatpush.bf16.msra.mxu2 %v399_v4 }
  0x13   :  { %415 = vmatpush.bf16.msra.mxu3 %v399_v4 }
  0x16   :  { %113 = vmatpush.bf16.msra.mxu0 %v398_v5  ;;  %416 = vmatpush.bf16.msra.mxu2 %v398_v5 }
  0x17   :  { %417 = vmatpush.bf16.msra.mxu3 %v398_v5 }
  0x1a   :  { %114 = vmatpush.bf16.msra.mxu0 %v397_v6  ;;  %418 = vmatpush.bf16.msra.mxu2 %v397_v6 }
  0x1b   :  { %419 = vmatpush.bf16.msra.mxu3 %v397_v6 }
  0x1e   :  { %115 = vmatpush.bf16.msra.mxu0 %v396_v7  ;;  %420 = vmatpush.bf16.msra.mxu2 %v396_v7 }
  0x1f   :  { %421 = vmatpush.bf16.msra.mxu3 %v396_v7 }
  0x21   :  { %116 = vmatmul.bf16.vlgmr.msra.gmra.mxu0 %v37_v13  ;;  %121 = vmatmul.bf16.vlgmr.msra.gmra.mxu2 %v38_v14 }
  0x22   :  { %126 = vmatmul.bf16.vlgmr.msra.gmra.mxu3 %v39_v15  ;;  %v404_v15 = vld [vmem:[%s648_s6] sm:$0xff] }
  0x23   :  { %322 = vmatpush.bf16.msra.mxu1 %v404_v15 }
  0x9e   :  { %v117_v17 = vpop.f32.mrf.mxu0 }
  0x9f   :  { %v118_v19 = vadd.f32 %v423_v16, %v117_v17 }
  0xa1   :  { %v136_v20 = vadd.f32 %v131_v18, %v118_v19 }
  0xa3   :  { %142 = vst.msk [vmem:[%s644_s8] sm:$0xff] %vm141_vm0, %v136_v20  ;;  %v150_v21 = vsel %vm141_vm0, %v136_v20, 0.0 }
  0xa4   :  { %v122_v22 = vpop.f32.mrf.mxu2  ;;  %151 = vadd.xlane.f32.xlu0 %v150_v21 }
  0xa5   :  { %v123_v24 = vadd.f32 %v423_v16, %v122_v22  ;;  %v127_v25 = vpop.f32.mrf.mxu3 }
  0xa6   :  { %v128_v27 = vadd.f32 %v423_v16, %v127_v25  ;;  %v119_v28 = vpop.f32.mrf.mxu0 }
  0xa7   :  { %v138_v30 = vadd.f32 %v133_v23, %v123_v24  ;;  %v120_v31 = vadd.f32 %v423_v16, %v119_v28 }
  0xa8   :  { %v140_v32 = vadd.f32 %v135_v26, %v128_v27 }
  0xa9   :  { %144 = vst.msk [vmem:[%s644_s8 + $0x10] sm:$0xff] %vm141_vm0, %v138_v30  ;;  %v137_v33 = vadd.f32 %v132_v29, %v120_v31  ;;  %v156_v34 = vsel %vm141_vm0, %v138_v30, 0.0 }
  0xaa   :  { %v162_v35 = vsel %vm146_vm1, %v140_v32, 0.0  ;;  %147 = vst.msk [vmem:[%s644_s8 + $0x20] sm:$0x3] %vm146_vm1, %v140_v32  ;;  %157 = vadd.xlane.f32.xlu1 %v156_v34 }
  0xab   :  { %143 = vst.msk [vmem:[%s644_s8 + $0x8] sm:$0xff] %vm141_vm0, %v137_v33  ;;  %163 = vadd.xlane.f32.xlu2 %v162_v35  ;;  %v153_v36 = vsel %vm141_vm0, %v137_v33, 0.0 }
  0xac   :  { %v124_v37 = vpop.f32.mrf.mxu2  ;;  %154 = vadd.xlane.f32.xlu0 %v153_v36 }
  0xad   :  { %v125_v39 = vadd.f32 %v423_v16, %v124_v37  ;;  %v129_v40 = vpop.f32.mrf.mxu3 }
  0xaf   :  { %v139_v41 = vadd.f32 %v134_v38, %v125_v39 }
  0xb1   :  { %145 = vst.msk [vmem:[%s644_s8 + $0x18] sm:$0xff] %vm141_vm0, %v139_v41  ;;  %v159_v42 = vsel %vm141_vm0, %v139_v41, 0.0 }
  0xb2   :  { %160 = vadd.xlane.f32.xlu1 %v159_v42 }
 0x117   :  { %v152_v50 = vpop.xlane.xlu0 %151 }
 0x118   :  { %v172_v51 = vmul.f32 %v171_v49, %v152_v50 }
 0x11a   :  { %v572_v52 = vsub.f32 %v136_v20, %v172_v51 }
 0x11c   :  { %v182_v53 = vmul.f32 %v572_v52, %v572_v52 }
 0x11d   :  { %v158_v54 = vpop.xlane.xlu1 %157 }
 0x11e   :  { %v174_v55 = vmul.f32 %v171_v49, %v158_v54  ;;  %v187_v56 = vsel %vm141_vm0, %v182_v53, 0.0  ;;  %v164_v57 = vpop.xlane.xlu2 %163 }
 0x11f   :  { %188 = vadd.xlane.f32.xlu2 %v187_v56  ;;  %v155_v58 = vpop.xlane.xlu0 %154  ;;  %v176_v61 = vmul.f32 %v171_v49, %v164_v57  ;;  %v425_v56 = vld [vmem:[%s646_s5] ss:$0 sm:$0xff] }
 0x120   :  { %v577_v59 = vsub.f32 %v138_v30, %v174_v55  ;;  %v173_v60 = vmul.f32 %v171_v49, %v155_v58 }
 0x121   :  { %v586_v3 = vsub.f32 %v140_v32, %v176_v61 }
 0x122   :  { %v579_v62 = vsub.f32 %v137_v33, %v173_v60  ;;  %v184_v63 = vmul.f32 %v577_v59, %v577_v59 }
 0x123   :  { %v186_v8 = vmul.f32 %v586_v3, %v586_v3 }
 0x124   :  { %v193_v0 = vsel %vm141_vm0, %v184_v63, 0.0  ;;  %v183_v1 = vmul.f32 %v579_v62, %v579_v62 }
 0x125   :  { %194 = vadd.xlane.f32.xlu1 %v193_v0  ;;  %v161_v2 = vpop.xlane.xlu1 %160  ;;  %v199_v10 = vsel %vm146_vm1, %v186_v8, 0.0 }
 0x126   :  { %v175_v4 = vmul.f32 %v171_v49, %v161_v2  ;;  %v190_v5 = vsel %vm141_vm0, %v183_v1, 0.0 }
 0x127   :  { %191 = vadd.xlane.f32.xlu0 %v190_v5 }
 0x128   :  { %v589_v6 = vsub.f32 %v139_v41, %v175_v4 }
 0x12a   :  { %v185_v7 = vmul.f32 %v589_v6, %v589_v6 }
 0x12c   :  { %v196_v9 = vsel %vm141_vm0, %v185_v7, 0.0 }
 0x12d   :  { %197 = vadd.xlane.f32.xlu2 %v196_v9 }
 0x12f   :  { %200 = vadd.xlane.f32.xlu0 %v199_v10 }
 0x192   :  { %v189_v12 = vpop.xlane.xlu2 %188 }
 0x193   :  { %v202_v13 = vmul.f32 %v189_v12, %v171_v49 }
 0x195   :  { %v207_v14 = vadd.f32 1e-05, %v202_v13 }
 0x197   :  { %429 = vrsqrt.f32 %v207_v14  ;;  %vm218_vm4 = vweird.f32 %v207_v14 }
 0x198   :  { %v195_v16 = vpop.xlane.xlu1 %194 }
 0x199   :  { %v204_v17 = vmul.f32 %v195_v16, %v171_v49 }
 0x19a   :  { %v192_v18 = vpop.xlane.xlu0 %191 }
 0x19b   :  { %v603_v19 = vadd.f32 1e-05, %v204_v17  ;;  %v203_v20 = vmul.f32 %v192_v18, %v171_v49 }
 0x19d   :  { %v430_v21 = vpop.eup %429  ;;  %431 = vrsqrt.f32 %v603_v19  ;;  %v208_v22 = vadd.f32 1e-05, %v203_v20  ;;  %vm238_vm13 = vweird.f32 %v603_v19 }
 0x19e   :  { %v213_v23 = vmul.f32 %v430_v21, %v207_v14  ;;  %vm219_vm3 = vweird.f32 %v430_v21 }
 0x19f   :  { %433 = vrsqrt.f32 %v208_v22  ;;  %vm220_vm5 = vmor %vm218_vm4, %vm219_vm3  ;;  %vm228_vm7 = vweird.f32 %v208_v22  ;;  %vm338_vm3 = vcmask 785408  }
 0x1a0   :  { %v214_v24 = vmul.f32 %v430_v21, %v213_v23  ;;  %v198_v25 = vpop.xlane.xlu2 %197 }
 0x1a1   :  { %v205_v26 = vmul.f32 %v198_v25, %v171_v49 }
 0x1a2   :  { %v215_v27 = vmul.f32 0.5, %v214_v24  ;;  %v201_v28 = vpop.xlane.xlu0 %200 }
 0x1a3   :  { %v432_v29 = vpop.eup %431  ;;  %v210_v30 = vadd.f32 1e-05, %v205_v26  ;;  %v206_v31 = vmul.f32 %v201_v28, %v171_v49 }
 0x1a4   :  { %v216_v32 = vsub.f32 1.5, %v215_v27  ;;  %v233_v35 = vmul.f32 %v432_v29, %v603_v19  ;;  %vm239_vm10 = vweird.f32 %v432_v29 }
 0x1a5   :  { %v434_v33 = vpop.eup %433  ;;  %435 = vrsqrt.f32 %v210_v30  ;;  %v211_v37 = vadd.f32 1e-05, %v206_v31  ;;  %vm248_vm11 = vweird.f32 %v210_v30  ;;  %vm240_vm14 = vmor %vm238_vm13, %vm239_vm10 }
 0x1a6   :  { %v217_v34 = vmul.f32 %v430_v21, %v216_v32  ;;  %v223_v36 = vmul.f32 %v434_v33, %v208_v22  ;;  %v234_v40 = vmul.f32 %v432_v29, %v233_v35  ;;  %vm229_vm6 = vweird.f32 %v434_v33 }
 0x1a7   :  { %437 = vrsqrt.f32 %v211_v37  ;;  %vm230_vm8 = vmor %vm228_vm7, %vm229_vm6  ;;  %vm258_vm1 = vweird.f32 %v211_v37 }
 0x1a8   :  { %v224_v38 = vmul.f32 %v434_v33, %v223_v36  ;;  %v221_v39 = vsel %vm220_vm5, %v430_v21, %v217_v34  ;;  %v235_v47 = vmul.f32 0.5, %v234_v40 }
 0x1a9   :  { %v262_v45 = vmul.f32 %v221_v39, %v572_v52 }
 0x1aa   :  { %v225_v41 = vmul.f32 0.5, %v224_v38  ;;  %v236_v52 = vsub.f32 1.5, %v235_v47 }
 0x1ab   :  { %v436_v42 = vpop.eup %435  ;;  %v270_v55 = vmul.f32 %v424_v46, %v262_v45 }
 0x1ac   :  { %v226_v43 = vsub.f32 1.5, %v225_v41  ;;  %v243_v44 = vmul.f32 %v436_v42, %v210_v30  ;;  %vm249_vm9 = vweird.f32 %v436_v42  ;;  %v237_v1 = vmul.f32 %v432_v29, %v236_v52 }
 0x1ad   :  { %v438_v53 = vpop.eup %437  ;;  %v278_v63 = vadd.f32 %v425_v56, %v270_v55  ;;  %vm250_vm12 = vmor %vm248_vm11, %vm249_vm9 }
 0x1ae   :  { %v227_v48 = vmul.f32 %v434_v33, %v226_v43  ;;  %v244_v49 = vmul.f32 %v436_v42, %v243_v44  ;;  %v253_v61 = vmul.f32 %v438_v53, %v211_v37  ;;  %v241_v5 = vsel %vm240_vm14, %v432_v29, %v237_v1 }
 0x1af   :  { %v264_v9 = vmul.f32 %v241_v5, %v577_v59  ;;  %vm259_vm15 = vweird.f32 %v438_v53  ;;  %v426_v59 = vld [vmem:[%s647_s7] ss:$0 sm:$0xff] }
 0x1b0   :  { %v231_v50 = vsel %vm230_vm8, %v434_v33, %v227_v48  ;;  %v245_v51 = vmul.f32 0.5, %v244_v49  ;;  %v254_v4 = vmul.f32 %v438_v53, %v253_v61  ;;  %vm260_vm2 = vmor %vm258_vm1, %vm259_vm15 }
 0x1b1   :  { %v263_v54 = vmul.f32 %v231_v50, %v579_v62  ;;  %v272_v12 = vmul.f32 %v424_v46, %v264_v9 }
 0x1b2   :  { %v246_v57 = vsub.f32 1.5, %v245_v51  ;;  %v255_v8 = vmul.f32 0.5, %v254_v4 }
 0x1b3   :  { %v271_v58 = vmul.f32 %v424_v46, %v263_v54  ;;  %v280_v15 = vadd.f32 %v425_v56, %v272_v12 }
 0x1b4   :  { %v247_v60 = vmul.f32 %v436_v42, %v246_v57  ;;  %v256_v11 = vsub.f32 1.5, %v255_v8 }
 0x1b5   :  { %v279_v0 = vadd.f32 %v425_v56, %v271_v58 }
 0x1b6   :  { %v251_v62 = vsel %vm250_vm12, %v436_v42, %v247_v60  ;;  %v257_v14 = vmul.f32 %v438_v53, %v256_v11 }
 0x1b7   :  { %v283_v2 = vpack.c.bf16 %v279_v0, %v278_v63  ;;  %v265_v7 = vmul.f32 %v251_v62, %v589_v6 }
 0x1b8   :  { %v261_v17 = vsel %vm260_vm2, %v438_v53, %v257_v14 }
 0x1b9   :  { %393 = vmatmul.msk.bf16.vlgmr.msra.gmra.mxu1 %vm141_vm0, %v283_v2  ;;  %v273_v10 = vmul.f32 %v424_v46, %v265_v7  ;;  %v266_v18 = vmul.f32 %v261_v17, %v586_v3 }
 0x1bb   :  { %v281_v13 = vadd.f32 %v425_v56, %v273_v10  ;;  %v274_v19 = vmul.f32 %v424_v46, %v266_v18 }
 0x1bd   :  { %v284_v16 = vpack.c.bf16 %v281_v13, %v280_v15  ;;  %v282_v6 = vadd.f32 %v425_v56, %v274_v19 }
 0x1bf   :  { %v285_v20 = vpack.c.bf16 %v282_v6, %v282_v6 }
 0x1c9   :  { %394 = vmatmul.msk.bf16.gmra.mxu1 %vm141_vm0, %v284_v16 }
 0x1d9   :  { %395 = vmatmul.msk.bf16.gmra.mxu1 %vm141_vm0, %v285_v20  ;;  %vm343_vm0 = vcmask 779264  }
 0x236   :  { %v324_v21 = vpop.f32.mrf.mxu1 }
 0x237   :  { %v325_v22 = vadd.f32 %v426_v59, %v324_v21 }
 0x239   :  { %339 = vst.msk [vmem:[%s649_s9] sm:$0xff] %vm338_vm3, %v325_v22 }
 0x23e   :  { %v326_v23 = vpop.f32.mrf.mxu1 }
 0x23f   :  { %v327_v24 = vadd.f32 %v426_v59, %v326_v23 }
 0x241   :  { %340 = vst.msk [vmem:[%s649_s9 + $0x8] sm:$0xff] %vm338_vm3, %v327_v24 }
 0x246   :  { %v329_v3 = vpop.f32.mrf.mxu1 }
 0x247   :  { %v330_v25 = vadd.f32 %v426_v59, %v329_v3 }
 0x249   :  { %341 = vst.msk [vmem:[%s649_s9 + $0x10] sm:$0xff] %vm338_vm3, %v330_v25 }
 0x24e   :  { %v331_v26 = vpop.f32.mrf.mxu1 }
 0x24f   :  { %v332_v27 = vadd.f32 %v426_v59, %v331_v26 }
 0x251   :  { %342 = vst.msk [vmem:[%s649_s9 + $0x18] sm:$0xff] %vm338_vm3, %v332_v27 }
 0x256   :  { %v334_v28 = vpop.f32.mrf.mxu1 }
 0x257   :  { %v335_v29 = vadd.f32 %v426_v59, %v334_v28 }
 0x259   :  { %344 = vst.msk [vmem:[%s649_s9 + $0x20] sm:$0x3] %vm343_vm0, %v335_v29 }
 0x25e   :  { %v336_v30 = vpop.f32.mrf.mxu1 }

</bundles_post_ra>
